<compile_context>
chip_gen: v7x
topology: tpu7x:2x2x1
jax: 0.10.0
libtpu: 0.0.40
codegen_flags: <defaults>
</compile_context>

<pallas_src>
import jax
import jax.numpy as jnp
from jax.experimental import pallas as pl
from jax.experimental.pallas import tpu as pltpu

# ---------------- config (small synthetic LLaVA) ----------------
VOCAB = 64        # vocab size
VOCAB_PAD = 128   # lane-dense LM-head width (sliced back to VOCAB in the wrapper)
D = 32            # text hidden
N_HEADS = 4
HEAD_DIM = D // N_HEADS
MLP_DIM = 64
N_LAYERS = 2
DV = 32           # vision hidden
V_MLP = 64
IMG = 16
CH = 3
PATCH = 8
PDIM = CH * PATCH * PATCH         # unfolded patch row width (192)
N_PATCH = (IMG // PATCH) ** 2     # 4 image tokens
T = 8             # text sequence length
B = 2             # batch
S = N_PATCH + T   # merged sequence length (image tokens + text tokens)
EPS = 1e-6

# padded (lane-dense) widths
D_PAD = 128
DV_PAD = 128
HP = 128          # per-head padded lane-group width
MLP_PAD = 128
VMLP_PAD = 128

assert N_PATCH & (N_PATCH - 1) == 0 and T & (T - 1) == 0
LOG2_NP = N_PATCH.bit_length() - 1
LOG2_T = T.bit_length() - 1


# ---------------- in-kernel math helpers (padded columns are exactly zero) ----------------
def _layernorm(x, wb, d_true, eps=1e-5):
    """LayerNorm over the true (unpadded) width; padded cols of w/b are zero."""
    w = wb[0:1, :]
    b = wb[1:2, :]
    s1 = jnp.sum(x, axis=-1, keepdims=True)
    s2 = jnp.sum(x * x, axis=-1, keepdims=True)
    mu = s1 * (1.0 / d_true)
    var = s2 * (1.0 / d_true) - mu * mu
    return (x - mu) * jax.lax.rsqrt(var + eps) * w + b


def _rmsnorm(x, w, d_true, eps=EPS):
    var = jnp.sum(x * x, axis=-1, keepdims=True) * (1.0 / d_true)
    return x * jax.lax.rsqrt(var + eps) * w


def _softmax_rows(s):
    m = jnp.max(s, axis=-1, keepdims=True)
    p = jnp.exp(s - m)
    return p * pl.reciprocal(jnp.sum(p, axis=-1, keepdims=True), approx=True)


def _mha(x, wqkv, bqkv, wo, bo, add_mask):
    """Multi-head attention on (rows, 128) slabs.

    wqkv: (128, N_HEADS*3*HP) bf16; per-head lane groups [q|k|v], scale folded into q.
    wo:   (N_HEADS*HP, 128) bf16; rows [h*HP : h*HP+head_dim] hold head h's out proj.
    All slices below are 128-lane / 128-sublane aligned -> free views, no repacking.
    """
    qkv = jnp.dot(x.astype(jnp.bfloat16), wqkv, preferred_element_type=jnp.float32)
    if bqkv is not None:
        qkv = qkv + bqkv
    out = None
    for h in range(N_HEADS):
        base = 3 * HP * h
        q = qkv[:, base:base + HP]
        k = qkv[:, base + HP:base + 2 * HP]
        v = qkv[:, base + 2 * HP:base + 3 * HP]
        s = jax.lax.dot_general(q.astype(jnp.bfloat16), k.astype(jnp.bfloat16),
                                (((1,), (1,)), ((), ())),
                                preferred_element_type=jnp.float32)
        if add_mask is not None:
            s = s + add_mask
        p = _softmax_rows(s)
        o_h = jnp.dot(p.astype(jnp.bfloat16), v.astype(jnp.bfloat16),
                      preferred_element_type=jnp.float32)
        proj = jnp.dot(o_h.astype(jnp.bfloat16), wo[h * HP:(h + 1) * HP, :],
                       preferred_element_type=jnp.float32)
        out = proj if out is None else out + proj
    if bo is not None:
        out = out + bo
    return out


# ---------------- the fused whole-model kernel ----------------
def _make_llava_kernel(nb, fold_out):
    """nb = batch elements folded into one grid step; fold_out -> 2D (B*S,128) output."""
    n_img = nb * N_PATCH
    n_txt = nb * T
    rows = n_img + n_txt

    def kernel(
        ids_ref,            # (nb*T, 1) int32, VMEM
        txtmask_ref,        # (nb, 1, T) f32
        patch_ref,          # (nb, N_PATCH, PDIM) f32
        patch_w_ref, patch_b_ref, vis_pos_ref,
        v_ln1_ref, v_qkv_w_ref, v_qkv_b_ref, v_wo_ref, v_ob_ref,
        v_ln2_ref, v_fc1_ref, v_fc1b_ref, v_fc2_ref, v_fc2b_ref,
        v_post_ln_ref,
        mm1_ref, mm1b_ref, mm2_ref, mm2b_ref,
        tok_emb_ref,
        lm_ln1_ref, lm_wqkv_ref, lm_wo_ref, lm_ln2_ref, lm_wgu_ref, lm_wdn_ref,
        final_norm_ref, lm_head_ref,
        o_ref,
    ):
        # ---------- vision tower (CLIP-like, 1 pre-LN block; patch conv == matmul) ----------
        if nb == 1:
            px = patch_ref[0]                                                # (N_PATCH, PDIM)
            vpos = vis_pos_ref[...]
            vis_mask = None
        else:
            px = jnp.concatenate([patch_ref[i] for i in range(nb)], axis=0)  # (n_img, PDIM)
            vpos = jnp.concatenate([vis_pos_ref[...]] * nb, axis=0)
            rv = jax.lax.broadcasted_iota(jnp.int32, (n_img, n_img), 0) >> LOG2_NP
            cv = jax.lax.broadcasted_iota(jnp.int32, (n_img, n_img), 1) >> LOG2_NP
            vis_mask = jnp.where(rv == cv, 0.0, -1e9)                        # block-diag

        h = jnp.dot(px.astype(jnp.bfloat16), patch_w_ref[...],
                    preferred_element_type=jnp.float32)
        h = h + patch_b_ref[...] + vpos                                      # (n_img, 128)

        hn = _layernorm(h, v_ln1_ref[...], DV)
        h = h + _mha(hn, v_qkv_w_ref[...], v_qkv_b_ref[...],
                     v_wo_ref[...], v_ob_ref[...], vis_mask)
        hn = _layernorm(h, v_ln2_ref[...], DV)
        # TODO(synk): PyTorch nn.GELU defaults to exact erf; jax.nn.gelu here is tanh-approx.
        f = jax.nn.gelu(jnp.dot(hn.astype(jnp.bfloat16), v_fc1_ref[...],
                                preferred_element_type=jnp.float32) + v_fc1b_ref[...])
        h = h + jnp.dot(f.astype(jnp.bfloat16), v_fc2_ref[...],
                        preferred_element_type=jnp.float32) + v_fc2b_ref[...]
        h = _layernorm(h, v_post_ln_ref[...], DV)

        # ---------- multimodal projector (linear -> gelu -> linear) ----------
        img = jax.nn.gelu(jnp.dot(h.astype(jnp.bfloat16), mm1_ref[...],
                                  preferred_element_type=jnp.float32) + mm1b_ref[...])
        img = jnp.dot(img.astype(jnp.bfloat16), mm2_ref[...],
                      preferred_element_type=jnp.float32) + mm2b_ref[...]    # (n_img, 128)

        # ---------- token embedding: vectorized one-hot -> MXU ----------
        ids_col = ids_ref[...]                                               # (n_txt, 1)
        onehot = (jax.lax.broadcasted_iota(jnp.int32, (n_txt, VOCAB_PAD), 1)
                  == ids_col).astype(jnp.bfloat16)
        tok = jnp.dot(onehot, tok_emb_ref[...],
                      preferred_element_type=jnp.float32)                    # (n_txt, 128)

        # ---------- merged sequence: grouped layout [all image rows; all text rows] ----------
        # TODO(synk): real LLaVA scatters image features into <image> placeholder positions;
        # image tokens are prepended to each text sequence here instead.
        x = jnp.concatenate([img, tok], axis=0)                              # (rows, 128)

        # ---------- additive mask: per-batch block diagonal + causal + text padding ----------
        r_idx = jax.lax.broadcasted_iota(jnp.int32, (rows, 1), 0)
        c_idx = jax.lax.broadcasted_iota(jnp.int32, (1, rows), 1)

        def batch_pos(idx):
            is_img = idx < n_img
            t_idx = jnp.maximum(idx - n_img, 0)
            bi = jnp.where(is_img, idx >> LOG2_NP, t_idx >> LOG2_T)
            pi = jnp.where(is_img, idx & (N_PATCH - 1), N_PATCH + (t_idx & (T - 1)))
            return bi, pi

        b_r, p_r = batch_pos(r_idx)
        b_c, p_c = batch_pos(c_idx)
        txt_valid = jnp.concatenate([txtmask_ref[i] for i in range(nb)], axis=1)  # (1, n_txt)
        valid = jnp.concatenate(
            [jnp.ones((1, n_img), jnp.float32), txt_valid], axis=1)               # (1, rows)
        pad_bias = jnp.where(valid == 0.0, -1e9, 0.0)
        add_mask = jnp.where((b_r == b_c) & (p_c <= p_r), 0.0, -1e9) + pad_bias

        # ---------- language model (LLaMA-like, pre-RMSNorm) ----------
        for li in range(N_LAYERS):
            xn = _rmsnorm(x, lm_ln1_ref[li:li + 1, :], D)
            x = x + _mha(xn, lm_wqkv_ref[li], None, lm_wo_ref[li], None, add_mask)
            xn = _rmsnorm(x, lm_ln2_ref[li:li + 1, :], D)
            gu = jnp.dot(xn.astype(jnp.bfloat16), lm_wgu_ref[li],
                         preferred_element_type=jnp.float32)                 # (rows, 256)
            g = gu[:, :MLP_PAD]          # 128-lane aligned split
            u = gu[:, MLP_PAD:]
            x = x + jnp.dot((g * jax.nn.sigmoid(g) * u).astype(jnp.bfloat16),
                            lm_wdn_ref[li], preferred_element_type=jnp.float32)

        x = _rmsnorm(x, final_norm_ref[...], D)
        logits = jnp.dot(x.astype(jnp.bfloat16), lm_head_ref[...],
                         preferred_element_type=jnp.float32)                 # (rows, 128)

        if fold_out:
            o_ref[...] = logits.astype(o_ref.dtype)      # (B*S, 128) lane-dense store
        else:
            o_ref[0] = logits.astype(o_ref.dtype)        # (S, 128) for this batch element

    return kernel


# ---------------- BlockSpec helper ----------------
def _full_spec(shape):
    nd = len(shape)
    return pl.BlockSpec(tuple(shape), lambda bb, _nd=nd: (0,) * _nd)


# ---------------- deterministic parameter init (PyTorch-like, unpacked) ----------------
def init_params(key):
    keys = iter(jax.random.split(key, 128))

    def nrm(shape, scale=0.02):
        return scale * jax.random.normal(next(keys), shape, jnp.float32)

    p = {}
    # vision tower (CLIP-like, 1 pre-LN encoder block)
    p["patch_w"] = nrm((PDIM, DV))                    # conv patch-embed as matmul
    p["patch_b"] = jnp.zeros((DV,), jnp.float32)
    p["vis_pos"] = nrm((N_PATCH, DV))
    p["v_ln1_w"] = jnp.ones((DV,), jnp.float32)
    p["v_ln1_b"] = jnp.zeros((DV,), jnp.float32)
    for n in ("q", "k", "v", "o"):
        p[f"v_{n}"] = nrm((DV, DV))
        p[f"v_{n}b"] = jnp.zeros((DV,), jnp.float32)
    p["v_ln2_w"] = jnp.ones((DV,), jnp.float32)
    p["v_ln2_b"] = jnp.zeros((DV,), jnp.float32)
    p["v_fc1"] = nrm((DV, V_MLP))
    p["v_fc1b"] = jnp.zeros((V_MLP,), jnp.float32)
    p["v_fc2"] = nrm((V_MLP, DV))
    p["v_fc2b"] = jnp.zeros((DV,), jnp.float32)
    p["v_post_ln_w"] = jnp.ones((DV,), jnp.float32)
    p["v_post_ln_b"] = jnp.zeros((DV,), jnp.float32)
    # multimodal projector (linear -> gelu -> linear)
    p["mm1"] = nrm((DV, D))
    p["mm1b"] = jnp.zeros((D,), jnp.float32)
    p["mm2"] = nrm((D, D))
    p["mm2b"] = jnp.zeros((D,), jnp.float32)
    # language model (LLaMA-like)
    p["tok_emb"] = nrm((VOCAB, D))
    p["layers"] = []
    for _ in range(N_LAYERS):
        p["layers"].append(
            dict(
                ln1=jnp.ones((D,), jnp.float32),
                wq=nrm((D, D)),
                wk=nrm((D, D)),
                wv=nrm((D, D)),
                wo=nrm((D, D)),
                ln2=jnp.ones((D,), jnp.float32),
                w_gate=nrm((D, MLP_DIM)),
                w_up=nrm((D, MLP_DIM)),
                w_down=nrm((MLP_DIM, D)),
            )
        )
    p["final_norm"] = jnp.ones((D,), jnp.float32)
    p["lm_head"] = nrm((D, VOCAB))
    return p


# ---------------- one-time weight packing (hoisted out of the forward) ----------------
def _pad2(a, rows, cols):
    return jnp.pad(a, ((0, rows - a.shape[0]), (0, cols - a.shape[1])))


def _pack_qkv(wq, wk, wv, in_pad, scale, bq=None, bk=None, bv=None):
    """(in, out) weights -> (in_pad, N_HEADS*3*HP) with per-head 128-lane [q|k|v] groups.

    The 1/sqrt(head_dim) attention scale is folded into the q weights (and q bias)."""
    dm_out = wq.shape[1]
    hd = dm_out // N_HEADS
    w_groups, b_groups = [], []
    for h in range(N_HEADS):
        cols = slice(h * hd, (h + 1) * hd)
        for w, b, s in ((wq, bq, scale), (wk, bk, 1.0), (wv, bv, 1.0)):
            w_groups.append(_pad2(w[:, cols] * s, in_pad, HP))
            if bq is not None:
                b_groups.append(_pad2((b[cols] * s).reshape(1, hd), 1, HP))
    wp = jnp.concatenate(w_groups, axis=1)
    bp = jnp.concatenate(b_groups, axis=1) if bq is not None else None
    return wp, bp


def _pack_wo(wo, out_pad):
    """(dm, dm) out-proj -> (N_HEADS*HP, out_pad), rows h*HP..h*HP+hd hold head h."""
    dm = wo.shape[0]
    hd = dm // N_HEADS
    blocks = [_pad2(wo[h * hd:(h + 1) * hd, :], HP, out_pad) for h in range(N_HEADS)]
    return jnp.concatenate(blocks, axis=0)


def pack_params(p):
    bf = jnp.bfloat16
    scale = 1.0 / (HEAD_DIM ** 0.5)

    def ln_pair(w, b, width):
        return _pad2(jnp.stack([w, b]), 2, width)

    v_qkv_w, v_qkv_b = _pack_qkv(p["v_q"], p["v_k"], p["v_v"], DV_PAD, scale,
                                 p["v_qb"], p["v_kb"], p["v_vb"])

    weights = [
        _pad2(p["patch_w"], PDIM, DV_PAD).astype(bf),
        _pad2(p["patch_b"].reshape(1, -1), 1, DV_PAD),
        _pad2(p["vis_pos"], N_PATCH, DV_PAD),
        ln_pair(p["v_ln1_w"], p["v_ln1_b"], DV_PAD),
        v_qkv_w.astype(bf),
        v_qkv_b,
        _pack_wo(p["v_o"], DV_PAD).astype(bf),
        _pad2(p["v_ob"].reshape(1, -1), 1, DV_PAD),
        ln_pair(p["v_ln2_w"], p["v_ln2_b"], DV_PAD),
        _pad2(p["v_fc1"], DV_PAD, VMLP_PAD).astype(bf),
        _pad2(p["v_fc1b"].reshape(1, -1), 1, VMLP_PAD),
        _pad2(p["v_fc2"], VMLP_PAD, DV_PAD).astype(bf),
        _pad2(p["v_fc2b"].reshape(1, -1), 1, DV_PAD),
        ln_pair(p["v_post_ln_w"], p["v_post_ln_b"], DV_PAD),
        _pad2(p["mm1"], DV_PAD, D_PAD).astype(bf),
        _pad2(p["mm1b"].reshape(1, -1), 1, D_PAD),
        _pad2(p["mm2"], D_PAD, D_PAD).astype(bf),
        _pad2(p["mm2b"].reshape(1, -1), 1, D_PAD),
        _pad2(p["tok_emb"], VOCAB_PAD, D_PAD).astype(bf),
        jnp.stack([jnp.pad(l["ln1"], (0, D_PAD - D)) for l in p["layers"]]),
        jnp.stack([_pack_qkv(l["wq"], l["wk"], l["wv"], D_PAD, scale)[0]
                   for l in p["layers"]]).astype(bf),
        jnp.stack([_pack_wo(l["wo"], D_PAD) for l in p["layers"]]).astype(bf),
        jnp.stack([jnp.pad(l["ln2"], (0, D_PAD - D)) for l in p["layers"]]),
        jnp.stack([jnp.concatenate([_pad2(l["w_gate"], D_PAD, MLP_PAD),
                                    _pad2(l["w_up"], D_PAD, MLP_PAD)], axis=1)
                   for l in p["layers"]]).astype(bf),
        jnp.stack([_pad2(l["w_down"], MLP_PAD, D_PAD) for l in p["layers"]]).astype(bf),
        _pad2(p["final_norm"].reshape(1, -1), 1, D_PAD),
        _pad2(p["lm_head"], D_PAD, VOCAB_PAD).astype(bf),
    ]
    return weights


# ---------------- batch-grouping policy (device-aware) ----------------
def _batch_group_size(bsz):
    """Single-TC chips (v5e/v6e): fold the whole batch into one grid step (per-step
    overhead dominates at these shapes). Multi-core chips (v7x): one batch element per
    grid step so the "parallel" grid axis is split across TensorCores."""
    try:
        kind = jax.devices()[0].device_kind.lower()
    except Exception:
        kind = ""
    if "v7" in kind or "7x" in kind:
        return 1
    return bsz


# ---------------- LLaVA-style forward (single fused pallas_call) ----------------
def llava_forward(packed, input_ids, attention_mask, pixel_values):
    bsz, t = input_ids.shape
    assert t == T and S == N_PATCH + T
    nb = _batch_group_size(bsz)
    assert nb in (1, bsz) and bsz % nb == 0
    fold_out = nb > 1

    # layout glue only: unfold NCHW image into non-overlapping patch rows
    patches = pixel_values.reshape(bsz, CH, IMG // PATCH, PATCH, IMG // PATCH, PATCH)
    patches = patches.transpose(0, 2, 4, 1, 3, 5).reshape(bsz, N_PATCH, PDIM)
    ids_col = input_ids.astype(jnp.int32).reshape(bsz * T, 1)
    txt_mask = attention_mask.astype(jnp.float32).reshape(bsz, 1, T)

    in_specs = [
        pl.BlockSpec((nb * T, 1), lambda bb: (bb, 0)),
        pl.BlockSpec((nb, 1, T), lambda bb: (bb, 0, 0)),
        pl.BlockSpec((nb, N_PATCH, PDIM), lambda bb: (bb, 0, 0)),
    ] + [_full_spec(w.shape) for w in packed]

    if fold_out:
        out_shape = jax.ShapeDtypeStruct((bsz * S, VOCAB_PAD), jnp.float32)
        out_spec = pl.BlockSpec((bsz * S, VOCAB_PAD), lambda bb: (0, 0))
    else:
        out_shape = jax.ShapeDtypeStruct((bsz, S, VOCAB_PAD), jnp.float32)
        out_spec = pl.BlockSpec((1, S, VOCAB_PAD), lambda bb: (bb, 0, 0))

    out = pl.pallas_call(
        _make_llava_kernel(nb, fold_out),
        grid_spec=pltpu.PrefetchScalarGridSpec(
            num_scalar_prefetch=0,
            grid=(bsz // nb,),
            in_specs=in_specs,
            out_specs=out_spec,
        ),
        out_shape=out_shape,
        compiler_params=pltpu.CompilerParams(dimension_semantics=("parallel",)),
    )(ids_col, txt_mask, patches, *packed)

    if fold_out:
        # grouped row order [img_b0..img_bN, tok_b0..tok_bN] -> (B, S, VOCAB_PAD)
        img_part = out[:bsz * N_PATCH].reshape(bsz, N_PATCH, VOCAB_PAD)
        tok_part = out[bsz * N_PATCH:].reshape(bsz, T, VOCAB_PAD)
        out = jnp.concatenate([img_part, tok_part], axis=1)
    return out[:, :, :VOCAB]


class Wrapper:
    """Mirrors the PyTorch Wrapper: forward(input_ids, attention_mask, pixel_values) -> logits."""

    def __init__(self, params):
        # weight packing (QKV fuse, per-head lane padding, gate/up fuse, bf16 cast,
        # attention-scale folding) done once here, not per forward call.
        self.packed = pack_params(params)

    def __call__(self, input_ids, attention_mask, pixel_values):
        return llava_forward(self.packed, input_ids, attention_mask, pixel_values)


if __name__ == "__main__":
    key = jax.random.PRNGKey(0)
    kp, ki, kv = jax.random.split(key, 3)
    params = init_params(kp)

    input_ids = jax.random.randint(ki, (B, T), 0, VOCAB, dtype=jnp.int32)
    attention_mask = jnp.ones((B, T), jnp.int32).at[1, T - 2:].set(0)  # exercise padding
    pixel_values = jax.random.normal(kv, (B, CH, IMG, IMG), jnp.float32)  # NCHW

    model = Wrapper(params)
    logits = jax.jit(model.__call__)(input_ids, attention_mask, pixel_values)
    jax.block_until_ready(logits)

    assert logits.shape == (B, S, VOCAB), logits.shape
    assert bool(jnp.all(jnp.isfinite(logits)))
    print("KERNEL_OK")
</pallas_src>

<mosaic_0001>
module attributes {stable_mosaic.version = 11 : i64} {
  func.func @kernel(%arg0: i32, %arg1: memref<16x1xi32, #tpu.memory_space<vmem>>, %arg2: memref<2x1x8xf32, #tpu.memory_space<vmem>>, %arg3: memref<2x4x192xf32, #tpu.memory_space<vmem>>, %arg4: memref<192x128xbf16, #tpu.memory_space<vmem>>, %arg5: memref<1x128xf32, #tpu.memory_space<vmem>>, %arg6: memref<4x128xf32, #tpu.memory_space<vmem>>, %arg7: memref<2x128xf32, #tpu.memory_space<vmem>>, %arg8: memref<128x1536xbf16, #tpu.memory_space<vmem>>, %arg9: memref<1x1536xf32, #tpu.memory_space<vmem>>, %arg10: memref<512x128xbf16, #tpu.memory_space<vmem>>, %arg11: memref<1x128xf32, #tpu.memory_space<vmem>>, %arg12: memref<2x128xf32, #tpu.memory_space<vmem>>, %arg13: memref<128x128xbf16, #tpu.memory_space<vmem>>, %arg14: memref<1x128xf32, #tpu.memory_space<vmem>>, %arg15: memref<128x128xbf16, #tpu.memory_space<vmem>>, %arg16: memref<1x128xf32, #tpu.memory_space<vmem>>, %arg17: memref<2x128xf32, #tpu.memory_space<vmem>>, %arg18: memref<128x128xbf16, #tpu.memory_space<vmem>>, %arg19: memref<1x128xf32, #tpu.memory_space<vmem>>, %arg20: memref<128x128xbf16, #tpu.memory_space<vmem>>, %arg21: memref<1x128xf32, #tpu.memory_space<vmem>>, %arg22: memref<128x128xbf16, #tpu.memory_space<vmem>>, %arg23: memref<2x128xf32, #tpu.memory_space<vmem>>, %arg24: memref<2x128x1536xbf16, #tpu.memory_space<vmem>>, %arg25: memref<2x512x128xbf16, #tpu.memory_space<vmem>>, %arg26: memref<2x128xf32, #tpu.memory_space<vmem>>, %arg27: memref<2x128x256xbf16, #tpu.memory_space<vmem>>, %arg28: memref<2x128x128xbf16, #tpu.memory_space<vmem>>, %arg29: memref<1x128xf32, #tpu.memory_space<vmem>>, %arg30: memref<128x128xbf16, #tpu.memory_space<vmem>>, %arg31: memref<24x128xf32, #tpu.memory_space<vmem>>) attributes {dimension_semantics = [#tpu.dimension_semantics<parallel>], iteration_bounds = array<i64: 1>, scalar_prefetch = 0 : i64, scratch_operands = 0 : i64, tpu.core_type = #tpu.core_type<tc>, window_params = [{transform_indices = @transform_0, window_bounds = array<i64: 16, 1>}, {transform_indices = @transform_1, window_bounds = array<i64: 2, 1, 8>}, {transform_indices = @transform_2, window_bounds = array<i64: 2, 4, 192>}, {pipeline_mode = #tpu.pipeline_mode<synchronous>, transform_indices = @transform_3, window_bounds = array<i64: 192, 128>}, {pipeline_mode = #tpu.pipeline_mode<synchronous>, transform_indices = @transform_4, window_bounds = array<i64: 1, 128>}, {pipeline_mode = #tpu.pipeline_mode<synchronous>, transform_indices = @transform_5, window_bounds = array<i64: 4, 128>}, {pipeline_mode = #tpu.pipeline_mode<synchronous>, transform_indices = @transform_6, window_bounds = array<i64: 2, 128>}, {pipeline_mode = #tpu.pipeline_mode<synchronous>, transform_indices = @transform_7, window_bounds = array<i64: 128, 1536>}, {pipeline_mode = #tpu.pipeline_mode<synchronous>, transform_indices = @transform_8, window_bounds = array<i64: 1, 1536>}, {pipeline_mode = #tpu.pipeline_mode<synchronous>, transform_indices = @transform_9, window_bounds = array<i64: 512, 128>}, {pipeline_mode = #tpu.pipeline_mode<synchronous>, transform_indices = @transform_10, window_bounds = array<i64: 1, 128>}, {pipeline_mode = #tpu.pipeline_mode<synchronous>, transform_indices = @transform_11, window_bounds = array<i64: 2, 128>}, {pipeline_mode = #tpu.pipeline_mode<synchronous>, transform_indices = @transform_12, window_bounds = array<i64: 128, 128>}, {pipeline_mode = #tpu.pipeline_mode<synchronous>, transform_indices = @transform_13, window_bounds = array<i64: 1, 128>}, {pipeline_mode = #tpu.pipeline_mode<synchronous>, transform_indices = @transform_14, window_bounds = array<i64: 128, 128>}, {pipeline_mode = #tpu.pipeline_mode<synchronous>, transform_indices = @transform_15, window_bounds = array<i64: 1, 128>}, {pipeline_mode = #tpu.pipeline_mode<synchronous>, transform_indices = @transform_16, window_bounds = array<i64: 2, 128>}, {pipeline_mode = #tpu.pipeline_mode<synchronous>, transform_indices = @transform_17, window_bounds = array<i64: 128, 128>}, {pipeline_mode = #tpu.pipeline_mode<synchronous>, transform_indices = @transform_18, window_bounds = array<i64: 1, 128>}, {pipeline_mode = #tpu.pipeline_mode<synchronous>, transform_indices = @transform_19, window_bounds = array<i64: 128, 128>}, {pipeline_mode = #tpu.pipeline_mode<synchronous>, transform_indices = @transform_20, window_bounds = array<i64: 1, 128>}, {pipeline_mode = #tpu.pipeline_mode<synchronous>, transform_indices = @transform_21, window_bounds = array<i64: 128, 128>}, {pipeline_mode = #tpu.pipeline_mode<synchronous>, transform_indices = @transform_22, window_bounds = array<i64: 2, 128>}, {pipeline_mode = #tpu.pipeline_mode<synchronous>, transform_indices = @transform_23, window_bounds = array<i64: 2, 128, 1536>}, {pipeline_mode = #tpu.pipeline_mode<synchronous>, transform_indices = @transform_24, window_bounds = array<i64: 2, 512, 128>}, {pipeline_mode = #tpu.pipeline_mode<synchronous>, transform_indices = @transform_25, window_bounds = array<i64: 2, 128>}, {pipeline_mode = #tpu.pipeline_mode<synchronous>, transform_indices = @transform_26, window_bounds = array<i64: 2, 128, 256>}, {pipeline_mode = #tpu.pipeline_mode<synchronous>, transform_indices = @transform_27, window_bounds = array<i64: 2, 128, 128>}, {pipeline_mode = #tpu.pipeline_mode<synchronous>, transform_indices = @transform_28, window_bounds = array<i64: 1, 128>}, {pipeline_mode = #tpu.pipeline_mode<synchronous>, transform_indices = @transform_29, window_bounds = array<i64: 128, 128>}, {pipeline_mode = #tpu.pipeline_mode<synchronous>, transform_indices = @transform_30, window_bounds = array<i64: 24, 128>}]} {
    %c0 = arith.constant 0 : index
    %c0_0 = arith.constant 0 : index
    %c0_1 = arith.constant 0 : index
    %0 = vector.load %arg3[%c0, %c0_0, %c0_1] : memref<2x4x192xf32, #tpu.memory_space<vmem>>, vector<1x4x192xf32>
    %1 = vector.shape_cast %0 : vector<1x4x192xf32> to vector<4x192xf32>
    %c1 = arith.constant 1 : index
    %c0_2 = arith.constant 0 : index
    %c0_3 = arith.constant 0 : index
    %2 = vector.load %arg3[%c1, %c0_2, %c0_3] : memref<2x4x192xf32, #tpu.memory_space<vmem>>, vector<1x4x192xf32>
    %3 = vector.shape_cast %2 : vector<1x4x192xf32> to vector<4x192xf32>
    %4 = tpu.concatenate %1, %3 in 0 : vector<4x192xf32>, vector<4x192xf32> -> vector<8x192xf32>
    %c0_4 = arith.constant 0 : index
    %c0_5 = arith.constant 0 : index
    %5 = vector.load %arg6[%c0_4, %c0_5] : memref<4x128xf32, #tpu.memory_space<vmem>>, vector<4x128xf32>
    %6 = tpu.concatenate %5, %5 in 0 : vector<4x128xf32>, vector<4x128xf32> -> vector<8x128xf32>
    %7 = tpu.iota {dimensions = array<i32: 0>} : vector<8x8xi32>
    %c2_i32 = arith.constant 2 : i32
    %8 = vector.broadcast %c2_i32 : i32 to vector<8x8xi32>
    %9 = arith.shrsi %7, %8 : vector<8x8xi32>
    %10 = tpu.iota {dimensions = array<i32: 1>} : vector<8x8xi32>
    %c2_i32_6 = arith.constant 2 : i32
    %11 = vector.broadcast %c2_i32_6 : i32 to vector<8x8xi32>
    %12 = arith.shrsi %10, %11 : vector<8x8xi32>
    %13 = arith.cmpi eq, %9, %12 : vector<8x8xi32>
    %cst = arith.constant 0.000000e+00 : f32
    %cst_7 = arith.constant -1.000000e+09 : f32
    %14 = vector.broadcast %cst : f32 to vector<8x8xf32>
    %15 = vector.broadcast %cst_7 : f32 to vector<8x8xf32>
    %16 = arith.select %13, %14, %15 : vector<8x8xi1>, vector<8x8xf32>
    %17 = arith.truncf %4 : vector<8x192xf32> to vector<8x192xbf16>
    %c0_8 = arith.constant 0 : index
    %c0_9 = arith.constant 0 : index
    %18 = vector.load %arg4[%c0_8, %c0_9] : memref<192x128xbf16, #tpu.memory_space<vmem>>, vector<192x128xbf16>
    %cst_10 = arith.constant dense<0.000000e+00> : vector<8x128xf32>
    %19 = tpu.matmul %17, %18, %cst_10 {dimension_numbers = #tpu.dot_dimension_numbers<[1], [0], [0], [1], [0, 0, 1, 1], [], []>} : vector<8x192xbf16>, vector<192x128xbf16>, vector<8x128xf32> -> vector<8x128xf32>
    %c0_11 = arith.constant 0 : index
    %c0_12 = arith.constant 0 : index
    %20 = vector.load %arg5[%c0_11, %c0_12] : memref<1x128xf32, #tpu.memory_space<vmem>>, vector<1x128xf32>
    %21 = vector.broadcast %20 : vector<1x128xf32> to vector<8x128xf32>
    %22 = arith.addf %19, %21 : vector<8x128xf32>
    %23 = arith.addf %22, %6 : vector<8x128xf32>
    %c0_13 = arith.constant 0 : index
    %c0_14 = arith.constant 0 : index
    %24 = vector.load %arg7[%c0_13, %c0_14] : memref<2x128xf32, #tpu.memory_space<vmem>>, vector<2x128xf32>
    %25 = vector.extract_strided_slice %24 {offsets = [0, 0], sizes = [1, 128], strides = [1, 1]} : vector<2x128xf32> to vector<1x128xf32>
    %26 = vector.extract_strided_slice %24 {offsets = [1, 0], sizes = [1, 128], strides = [1, 1]} : vector<2x128xf32> to vector<1x128xf32>
    %cst_15 = arith.constant dense<0.000000e+00> : vector<8xf32>
    %27 = vector.multi_reduction <add>, %23, %cst_15 [1] : vector<8x128xf32> to vector<8xf32>
    %28 = vector.shape_cast %27 : vector<8xf32> to vector<8x1xf32>
    %29 = arith.mulf %23, %23 : vector<8x128xf32>
    %cst_16 = arith.constant dense<0.000000e+00> : vector<8xf32>
    %30 = vector.multi_reduction <add>, %29, %cst_16 [1] : vector<8x128xf32> to vector<8xf32>
    %31 = vector.shape_cast %30 : vector<8xf32> to vector<8x1xf32>
    %cst_17 = arith.constant 3.125000e-02 : f32
    %32 = vector.broadcast %cst_17 : f32 to vector<8x1xf32>
    %33 = arith.mulf %28, %32 : vector<8x1xf32>
    %cst_18 = arith.constant 3.125000e-02 : f32
    %34 = vector.broadcast %cst_18 : f32 to vector<8x1xf32>
    %35 = arith.mulf %31, %34 : vector<8x1xf32>
    %36 = arith.mulf %33, %33 : vector<8x1xf32>
    %37 = arith.subf %35, %36 : vector<8x1xf32>
    %38 = vector.broadcast %33 : vector<8x1xf32> to vector<8x128xf32>
    %39 = arith.subf %23, %38 : vector<8x128xf32>
    %cst_19 = arith.constant 9.99999974E-6 : f32
    %40 = vector.broadcast %cst_19 : f32 to vector<8x1xf32>
    %41 = arith.addf %37, %40 : vector<8x1xf32>
    %42 = math.rsqrt %41 : vector<8x1xf32>
    %43 = vector.broadcast %42 : vector<8x1xf32> to vector<8x128xf32>
    %44 = arith.mulf %39, %43 : vector<8x128xf32>
    %45 = vector.broadcast %25 : vector<1x128xf32> to vector<8x128xf32>
    %46 = arith.mulf %44, %45 : vector<8x128xf32>
    %47 = vector.broadcast %26 : vector<1x128xf32> to vector<8x128xf32>
    %48 = arith.addf %46, %47 : vector<8x128xf32>
    %c0_20 = arith.constant 0 : index
    %c0_21 = arith.constant 0 : index
    %49 = vector.load %arg8[%c0_20, %c0_21] : memref<128x1536xbf16, #tpu.memory_space<vmem>>, vector<128x1536xbf16>
    %c0_22 = arith.constant 0 : index
    %c0_23 = arith.constant 0 : index
    %50 = vector.load %arg9[%c0_22, %c0_23] : memref<1x1536xf32, #tpu.memory_space<vmem>>, vector<1x1536xf32>
    %c0_24 = arith.constant 0 : index
    %c0_25 = arith.constant 0 : index
    %51 = vector.load %arg10[%c0_24, %c0_25] : memref<512x128xbf16, #tpu.memory_space<vmem>>, vector<512x128xbf16>
    %c0_26 = arith.constant 0 : index
    %c0_27 = arith.constant 0 : index
    %52 = vector.load %arg11[%c0_26, %c0_27] : memref<1x128xf32, #tpu.memory_space<vmem>>, vector<1x128xf32>
    %53 = arith.truncf %48 : vector<8x128xf32> to vector<8x128xbf16>
    %cst_28 = arith.constant dense<0.000000e+00> : vector<8x1536xf32>
    %54 = tpu.matmul %53, %49, %cst_28 {dimension_numbers = #tpu.dot_dimension_numbers<[1], [0], [0], [1], [0, 0, 1, 1], [], []>} : vector<8x128xbf16>, vector<128x1536xbf16>, vector<8x1536xf32> -> vector<8x1536xf32>
    %55 = vector.broadcast %50 : vector<1x1536xf32> to vector<8x1536xf32>
    %56 = arith.addf %54, %55 : vector<8x1536xf32>
    %57 = vector.extract_strided_slice %56 {offsets = [0, 0], sizes = [8, 128], strides = [1, 1]} : vector<8x1536xf32> to vector<8x128xf32>
    %58 = vector.extract_strided_slice %56 {offsets = [0, 128], sizes = [8, 128], strides = [1, 1]} : vector<8x1536xf32> to vector<8x128xf32>
    %59 = vector.extract_strided_slice %56 {offsets = [0, 256], sizes = [8, 128], strides = [1, 1]} : vector<8x1536xf32> to vector<8x128xf32>
    %60 = arith.truncf %57 : vector<8x128xf32> to vector<8x128xbf16>
    %61 = arith.truncf %58 : vector<8x128xf32> to vector<8x128xbf16>
    %cst_29 = arith.constant dense<0.000000e+00> : vector<8x8xf32>
    %62 = tpu.matmul %60, %61, %cst_29 {dimension_numbers = #tpu.dot_dimension_numbers<[1], [1], [0], [0], [0, 0, 1, 0], [], []>} : vector<8x128xbf16>, vector<8x128xbf16>, vector<8x8xf32> -> vector<8x8xf32>
    %63 = arith.addf %62, %16 : vector<8x8xf32>
    %cst_30 = arith.constant dense<0xFF800000> : vector<8xf32>
    %64 = vector.multi_reduction <maximumf>, %63, %cst_30 [1] : vector<8x8xf32> to vector<8xf32>
    %65 = vector.shape_cast %64 : vector<8xf32> to vector<8x1xf32>
    %66 = vector.broadcast %65 : vector<8x1xf32> to vector<8x8xf32>
    %67 = arith.subf %63, %66 : vector<8x8xf32>
    %68 = math.exp %67 : vector<8x8xf32>
    %cst_31 = arith.constant dense<0.000000e+00> : vector<8xf32>
    %69 = vector.multi_reduction <add>, %68, %cst_31 [1] : vector<8x8xf32> to vector<8xf32>
    %70 = vector.shape_cast %69 : vector<8xf32> to vector<8x1xf32>
    %71 = tpu.reciprocal %70 {approx = true} : vector<8x1xf32> -> vector<8x1xf32>
    %72 = vector.broadcast %71 : vector<8x1xf32> to vector<8x8xf32>
    %73 = arith.mulf %68, %72 : vector<8x8xf32>
    %74 = arith.truncf %73 : vector<8x8xf32> to vector<8x8xbf16>
    %75 = arith.truncf %59 : vector<8x128xf32> to vector<8x128xbf16>
    %cst_32 = arith.constant dense<0.000000e+00> : vector<8x128xf32>
    %76 = tpu.matmul %74, %75, %cst_32 {dimension_numbers = #tpu.dot_dimension_numbers<[1], [0], [0], [1], [0, 0, 1, 1], [], []>} : vector<8x8xbf16>, vector<8x128xbf16>, vector<8x128xf32> -> vector<8x128xf32>
    %77 = arith.truncf %76 : vector<8x128xf32> to vector<8x128xbf16>
    %78 = vector.extract_strided_slice %51 {offsets = [0, 0], sizes = [128, 128], strides = [1, 1]} : vector<512x128xbf16> to vector<128x128xbf16>
    %cst_33 = arith.constant dense<0.000000e+00> : vector<8x128xf32>
    %79 = tpu.matmul %77, %78, %cst_33 {dimension_numbers = #tpu.dot_dimension_numbers<[1], [0], [0], [1], [0, 0, 1, 1], [], []>} : vector<8x128xbf16>, vector<128x128xbf16>, vector<8x128xf32> -> vector<8x128xf32>
    %80 = vector.extract_strided_slice %56 {offsets = [0, 384], sizes = [8, 128], strides = [1, 1]} : vector<8x1536xf32> to vector<8x128xf32>
    %81 = vector.extract_strided_slice %56 {offsets = [0, 512], sizes = [8, 128], strides = [1, 1]} : vector<8x1536xf32> to vector<8x128xf32>
    %82 = vector.extract_strided_slice %56 {offsets = [0, 640], sizes = [8, 128], strides = [1, 1]} : vector<8x1536xf32> to vector<8x128xf32>
    %83 = arith.truncf %80 : vector<8x128xf32> to vector<8x128xbf16>
    %84 = arith.truncf %81 : vector<8x128xf32> to vector<8x128xbf16>
    %cst_34 = arith.constant dense<0.000000e+00> : vector<8x8xf32>
    %85 = tpu.matmul %83, %84, %cst_34 {dimension_numbers = #tpu.dot_dimension_numbers<[1], [1], [0], [0], [0, 0, 1, 0], [], []>} : vector<8x128xbf16>, vector<8x128xbf16>, vector<8x8xf32> -> vector<8x8xf32>
    %86 = arith.addf %85, %16 : vector<8x8xf32>
    %cst_35 = arith.constant dense<0xFF800000> : vector<8xf32>
    %87 = vector.multi_reduction <maximumf>, %86, %cst_35 [1] : vector<8x8xf32> to vector<8xf32>
    %88 = vector.shape_cast %87 : vector<8xf32> to vector<8x1xf32>
    %89 = vector.broadcast %88 : vector<8x1xf32> to vector<8x8xf32>
    %90 = arith.subf %86, %89 : vector<8x8xf32>
    %91 = math.exp %90 : vector<8x8xf32>
    %cst_36 = arith.constant dense<0.000000e+00> : vector<8xf32>
    %92 = vector.multi_reduction <add>, %91, %cst_36 [1] : vector<8x8xf32> to vector<8xf32>
    %93 = vector.shape_cast %92 : vector<8xf32> to vector<8x1xf32>
    %94 = tpu.reciprocal %93 {approx = true} : vector<8x1xf32> -> vector<8x1xf32>
    %95 = vector.broadcast %94 : vector<8x1xf32> to vector<8x8xf32>
    %96 = arith.mulf %91, %95 : vector<8x8xf32>
    %97 = arith.truncf %96 : vector<8x8xf32> to vector<8x8xbf16>
    %98 = arith.truncf %82 : vector<8x128xf32> to vector<8x128xbf16>
    %cst_37 = arith.constant dense<0.000000e+00> : vector<8x128xf32>
    %99 = tpu.matmul %97, %98, %cst_37 {dimension_numbers = #tpu.dot_dimension_numbers<[1], [0], [0], [1], [0, 0, 1, 1], [], []>} : vector<8x8xbf16>, vector<8x128xbf16>, vector<8x128xf32> -> vector<8x128xf32>
    %100 = arith.truncf %99 : vector<8x128xf32> to vector<8x128xbf16>
    %101 = vector.extract_strided_slice %51 {offsets = [128, 0], sizes = [128, 128], strides = [1, 1]} : vector<512x128xbf16> to vector<128x128xbf16>
    %cst_38 = arith.constant dense<0.000000e+00> : vector<8x128xf32>
    %102 = tpu.matmul %100, %101, %cst_38 {dimension_numbers = #tpu.dot_dimension_numbers<[1], [0], [0], [1], [0, 0, 1, 1], [], []>} : vector<8x128xbf16>, vector<128x128xbf16>, vector<8x128xf32> -> vector<8x128xf32>
    %103 = arith.addf %79, %102 : vector<8x128xf32>
    %104 = vector.extract_strided_slice %56 {offsets = [0, 768], sizes = [8, 128], strides = [1, 1]} : vector<8x1536xf32> to vector<8x128xf32>
    %105 = vector.extract_strided_slice %56 {offsets = [0, 896], sizes = [8, 128], strides = [1, 1]} : vector<8x1536xf32> to vector<8x128xf32>
    %106 = vector.extract_strided_slice %56 {offsets = [0, 1024], sizes = [8, 128], strides = [1, 1]} : vector<8x1536xf32> to vector<8x128xf32>
    %107 = arith.truncf %104 : vector<8x128xf32> to vector<8x128xbf16>
    %108 = arith.truncf %105 : vector<8x128xf32> to vector<8x128xbf16>
    %cst_39 = arith.constant dense<0.000000e+00> : vector<8x8xf32>
    %109 = tpu.matmul %107, %108, %cst_39 {dimension_numbers = #tpu.dot_dimension_numbers<[1], [1], [0], [0], [0, 0, 1, 0], [], []>} : vector<8x128xbf16>, vector<8x128xbf16>, vector<8x8xf32> -> vector<8x8xf32>
    %110 = arith.addf %109, %16 : vector<8x8xf32>
    %cst_40 = arith.constant dense<0xFF800000> : vector<8xf32>
    %111 = vector.multi_reduction <maximumf>, %110, %cst_40 [1] : vector<8x8xf32> to vector<8xf32>
    %112 = vector.shape_cast %111 : vector<8xf32> to vector<8x1xf32>
    %113 = vector.broadcast %112 : vector<8x1xf32> to vector<8x8xf32>
    %114 = arith.subf %110, %113 : vector<8x8xf32>
    %115 = math.exp %114 : vector<8x8xf32>
    %cst_41 = arith.constant dense<0.000000e+00> : vector<8xf32>
    %116 = vector.multi_reduction <add>, %115, %cst_41 [1] : vector<8x8xf32> to vector<8xf32>
    %117 = vector.shape_cast %116 : vector<8xf32> to vector<8x1xf32>
    %118 = tpu.reciprocal %117 {approx = true} : vector<8x1xf32> -> vector<8x1xf32>
    %119 = vector.broadcast %118 : vector<8x1xf32> to vector<8x8xf32>
    %120 = arith.mulf %115, %119 : vector<8x8xf32>
    %121 = arith.truncf %120 : vector<8x8xf32> to vector<8x8xbf16>
    %122 = arith.truncf %106 : vector<8x128xf32> to vector<8x128xbf16>
    %cst_42 = arith.constant dense<0.000000e+00> : vector<8x128xf32>
    %123 = tpu.matmul %121, %122, %cst_42 {dimension_numbers = #tpu.dot_dimension_numbers<[1], [0], [0], [1], [0, 0, 1, 1], [], []>} : vector<8x8xbf16>, vector<8x128xbf16>, vector<8x128xf32> -> vector<8x128xf32>
    %124 = arith.truncf %123 : vector<8x128xf32> to vector<8x128xbf16>
    %125 = vector.extract_strided_slice %51 {offsets = [256, 0], sizes = [128, 128], strides = [1, 1]} : vector<512x128xbf16> to vector<128x128xbf16>
    %cst_43 = arith.constant dense<0.000000e+00> : vector<8x128xf32>
    %126 = tpu.matmul %124, %125, %cst_43 {dimension_numbers = #tpu.dot_dimension_numbers<[1], [0], [0], [1], [0, 0, 1, 1], [], []>} : vector<8x128xbf16>, vector<128x128xbf16>, vector<8x128xf32> -> vector<8x128xf32>
    %127 = arith.addf %103, %126 : vector<8x128xf32>
    %128 = vector.extract_strided_slice %56 {offsets = [0, 1152], sizes = [8, 128], strides = [1, 1]} : vector<8x1536xf32> to vector<8x128xf32>
    %129 = vector.extract_strided_slice %56 {offsets = [0, 1280], sizes = [8, 128], strides = [1, 1]} : vector<8x1536xf32> to vector<8x128xf32>
    %130 = vector.extract_strided_slice %56 {offsets = [0, 1408], sizes = [8, 128], strides = [1, 1]} : vector<8x1536xf32> to vector<8x128xf32>
    %131 = arith.truncf %128 : vector<8x128xf32> to vector<8x128xbf16>
    %132 = arith.truncf %129 : vector<8x128xf32> to vector<8x128xbf16>
    %cst_44 = arith.constant dense<0.000000e+00> : vector<8x8xf32>
    %133 = tpu.matmul %131, %132, %cst_44 {dimension_numbers = #tpu.dot_dimension_numbers<[1], [1], [0], [0], [0, 0, 1, 0], [], []>} : vector<8x128xbf16>, vector<8x128xbf16>, vector<8x8xf32> -> vector<8x8xf32>
    %134 = arith.addf %133, %16 : vector<8x8xf32>
    %cst_45 = arith.constant dense<0xFF800000> : vector<8xf32>
    %135 = vector.multi_reduction <maximumf>, %134, %cst_45 [1] : vector<8x8xf32> to vector<8xf32>
    %136 = vector.shape_cast %135 : vector<8xf32> to vector<8x1xf32>
    %137 = vector.broadcast %136 : vector<8x1xf32> to vector<8x8xf32>
    %138 = arith.subf %134, %137 : vector<8x8xf32>
    %139 = math.exp %138 : vector<8x8xf32>
    %cst_46 = arith.constant dense<0.000000e+00> : vector<8xf32>
    %140 = vector.multi_reduction <add>, %139, %cst_46 [1] : vector<8x8xf32> to vector<8xf32>
    %141 = vector.shape_cast %140 : vector<8xf32> to vector<8x1xf32>
    %142 = tpu.reciprocal %141 {approx = true} : vector<8x1xf32> -> vector<8x1xf32>
    %143 = vector.broadcast %142 : vector<8x1xf32> to vector<8x8xf32>
    %144 = arith.mulf %139, %143 : vector<8x8xf32>
    %145 = arith.truncf %144 : vector<8x8xf32> to vector<8x8xbf16>
    %146 = arith.truncf %130 : vector<8x128xf32> to vector<8x128xbf16>
    %cst_47 = arith.constant dense<0.000000e+00> : vector<8x128xf32>
    %147 = tpu.matmul %145, %146, %cst_47 {dimension_numbers = #tpu.dot_dimension_numbers<[1], [0], [0], [1], [0, 0, 1, 1], [], []>} : vector<8x8xbf16>, vector<8x128xbf16>, vector<8x128xf32> -> vector<8x128xf32>
    %148 = arith.truncf %147 : vector<8x128xf32> to vector<8x128xbf16>
    %149 = vector.extract_strided_slice %51 {offsets = [384, 0], sizes = [128, 128], strides = [1, 1]} : vector<512x128xbf16> to vector<128x128xbf16>
    %cst_48 = arith.constant dense<0.000000e+00> : vector<8x128xf32>
    %150 = tpu.matmul %148, %149, %cst_48 {dimension_numbers = #tpu.dot_dimension_numbers<[1], [0], [0], [1], [0, 0, 1, 1], [], []>} : vector<8x128xbf16>, vector<128x128xbf16>, vector<8x128xf32> -> vector<8x128xf32>
    %151 = arith.addf %127, %150 : vector<8x128xf32>
    %152 = vector.broadcast %52 : vector<1x128xf32> to vector<8x128xf32>
    %153 = arith.addf %151, %152 : vector<8x128xf32>
    %154 = arith.addf %23, %153 : vector<8x128xf32>
    %c0_49 = arith.constant 0 : index
    %c0_50 = arith.constant 0 : index
    %155 = vector.load %arg12[%c0_49, %c0_50] : memref<2x128xf32, #tpu.memory_space<vmem>>, vector<2x128xf32>
    %156 = vector.extract_strided_slice %155 {offsets = [0, 0], sizes = [1, 128], strides = [1, 1]} : vector<2x128xf32> to vector<1x128xf32>
    %157 = vector.extract_strided_slice %155 {offsets = [1, 0], sizes = [1, 128], strides = [1, 1]} : vector<2x128xf32> to vector<1x128xf32>
    %cst_51 = arith.constant dense<0.000000e+00> : vector<8xf32>
    %158 = vector.multi_reduction <add>, %154, %cst_51 [1] : vector<8x128xf32> to vector<8xf32>
    %159 = vector.shape_cast %158 : vector<8xf32> to vector<8x1xf32>
    %160 = arith.mulf %154, %154 : vector<8x128xf32>
    %cst_52 = arith.constant dense<0.000000e+00> : vector<8xf32>
    %161 = vector.multi_reduction <add>, %160, %cst_52 [1] : vector<8x128xf32> to vector<8xf32>
    %162 = vector.shape_cast %161 : vector<8xf32> to vector<8x1xf32>
    %cst_53 = arith.constant 3.125000e-02 : f32
    %163 = vector.broadcast %cst_53 : f32 to vector<8x1xf32>
    %164 = arith.mulf %159, %163 : vector<8x1xf32>
    %cst_54 = arith.constant 3.125000e-02 : f32
    %165 = vector.broadcast %cst_54 : f32 to vector<8x1xf32>
    %166 = arith.mulf %162, %165 : vector<8x1xf32>
    %167 = arith.mulf %164, %164 : vector<8x1xf32>
    %168 = arith.subf %166, %167 : vector<8x1xf32>
    %169 = vector.broadcast %164 : vector<8x1xf32> to vector<8x128xf32>
    %170 = arith.subf %154, %169 : vector<8x128xf32>
    %cst_55 = arith.constant 9.99999974E-6 : f32
    %171 = vector.broadcast %cst_55 : f32 to vector<8x1xf32>
    %172 = arith.addf %168, %171 : vector<8x1xf32>
    %173 = math.rsqrt %172 : vector<8x1xf32>
    %174 = vector.broadcast %173 : vector<8x1xf32> to vector<8x128xf32>
    %175 = arith.mulf %170, %174 : vector<8x128xf32>
    %176 = vector.broadcast %156 : vector<1x128xf32> to vector<8x128xf32>
    %177 = arith.mulf %175, %176 : vector<8x128xf32>
    %178 = vector.broadcast %157 : vector<1x128xf32> to vector<8x128xf32>
    %179 = arith.addf %177, %178 : vector<8x128xf32>
    %180 = arith.truncf %179 : vector<8x128xf32> to vector<8x128xbf16>
    %c0_56 = arith.constant 0 : index
    %c0_57 = arith.constant 0 : index
    %181 = vector.load %arg13[%c0_56, %c0_57] : memref<128x128xbf16, #tpu.memory_space<vmem>>, vector<128x128xbf16>
    %cst_58 = arith.constant dense<0.000000e+00> : vector<8x128xf32>
    %182 = tpu.matmul %180, %181, %cst_58 {dimension_numbers = #tpu.dot_dimension_numbers<[1], [0], [0], [1], [0, 0, 1, 1], [], []>} : vector<8x128xbf16>, vector<128x128xbf16>, vector<8x128xf32> -> vector<8x128xf32>
    %c0_59 = arith.constant 0 : index
    %c0_60 = arith.constant 0 : index
    %183 = vector.load %arg14[%c0_59, %c0_60] : memref<1x128xf32, #tpu.memory_space<vmem>>, vector<1x128xf32>
    %184 = vector.broadcast %183 : vector<1x128xf32> to vector<8x128xf32>
    %185 = arith.addf %182, %184 : vector<8x128xf32>
    %186 = arith.mulf %185, %185 : vector<8x128xf32>
    %187 = arith.mulf %185, %186 : vector<8x128xf32>
    %cst_61 = arith.constant 4.471500e-02 : f32
    %188 = vector.broadcast %cst_61 : f32 to vector<8x128xf32>
    %189 = arith.mulf %188, %187 : vector<8x128xf32>
    %190 = arith.addf %185, %189 : vector<8x128xf32>
    %cst_62 = arith.constant 0.797884583 : f32
    %191 = vector.broadcast %cst_62 : f32 to vector<8x128xf32>
    %192 = arith.mulf %191, %190 : vector<8x128xf32>
    %193 = math.tanh %192 : vector<8x128xf32>
    %cst_63 = arith.constant 1.000000e+00 : f32
    %194 = vector.broadcast %cst_63 : f32 to vector<8x128xf32>
    %195 = arith.addf %194, %193 : vector<8x128xf32>
    %cst_64 = arith.constant 5.000000e-01 : f32
    %196 = vector.broadcast %cst_64 : f32 to vector<8x128xf32>
    %197 = arith.mulf %196, %195 : vector<8x128xf32>
    %198 = arith.mulf %185, %197 : vector<8x128xf32>
    %199 = arith.truncf %198 : vector<8x128xf32> to vector<8x128xbf16>
    %c0_65 = arith.constant 0 : index
    %c0_66 = arith.constant 0 : index
    %200 = vector.load %arg15[%c0_65, %c0_66] : memref<128x128xbf16, #tpu.memory_space<vmem>>, vector<128x128xbf16>
    %cst_67 = arith.constant dense<0.000000e+00> : vector<8x128xf32>
    %201 = tpu.matmul %199, %200, %cst_67 {dimension_numbers = #tpu.dot_dimension_numbers<[1], [0], [0], [1], [0, 0, 1, 1], [], []>} : vector<8x128xbf16>, vector<128x128xbf16>, vector<8x128xf32> -> vector<8x128xf32>
    %202 = arith.addf %154, %201 : vector<8x128xf32>
    %c0_68 = arith.constant 0 : index
    %c0_69 = arith.constant 0 : index
    %203 = vector.load %arg16[%c0_68, %c0_69] : memref<1x128xf32, #tpu.memory_space<vmem>>, vector<1x128xf32>
    %204 = vector.broadcast %203 : vector<1x128xf32> to vector<8x128xf32>
    %205 = arith.addf %202, %204 : vector<8x128xf32>
    %c0_70 = arith.constant 0 : index
    %c0_71 = arith.constant 0 : index
    %206 = vector.load %arg17[%c0_70, %c0_71] : memref<2x128xf32, #tpu.memory_space<vmem>>, vector<2x128xf32>
    %207 = vector.extract_strided_slice %206 {offsets = [0, 0], sizes = [1, 128], strides = [1, 1]} : vector<2x128xf32> to vector<1x128xf32>
    %208 = vector.extract_strided_slice %206 {offsets = [1, 0], sizes = [1, 128], strides = [1, 1]} : vector<2x128xf32> to vector<1x128xf32>
    %cst_72 = arith.constant dense<0.000000e+00> : vector<8xf32>
    %209 = vector.multi_reduction <add>, %205, %cst_72 [1] : vector<8x128xf32> to vector<8xf32>
    %210 = vector.shape_cast %209 : vector<8xf32> to vector<8x1xf32>
    %211 = arith.mulf %205, %205 : vector<8x128xf32>
    %cst_73 = arith.constant dense<0.000000e+00> : vector<8xf32>
    %212 = vector.multi_reduction <add>, %211, %cst_73 [1] : vector<8x128xf32> to vector<8xf32>
    %213 = vector.shape_cast %212 : vector<8xf32> to vector<8x1xf32>
    %cst_74 = arith.constant 3.125000e-02 : f32
    %214 = vector.broadcast %cst_74 : f32 to vector<8x1xf32>
    %215 = arith.mulf %210, %214 : vector<8x1xf32>
    %cst_75 = arith.constant 3.125000e-02 : f32
    %216 = vector.broadcast %cst_75 : f32 to vector<8x1xf32>
    %217 = arith.mulf %213, %216 : vector<8x1xf32>
    %218 = arith.mulf %215, %215 : vector<8x1xf32>
    %219 = arith.subf %217, %218 : vector<8x1xf32>
    %220 = vector.broadcast %215 : vector<8x1xf32> to vector<8x128xf32>
    %221 = arith.subf %205, %220 : vector<8x128xf32>
    %cst_76 = arith.constant 9.99999974E-6 : f32
    %222 = vector.broadcast %cst_76 : f32 to vector<8x1xf32>
    %223 = arith.addf %219, %222 : vector<8x1xf32>
    %224 = math.rsqrt %223 : vector<8x1xf32>
    %225 = vector.broadcast %224 : vector<8x1xf32> to vector<8x128xf32>
    %226 = arith.mulf %221, %225 : vector<8x128xf32>
    %227 = vector.broadcast %207 : vector<1x128xf32> to vector<8x128xf32>
    %228 = arith.mulf %226, %227 : vector<8x128xf32>
    %229 = vector.broadcast %208 : vector<1x128xf32> to vector<8x128xf32>
    %230 = arith.addf %228, %229 : vector<8x128xf32>
    %231 = arith.truncf %230 : vector<8x128xf32> to vector<8x128xbf16>
    %c0_77 = arith.constant 0 : index
    %c0_78 = arith.constant 0 : index
    %232 = vector.load %arg18[%c0_77, %c0_78] : memref<128x128xbf16, #tpu.memory_space<vmem>>, vector<128x128xbf16>
    %cst_79 = arith.constant dense<0.000000e+00> : vector<8x128xf32>
    %233 = tpu.matmul %231, %232, %cst_79 {dimension_numbers = #tpu.dot_dimension_numbers<[1], [0], [0], [1], [0, 0, 1, 1], [], []>} : vector<8x128xbf16>, vector<128x128xbf16>, vector<8x128xf32> -> vector<8x128xf32>
    %c0_80 = arith.constant 0 : index
    %c0_81 = arith.constant 0 : index
    %234 = vector.load %arg19[%c0_80, %c0_81] : memref<1x128xf32, #tpu.memory_space<vmem>>, vector<1x128xf32>
    %235 = vector.broadcast %234 : vector<1x128xf32> to vector<8x128xf32>
    %236 = arith.addf %233, %235 : vector<8x128xf32>
    %237 = arith.mulf %236, %236 : vector<8x128xf32>
    %238 = arith.mulf %236, %237 : vector<8x128xf32>
    %cst_82 = arith.constant 4.471500e-02 : f32
    %239 = vector.broadcast %cst_82 : f32 to vector<8x128xf32>
    %240 = arith.mulf %239, %238 : vector<8x128xf32>
    %241 = arith.addf %236, %240 : vector<8x128xf32>
    %cst_83 = arith.constant 0.797884583 : f32
    %242 = vector.broadcast %cst_83 : f32 to vector<8x128xf32>
    %243 = arith.mulf %242, %241 : vector<8x128xf32>
    %244 = math.tanh %243 : vector<8x128xf32>
    %cst_84 = arith.constant 1.000000e+00 : f32
    %245 = vector.broadcast %cst_84 : f32 to vector<8x128xf32>
    %246 = arith.addf %245, %244 : vector<8x128xf32>
    %cst_85 = arith.constant 5.000000e-01 : f32
    %247 = vector.broadcast %cst_85 : f32 to vector<8x128xf32>
    %248 = arith.mulf %247, %246 : vector<8x128xf32>
    %249 = arith.mulf %236, %248 : vector<8x128xf32>
    %250 = arith.truncf %249 : vector<8x128xf32> to vector<8x128xbf16>
    %c0_86 = arith.constant 0 : index
    %c0_87 = arith.constant 0 : index
    %251 = vector.load %arg20[%c0_86, %c0_87] : memref<128x128xbf16, #tpu.memory_space<vmem>>, vector<128x128xbf16>
    %cst_88 = arith.constant dense<0.000000e+00> : vector<8x128xf32>
    %252 = tpu.matmul %250, %251, %cst_88 {dimension_numbers = #tpu.dot_dimension_numbers<[1], [0], [0], [1], [0, 0, 1, 1], [], []>} : vector<8x128xbf16>, vector<128x128xbf16>, vector<8x128xf32> -> vector<8x128xf32>
    %c0_89 = arith.constant 0 : index
    %c0_90 = arith.constant 0 : index
    %253 = vector.load %arg21[%c0_89, %c0_90] : memref<1x128xf32, #tpu.memory_space<vmem>>, vector<1x128xf32>
    %254 = vector.broadcast %253 : vector<1x128xf32> to vector<8x128xf32>
    %255 = arith.addf %252, %254 : vector<8x128xf32>
    %c0_91 = arith.constant 0 : index
    %c0_92 = arith.constant 0 : index
    %256 = vector.load %arg1[%c0_91, %c0_92] : memref<16x1xi32, #tpu.memory_space<vmem>>, vector<16x1xi32>
    %257 = tpu.iota {dimensions = array<i32: 1>} : vector<16x128xi32>
    %258 = vector.broadcast %256 : vector<16x1xi32> to vector<16x128xi32>
    %259 = arith.cmpi eq, %257, %258 : vector<16x128xi32>
    %260 = arith.extui %259 : vector<16x128xi1> to vector<16x128xi32>
    %261 = arith.sitofp %260 : vector<16x128xi32> to vector<16x128xf32>
    %262 = arith.truncf %261 : vector<16x128xf32> to vector<16x128xbf16>
    %c0_93 = arith.constant 0 : index
    %c0_94 = arith.constant 0 : index
    %263 = vector.load %arg22[%c0_93, %c0_94] : memref<128x128xbf16, #tpu.memory_space<vmem>>, vector<128x128xbf16>
    %cst_95 = arith.constant dense<0.000000e+00> : vector<16x128xf32>
    %264 = tpu.matmul %262, %263, %cst_95 {dimension_numbers = #tpu.dot_dimension_numbers<[1], [0], [0], [1], [0, 0, 1, 1], [], []>} : vector<16x128xbf16>, vector<128x128xbf16>, vector<16x128xf32> -> vector<16x128xf32>
    %265 = tpu.concatenate %255, %264 in 0 : vector<8x128xf32>, vector<16x128xf32> -> vector<24x128xf32>
    %266 = tpu.iota {dimensions = array<i32: 0>} : vector<24x1xi32>
    %267 = tpu.iota {dimensions = array<i32: 1>} : vector<1x24xi32>
    %c8_i32 = arith.constant 8 : i32
    %268 = vector.broadcast %c8_i32 : i32 to vector<24x1xi32>
    %269 = arith.cmpi slt, %266, %268 : vector<24x1xi32>
    %c8_i32_96 = arith.constant 8 : i32
    %270 = vector.broadcast %c8_i32_96 : i32 to vector<24x1xi32>
    %271 = arith.subi %266, %270 : vector<24x1xi32>
    %c0_i32 = arith.constant 0 : i32
    %272 = vector.broadcast %c0_i32 : i32 to vector<24x1xi32>
    %273 = arith.maxsi %271, %272 : vector<24x1xi32>
    %c2_i32_97 = arith.constant 2 : i32
    %274 = vector.broadcast %c2_i32_97 : i32 to vector<24x1xi32>
    %275 = arith.shrsi %266, %274 : vector<24x1xi32>
    %c3_i32 = arith.constant 3 : i32
    %276 = vector.broadcast %c3_i32 : i32 to vector<24x1xi32>
    %277 = arith.shrsi %273, %276 : vector<24x1xi32>
    %278 = arith.select %269, %275, %277 : vector<24x1xi1>, vector<24x1xi32>
    %c3_i32_98 = arith.constant 3 : i32
    %279 = vector.broadcast %c3_i32_98 : i32 to vector<24x1xi32>
    %280 = arith.andi %266, %279 : vector<24x1xi32>
    %c7_i32 = arith.constant 7 : i32
    %281 = vector.broadcast %c7_i32 : i32 to vector<24x1xi32>
    %282 = arith.andi %273, %281 : vector<24x1xi32>
    %c4_i32 = arith.constant 4 : i32
    %283 = vector.broadcast %c4_i32 : i32 to vector<24x1xi32>
    %284 = arith.addi %283, %282 : vector<24x1xi32>
    %285 = arith.select %269, %280, %284 : vector<24x1xi1>, vector<24x1xi32>
    %c8_i32_99 = arith.constant 8 : i32
    %286 = vector.broadcast %c8_i32_99 : i32 to vector<1x24xi32>
    %287 = arith.cmpi slt, %267, %286 : vector<1x24xi32>
    %c8_i32_100 = arith.constant 8 : i32
    %288 = vector.broadcast %c8_i32_100 : i32 to vector<1x24xi32>
    %289 = arith.subi %267, %288 : vector<1x24xi32>
    %c0_i32_101 = arith.constant 0 : i32
    %290 = vector.broadcast %c0_i32_101 : i32 to vector<1x24xi32>
    %291 = arith.maxsi %289, %290 : vector<1x24xi32>
    %c2_i32_102 = arith.constant 2 : i32
    %292 = vector.broadcast %c2_i32_102 : i32 to vector<1x24xi32>
    %293 = arith.shrsi %267, %292 : vector<1x24xi32>
    %c3_i32_103 = arith.constant 3 : i32
    %294 = vector.broadcast %c3_i32_103 : i32 to vector<1x24xi32>
    %295 = arith.shrsi %291, %294 : vector<1x24xi32>
    %296 = arith.select %287, %293, %295 : vector<1x24xi1>, vector<1x24xi32>
    %c3_i32_104 = arith.constant 3 : i32
    %297 = vector.broadcast %c3_i32_104 : i32 to vector<1x24xi32>
    %298 = arith.andi %267, %297 : vector<1x24xi32>
    %c7_i32_105 = arith.constant 7 : i32
    %299 = vector.broadcast %c7_i32_105 : i32 to vector<1x24xi32>
    %300 = arith.andi %291, %299 : vector<1x24xi32>
    %c4_i32_106 = arith.constant 4 : i32
    %301 = vector.broadcast %c4_i32_106 : i32 to vector<1x24xi32>
    %302 = arith.addi %301, %300 : vector<1x24xi32>
    %303 = arith.select %287, %298, %302 : vector<1x24xi1>, vector<1x24xi32>
    %c0_107 = arith.constant 0 : index
    %c0_108 = arith.constant 0 : index
    %c0_109 = arith.constant 0 : index
    %304 = vector.load %arg2[%c0_107, %c0_108, %c0_109] : memref<2x1x8xf32, #tpu.memory_space<vmem>>, vector<1x1x8xf32>
    %305 = vector.shape_cast %304 : vector<1x1x8xf32> to vector<1x8xf32>
    %c1_110 = arith.constant 1 : index
    %c0_111 = arith.constant 0 : index
    %c0_112 = arith.constant 0 : index
    %306 = vector.load %arg2[%c1_110, %c0_111, %c0_112] : memref<2x1x8xf32, #tpu.memory_space<vmem>>, vector<1x1x8xf32>
    %307 = vector.shape_cast %306 : vector<1x1x8xf32> to vector<1x8xf32>
    %308 = tpu.concatenate %305, %307 in 1 : vector<1x8xf32>, vector<1x8xf32> -> vector<1x16xf32>
    %cst_113 = arith.constant 1.000000e+00 : f32
    %309 = vector.broadcast %cst_113 : f32 to vector<1x8xf32>
    %310 = tpu.concatenate %309, %308 in 1 : vector<1x8xf32>, vector<1x16xf32> -> vector<1x24xf32>
    %cst_114 = arith.constant 0.000000e+00 : f32
    %311 = vector.broadcast %cst_114 : f32 to vector<1x24xf32>
    %312 = arith.cmpf oeq, %310, %311 : vector<1x24xf32>
    %cst_115 = arith.constant -1.000000e+09 : f32
    %cst_116 = arith.constant 0.000000e+00 : f32
    %313 = vector.broadcast %cst_115 : f32 to vector<1x24xf32>
    %314 = vector.broadcast %cst_116 : f32 to vector<1x24xf32>
    %315 = arith.select %312, %313, %314 : vector<1x24xi1>, vector<1x24xf32>
    %316 = vector.broadcast %278 : vector<24x1xi32> to vector<24x24xi32>
    %317 = vector.broadcast %296 : vector<1x24xi32> to vector<24x24xi32>
    %318 = arith.cmpi eq, %316, %317 : vector<24x24xi32>
    %319 = vector.broadcast %303 : vector<1x24xi32> to vector<24x24xi32>
    %320 = vector.broadcast %285 : vector<24x1xi32> to vector<24x24xi32>
    %321 = arith.cmpi sle, %319, %320 : vector<24x24xi32>
    %322 = arith.andi %318, %321 : vector<24x24xi1>
    %cst_117 = arith.constant 0.000000e+00 : f32
    %cst_118 = arith.constant -1.000000e+09 : f32
    %323 = vector.broadcast %cst_117 : f32 to vector<24x24xf32>
    %324 = vector.broadcast %cst_118 : f32 to vector<24x24xf32>
    %325 = arith.select %322, %323, %324 : vector<24x24xi1>, vector<24x24xf32>
    %326 = vector.broadcast %315 : vector<1x24xf32> to vector<24x24xf32>
    %327 = arith.addf %325, %326 : vector<24x24xf32>
    %c0_119 = arith.constant 0 : index
    %c0_120 = arith.constant 0 : index
    %328 = vector.load %arg23[%c0_119, %c0_120] : memref<2x128xf32, #tpu.memory_space<vmem>>, vector<1x128xf32>
    %329 = arith.mulf %265, %265 : vector<24x128xf32>
    %cst_121 = arith.constant dense<0.000000e+00> : vector<24xf32>
    %330 = vector.multi_reduction <add>, %329, %cst_121 [1] : vector<24x128xf32> to vector<24xf32>
    %331 = vector.shape_cast %330 : vector<24xf32> to vector<24x1xf32>
    %cst_122 = arith.constant 3.125000e-02 : f32
    %332 = vector.broadcast %cst_122 : f32 to vector<24x1xf32>
    %333 = arith.mulf %331, %332 : vector<24x1xf32>
    %cst_123 = arith.constant 9.99999997E-7 : f32
    %334 = vector.broadcast %cst_123 : f32 to vector<24x1xf32>
    %335 = arith.addf %333, %334 : vector<24x1xf32>
    %336 = math.rsqrt %335 : vector<24x1xf32>
    %337 = vector.broadcast %336 : vector<24x1xf32> to vector<24x128xf32>
    %338 = arith.mulf %265, %337 : vector<24x128xf32>
    %339 = vector.broadcast %328 : vector<1x128xf32> to vector<24x128xf32>
    %340 = arith.mulf %338, %339 : vector<24x128xf32>
    %c0_124 = arith.constant 0 : index
    %c0_125 = arith.constant 0 : index
    %c0_126 = arith.constant 0 : index
    %341 = vector.load %arg24[%c0_124, %c0_125, %c0_126] : memref<2x128x1536xbf16, #tpu.memory_space<vmem>>, vector<1x128x1536xbf16>
    %342 = vector.shape_cast %341 : vector<1x128x1536xbf16> to vector<128x1536xbf16>
    %c0_127 = arith.constant 0 : index
    %c0_128 = arith.constant 0 : index
    %c0_129 = arith.constant 0 : index
    %343 = vector.load %arg25[%c0_127, %c0_128, %c0_129] : memref<2x512x128xbf16, #tpu.memory_space<vmem>>, vector<1x512x128xbf16>
    %344 = vector.shape_cast %343 : vector<1x512x128xbf16> to vector<512x128xbf16>
    %345 = arith.truncf %340 : vector<24x128xf32> to vector<24x128xbf16>
    %cst_130 = arith.constant dense<0.000000e+00> : vector<24x1536xf32>
    %346 = tpu.matmul %345, %342, %cst_130 {dimension_numbers = #tpu.dot_dimension_numbers<[1], [0], [0], [1], [0, 0, 1, 1], [], []>} : vector<24x128xbf16>, vector<128x1536xbf16>, vector<24x1536xf32> -> vector<24x1536xf32>
    %347 = vector.extract_strided_slice %346 {offsets = [0, 0], sizes = [24, 128], strides = [1, 1]} : vector<24x1536xf32> to vector<24x128xf32>
    %348 = vector.extract_strided_slice %346 {offsets = [0, 128], sizes = [24, 128], strides = [1, 1]} : vector<24x1536xf32> to vector<24x128xf32>
    %349 = vector.extract_strided_slice %346 {offsets = [0, 256], sizes = [24, 128], strides = [1, 1]} : vector<24x1536xf32> to vector<24x128xf32>
    %350 = arith.truncf %347 : vector<24x128xf32> to vector<24x128xbf16>
    %351 = arith.truncf %348 : vector<24x128xf32> to vector<24x128xbf16>
    %cst_131 = arith.constant dense<0.000000e+00> : vector<24x24xf32>
    %352 = tpu.matmul %350, %351, %cst_131 {dimension_numbers = #tpu.dot_dimension_numbers<[1], [1], [0], [0], [0, 0, 1, 0], [], []>} : vector<24x128xbf16>, vector<24x128xbf16>, vector<24x24xf32> -> vector<24x24xf32>
    %353 = arith.addf %352, %327 : vector<24x24xf32>
    %cst_132 = arith.constant dense<0xFF800000> : vector<24xf32>
    %354 = vector.multi_reduction <maximumf>, %353, %cst_132 [1] : vector<24x24xf32> to vector<24xf32>
    %355 = vector.shape_cast %354 : vector<24xf32> to vector<24x1xf32>
    %356 = vector.broadcast %355 : vector<24x1xf32> to vector<24x24xf32>
    %357 = arith.subf %353, %356 : vector<24x24xf32>
    %358 = math.exp %357 : vector<24x24xf32>
    %cst_133 = arith.constant dense<0.000000e+00> : vector<24xf32>
    %359 = vector.multi_reduction <add>, %358, %cst_133 [1] : vector<24x24xf32> to vector<24xf32>
    %360 = vector.shape_cast %359 : vector<24xf32> to vector<24x1xf32>
    %361 = tpu.reciprocal %360 {approx = true} : vector<24x1xf32> -> vector<24x1xf32>
    %362 = vector.broadcast %361 : vector<24x1xf32> to vector<24x24xf32>
    %363 = arith.mulf %358, %362 : vector<24x24xf32>
    %364 = arith.truncf %363 : vector<24x24xf32> to vector<24x24xbf16>
    %365 = arith.truncf %349 : vector<24x128xf32> to vector<24x128xbf16>
    %cst_134 = arith.constant dense<0.000000e+00> : vector<24x128xf32>
    %366 = tpu.matmul %364, %365, %cst_134 {dimension_numbers = #tpu.dot_dimension_numbers<[1], [0], [0], [1], [0, 0, 1, 1], [], []>} : vector<24x24xbf16>, vector<24x128xbf16>, vector<24x128xf32> -> vector<24x128xf32>
    %367 = arith.truncf %366 : vector<24x128xf32> to vector<24x128xbf16>
    %368 = vector.extract_strided_slice %344 {offsets = [0, 0], sizes = [128, 128], strides = [1, 1]} : vector<512x128xbf16> to vector<128x128xbf16>
    %cst_135 = arith.constant dense<0.000000e+00> : vector<24x128xf32>
    %369 = tpu.matmul %367, %368, %cst_135 {dimension_numbers = #tpu.dot_dimension_numbers<[1], [0], [0], [1], [0, 0, 1, 1], [], []>} : vector<24x128xbf16>, vector<128x128xbf16>, vector<24x128xf32> -> vector<24x128xf32>
    %370 = vector.extract_strided_slice %346 {offsets = [0, 384], sizes = [24, 128], strides = [1, 1]} : vector<24x1536xf32> to vector<24x128xf32>
    %371 = vector.extract_strided_slice %346 {offsets = [0, 512], sizes = [24, 128], strides = [1, 1]} : vector<24x1536xf32> to vector<24x128xf32>
    %372 = vector.extract_strided_slice %346 {offsets = [0, 640], sizes = [24, 128], strides = [1, 1]} : vector<24x1536xf32> to vector<24x128xf32>
    %373 = arith.truncf %370 : vector<24x128xf32> to vector<24x128xbf16>
    %374 = arith.truncf %371 : vector<24x128xf32> to vector<24x128xbf16>
    %cst_136 = arith.constant dense<0.000000e+00> : vector<24x24xf32>
    %375 = tpu.matmul %373, %374, %cst_136 {dimension_numbers = #tpu.dot_dimension_numbers<[1], [1], [0], [0], [0, 0, 1, 0], [], []>} : vector<24x128xbf16>, vector<24x128xbf16>, vector<24x24xf32> -> vector<24x24xf32>
    %376 = arith.addf %375, %327 : vector<24x24xf32>
    %cst_137 = arith.constant dense<0xFF800000> : vector<24xf32>
    %377 = vector.multi_reduction <maximumf>, %376, %cst_137 [1] : vector<24x24xf32> to vector<24xf32>
    %378 = vector.shape_cast %377 : vector<24xf32> to vector<24x1xf32>
    %379 = vector.broadcast %378 : vector<24x1xf32> to vector<24x24xf32>
    %380 = arith.subf %376, %379 : vector<24x24xf32>
    %381 = math.exp %380 : vector<24x24xf32>
    %cst_138 = arith.constant dense<0.000000e+00> : vector<24xf32>
    %382 = vector.multi_reduction <add>, %381, %cst_138 [1] : vector<24x24xf32> to vector<24xf32>
    %383 = vector.shape_cast %382 : vector<24xf32> to vector<24x1xf32>
    %384 = tpu.reciprocal %383 {approx = true} : vector<24x1xf32> -> vector<24x1xf32>
    %385 = vector.broadcast %384 : vector<24x1xf32> to vector<24x24xf32>
    %386 = arith.mulf %381, %385 : vector<24x24xf32>
    %387 = arith.truncf %386 : vector<24x24xf32> to vector<24x24xbf16>
    %388 = arith.truncf %372 : vector<24x128xf32> to vector<24x128xbf16>
    %cst_139 = arith.constant dense<0.000000e+00> : vector<24x128xf32>
    %389 = tpu.matmul %387, %388, %cst_139 {dimension_numbers = #tpu.dot_dimension_numbers<[1], [0], [0], [1], [0, 0, 1, 1], [], []>} : vector<24x24xbf16>, vector<24x128xbf16>, vector<24x128xf32> -> vector<24x128xf32>
    %390 = arith.truncf %389 : vector<24x128xf32> to vector<24x128xbf16>
    %391 = vector.extract_strided_slice %344 {offsets = [128, 0], sizes = [128, 128], strides = [1, 1]} : vector<512x128xbf16> to vector<128x128xbf16>
    %cst_140 = arith.constant dense<0.000000e+00> : vector<24x128xf32>
    %392 = tpu.matmul %390, %391, %cst_140 {dimension_numbers = #tpu.dot_dimension_numbers<[1], [0], [0], [1], [0, 0, 1, 1], [], []>} : vector<24x128xbf16>, vector<128x128xbf16>, vector<24x128xf32> -> vector<24x128xf32>
    %393 = arith.addf %369, %392 : vector<24x128xf32>
    %394 = vector.extract_strided_slice %346 {offsets = [0, 768], sizes = [24, 128], strides = [1, 1]} : vector<24x1536xf32> to vector<24x128xf32>
    %395 = vector.extract_strided_slice %346 {offsets = [0, 896], sizes = [24, 128], strides = [1, 1]} : vector<24x1536xf32> to vector<24x128xf32>
    %396 = vector.extract_strided_slice %346 {offsets = [0, 1024], sizes = [24, 128], strides = [1, 1]} : vector<24x1536xf32> to vector<24x128xf32>
    %397 = arith.truncf %394 : vector<24x128xf32> to vector<24x128xbf16>
    %398 = arith.truncf %395 : vector<24x128xf32> to vector<24x128xbf16>
    %cst_141 = arith.constant dense<0.000000e+00> : vector<24x24xf32>
    %399 = tpu.matmul %397, %398, %cst_141 {dimension_numbers = #tpu.dot_dimension_numbers<[1], [1], [0], [0], [0, 0, 1, 0], [], []>} : vector<24x128xbf16>, vector<24x128xbf16>, vector<24x24xf32> -> vector<24x24xf32>
    %400 = arith.addf %399, %327 : vector<24x24xf32>
    %cst_142 = arith.constant dense<0xFF800000> : vector<24xf32>
    %401 = vector.multi_reduction <maximumf>, %400, %cst_142 [1] : vector<24x24xf32> to vector<24xf32>
    %402 = vector.shape_cast %401 : vector<24xf32> to vector<24x1xf32>
    %403 = vector.broadcast %402 : vector<24x1xf32> to vector<24x24xf32>
    %404 = arith.subf %400, %403 : vector<24x24xf32>
    %405 = math.exp %404 : vector<24x24xf32>
    %cst_143 = arith.constant dense<0.000000e+00> : vector<24xf32>
    %406 = vector.multi_reduction <add>, %405, %cst_143 [1] : vector<24x24xf32> to vector<24xf32>
    %407 = vector.shape_cast %406 : vector<24xf32> to vector<24x1xf32>
    %408 = tpu.reciprocal %407 {approx = true} : vector<24x1xf32> -> vector<24x1xf32>
    %409 = vector.broadcast %408 : vector<24x1xf32> to vector<24x24xf32>
    %410 = arith.mulf %405, %409 : vector<24x24xf32>
    %411 = arith.truncf %410 : vector<24x24xf32> to vector<24x24xbf16>
    %412 = arith.truncf %396 : vector<24x128xf32> to vector<24x128xbf16>
    %cst_144 = arith.constant dense<0.000000e+00> : vector<24x128xf32>
    %413 = tpu.matmul %411, %412, %cst_144 {dimension_numbers = #tpu.dot_dimension_numbers<[1], [0], [0], [1], [0, 0, 1, 1], [], []>} : vector<24x24xbf16>, vector<24x128xbf16>, vector<24x128xf32> -> vector<24x128xf32>
    %414 = arith.truncf %413 : vector<24x128xf32> to vector<24x128xbf16>
    %415 = vector.extract_strided_slice %344 {offsets = [256, 0], sizes = [128, 128], strides = [1, 1]} : vector<512x128xbf16> to vector<128x128xbf16>
    %cst_145 = arith.constant dense<0.000000e+00> : vector<24x128xf32>
    %416 = tpu.matmul %414, %415, %cst_145 {dimension_numbers = #tpu.dot_dimension_numbers<[1], [0], [0], [1], [0, 0, 1, 1], [], []>} : vector<24x128xbf16>, vector<128x128xbf16>, vector<24x128xf32> -> vector<24x128xf32>
    %417 = arith.addf %393, %416 : vector<24x128xf32>
    %418 = vector.extract_strided_slice %346 {offsets = [0, 1152], sizes = [24, 128], strides = [1, 1]} : vector<24x1536xf32> to vector<24x128xf32>
    %419 = vector.extract_strided_slice %346 {offsets = [0, 1280], sizes = [24, 128], strides = [1, 1]} : vector<24x1536xf32> to vector<24x128xf32>
    %420 = vector.extract_strided_slice %346 {offsets = [0, 1408], sizes = [24, 128], strides = [1, 1]} : vector<24x1536xf32> to vector<24x128xf32>
    %421 = arith.truncf %418 : vector<24x128xf32> to vector<24x128xbf16>
    %422 = arith.truncf %419 : vector<24x128xf32> to vector<24x128xbf16>
    %cst_146 = arith.constant dense<0.000000e+00> : vector<24x24xf32>
    %423 = tpu.matmul %421, %422, %cst_146 {dimension_numbers = #tpu.dot_dimension_numbers<[1], [1], [0], [0], [0, 0, 1, 0], [], []>} : vector<24x128xbf16>, vector<24x128xbf16>, vector<24x24xf32> -> vector<24x24xf32>
    %424 = arith.addf %423, %327 : vector<24x24xf32>
    %cst_147 = arith.constant dense<0xFF800000> : vector<24xf32>
    %425 = vector.multi_reduction <maximumf>, %424, %cst_147 [1] : vector<24x24xf32> to vector<24xf32>
    %426 = vector.shape_cast %425 : vector<24xf32> to vector<24x1xf32>
    %427 = vector.broadcast %426 : vector<24x1xf32> to vector<24x24xf32>
    %428 = arith.subf %424, %427 : vector<24x24xf32>
    %429 = math.exp %428 : vector<24x24xf32>
    %cst_148 = arith.constant dense<0.000000e+00> : vector<24xf32>
    %430 = vector.multi_reduction <add>, %429, %cst_148 [1] : vector<24x24xf32> to vector<24xf32>
    %431 = vector.shape_cast %430 : vector<24xf32> to vector<24x1xf32>
    %432 = tpu.reciprocal %431 {approx = true} : vector<24x1xf32> -> vector<24x1xf32>
    %433 = vector.broadcast %432 : vector<24x1xf32> to vector<24x24xf32>
    %434 = arith.mulf %429, %433 : vector<24x24xf32>
    %435 = arith.truncf %434 : vector<24x24xf32> to vector<24x24xbf16>
    %436 = arith.truncf %420 : vector<24x128xf32> to vector<24x128xbf16>
    %cst_149 = arith.constant dense<0.000000e+00> : vector<24x128xf32>
    %437 = tpu.matmul %435, %436, %cst_149 {dimension_numbers = #tpu.dot_dimension_numbers<[1], [0], [0], [1], [0, 0, 1, 1], [], []>} : vector<24x24xbf16>, vector<24x128xbf16>, vector<24x128xf32> -> vector<24x128xf32>
    %438 = arith.truncf %437 : vector<24x128xf32> to vector<24x128xbf16>
    %439 = vector.extract_strided_slice %344 {offsets = [384, 0], sizes = [128, 128], strides = [1, 1]} : vector<512x128xbf16> to vector<128x128xbf16>
    %cst_150 = arith.constant dense<0.000000e+00> : vector<24x128xf32>
    %440 = tpu.matmul %438, %439, %cst_150 {dimension_numbers = #tpu.dot_dimension_numbers<[1], [0], [0], [1], [0, 0, 1, 1], [], []>} : vector<24x128xbf16>, vector<128x128xbf16>, vector<24x128xf32> -> vector<24x128xf32>
    %441 = arith.addf %417, %440 : vector<24x128xf32>
    %442 = arith.addf %265, %441 : vector<24x128xf32>
    %c0_151 = arith.constant 0 : index
    %c0_152 = arith.constant 0 : index
    %443 = vector.load %arg26[%c0_151, %c0_152] : memref<2x128xf32, #tpu.memory_space<vmem>>, vector<1x128xf32>
    %444 = arith.mulf %442, %442 : vector<24x128xf32>
    %cst_153 = arith.constant dense<0.000000e+00> : vector<24xf32>
    %445 = vector.multi_reduction <add>, %444, %cst_153 [1] : vector<24x128xf32> to vector<24xf32>
    %446 = vector.shape_cast %445 : vector<24xf32> to vector<24x1xf32>
    %cst_154 = arith.constant 3.125000e-02 : f32
    %447 = vector.broadcast %cst_154 : f32 to vector<24x1xf32>
    %448 = arith.mulf %446, %447 : vector<24x1xf32>
    %cst_155 = arith.constant 9.99999997E-7 : f32
    %449 = vector.broadcast %cst_155 : f32 to vector<24x1xf32>
    %450 = arith.addf %448, %449 : vector<24x1xf32>
    %451 = math.rsqrt %450 : vector<24x1xf32>
    %452 = vector.broadcast %451 : vector<24x1xf32> to vector<24x128xf32>
    %453 = arith.mulf %442, %452 : vector<24x128xf32>
    %454 = vector.broadcast %443 : vector<1x128xf32> to vector<24x128xf32>
    %455 = arith.mulf %453, %454 : vector<24x128xf32>
    %456 = arith.truncf %455 : vector<24x128xf32> to vector<24x128xbf16>
    %c0_156 = arith.constant 0 : index
    %c0_157 = arith.constant 0 : index
    %c0_158 = arith.constant 0 : index
    %457 = vector.load %arg27[%c0_156, %c0_157, %c0_158] : memref<2x128x256xbf16, #tpu.memory_space<vmem>>, vector<1x128x256xbf16>
    %458 = vector.shape_cast %457 : vector<1x128x256xbf16> to vector<128x256xbf16>
    %cst_159 = arith.constant dense<0.000000e+00> : vector<24x256xf32>
    %459 = tpu.matmul %456, %458, %cst_159 {dimension_numbers = #tpu.dot_dimension_numbers<[1], [0], [0], [1], [0, 0, 1, 1], [], []>} : vector<24x128xbf16>, vector<128x256xbf16>, vector<24x256xf32> -> vector<24x256xf32>
    %460 = vector.extract_strided_slice %459 {offsets = [0, 0], sizes = [24, 128], strides = [1, 1]} : vector<24x256xf32> to vector<24x128xf32>
    %461 = vector.extract_strided_slice %459 {offsets = [0, 128], sizes = [24, 128], strides = [1, 1]} : vector<24x256xf32> to vector<24x128xf32>
    %462 = arith.negf %460 : vector<24x128xf32>
    %463 = math.exp %462 : vector<24x128xf32>
    %cst_160 = arith.constant 1.000000e+00 : f32
    %464 = vector.broadcast %cst_160 : f32 to vector<24x128xf32>
    %465 = arith.addf %464, %463 : vector<24x128xf32>
    %466 = arith.divf %464, %465 : vector<24x128xf32>
    %467 = arith.mulf %460, %466 : vector<24x128xf32>
    %468 = arith.mulf %467, %461 : vector<24x128xf32>
    %469 = arith.truncf %468 : vector<24x128xf32> to vector<24x128xbf16>
    %c0_161 = arith.constant 0 : index
    %c0_162 = arith.constant 0 : index
    %c0_163 = arith.constant 0 : index
    %470 = vector.load %arg28[%c0_161, %c0_162, %c0_163] : memref<2x128x128xbf16, #tpu.memory_space<vmem>>, vector<1x128x128xbf16>
    %471 = vector.shape_cast %470 : vector<1x128x128xbf16> to vector<128x128xbf16>
    %cst_164 = arith.constant dense<0.000000e+00> : vector<24x128xf32>
    %472 = tpu.matmul %469, %471, %cst_164 {dimension_numbers = #tpu.dot_dimension_numbers<[1], [0], [0], [1], [0, 0, 1, 1], [], []>} : vector<24x128xbf16>, vector<128x128xbf16>, vector<24x128xf32> -> vector<24x128xf32>
    %473 = arith.addf %442, %472 : vector<24x128xf32>
    %c1_165 = arith.constant 1 : index
    %c0_166 = arith.constant 0 : index
    %474 = vector.load %arg23[%c1_165, %c0_166] : memref<2x128xf32, #tpu.memory_space<vmem>>, vector<1x128xf32>
    %475 = arith.mulf %473, %473 : vector<24x128xf32>
    %cst_167 = arith.constant dense<0.000000e+00> : vector<24xf32>
    %476 = vector.multi_reduction <add>, %475, %cst_167 [1] : vector<24x128xf32> to vector<24xf32>
    %477 = vector.shape_cast %476 : vector<24xf32> to vector<24x1xf32>
    %cst_168 = arith.constant 3.125000e-02 : f32
    %478 = vector.broadcast %cst_168 : f32 to vector<24x1xf32>
    %479 = arith.mulf %477, %478 : vector<24x1xf32>
    %cst_169 = arith.constant 9.99999997E-7 : f32
    %480 = vector.broadcast %cst_169 : f32 to vector<24x1xf32>
    %481 = arith.addf %479, %480 : vector<24x1xf32>
    %482 = math.rsqrt %481 : vector<24x1xf32>
    %483 = vector.broadcast %482 : vector<24x1xf32> to vector<24x128xf32>
    %484 = arith.mulf %473, %483 : vector<24x128xf32>
    %485 = vector.broadcast %474 : vector<1x128xf32> to vector<24x128xf32>
    %486 = arith.mulf %484, %485 : vector<24x128xf32>
    %c1_170 = arith.constant 1 : index
    %c0_171 = arith.constant 0 : index
    %c0_172 = arith.constant 0 : index
    %487 = vector.load %arg24[%c1_170, %c0_171, %c0_172] : memref<2x128x1536xbf16, #tpu.memory_space<vmem>>, vector<1x128x1536xbf16>
    %488 = vector.shape_cast %487 : vector<1x128x1536xbf16> to vector<128x1536xbf16>
    %c1_173 = arith.constant 1 : index
    %c0_174 = arith.constant 0 : index
    %c0_175 = arith.constant 0 : index
    %489 = vector.load %arg25[%c1_173, %c0_174, %c0_175] : memref<2x512x128xbf16, #tpu.memory_space<vmem>>, vector<1x512x128xbf16>
    %490 = vector.shape_cast %489 : vector<1x512x128xbf16> to vector<512x128xbf16>
    %491 = arith.truncf %486 : vector<24x128xf32> to vector<24x128xbf16>
    %cst_176 = arith.constant dense<0.000000e+00> : vector<24x1536xf32>
    %492 = tpu.matmul %491, %488, %cst_176 {dimension_numbers = #tpu.dot_dimension_numbers<[1], [0], [0], [1], [0, 0, 1, 1], [], []>} : vector<24x128xbf16>, vector<128x1536xbf16>, vector<24x1536xf32> -> vector<24x1536xf32>
    %493 = vector.extract_strided_slice %492 {offsets = [0, 0], sizes = [24, 128], strides = [1, 1]} : vector<24x1536xf32> to vector<24x128xf32>
    %494 = vector.extract_strided_slice %492 {offsets = [0, 128], sizes = [24, 128], strides = [1, 1]} : vector<24x1536xf32> to vector<24x128xf32>
    %495 = vector.extract_strided_slice %492 {offsets = [0, 256], sizes = [24, 128], strides = [1, 1]} : vector<24x1536xf32> to vector<24x128xf32>
    %496 = arith.truncf %493 : vector<24x128xf32> to vector<24x128xbf16>
    %497 = arith.truncf %494 : vector<24x128xf32> to vector<24x128xbf16>
    %cst_177 = arith.constant dense<0.000000e+00> : vector<24x24xf32>
    %498 = tpu.matmul %496, %497, %cst_177 {dimension_numbers = #tpu.dot_dimension_numbers<[1], [1], [0], [0], [0, 0, 1, 0], [], []>} : vector<24x128xbf16>, vector<24x128xbf16>, vector<24x24xf32> -> vector<24x24xf32>
    %499 = arith.addf %498, %327 : vector<24x24xf32>
    %cst_178 = arith.constant dense<0xFF800000> : vector<24xf32>
    %500 = vector.multi_reduction <maximumf>, %499, %cst_178 [1] : vector<24x24xf32> to vector<24xf32>
    %501 = vector.shape_cast %500 : vector<24xf32> to vector<24x1xf32>
    %502 = vector.broadcast %501 : vector<24x1xf32> to vector<24x24xf32>
    %503 = arith.subf %499, %502 : vector<24x24xf32>
    %504 = math.exp %503 : vector<24x24xf32>
    %cst_179 = arith.constant dense<0.000000e+00> : vector<24xf32>
    %505 = vector.multi_reduction <add>, %504, %cst_179 [1] : vector<24x24xf32> to vector<24xf32>
    %506 = vector.shape_cast %505 : vector<24xf32> to vector<24x1xf32>
    %507 = tpu.reciprocal %506 {approx = true} : vector<24x1xf32> -> vector<24x1xf32>
    %508 = vector.broadcast %507 : vector<24x1xf32> to vector<24x24xf32>
    %509 = arith.mulf %504, %508 : vector<24x24xf32>
    %510 = arith.truncf %509 : vector<24x24xf32> to vector<24x24xbf16>
    %511 = arith.truncf %495 : vector<24x128xf32> to vector<24x128xbf16>
    %cst_180 = arith.constant dense<0.000000e+00> : vector<24x128xf32>
    %512 = tpu.matmul %510, %511, %cst_180 {dimension_numbers = #tpu.dot_dimension_numbers<[1], [0], [0], [1], [0, 0, 1, 1], [], []>} : vector<24x24xbf16>, vector<24x128xbf16>, vector<24x128xf32> -> vector<24x128xf32>
    %513 = arith.truncf %512 : vector<24x128xf32> to vector<24x128xbf16>
    %514 = vector.extract_strided_slice %490 {offsets = [0, 0], sizes = [128, 128], strides = [1, 1]} : vector<512x128xbf16> to vector<128x128xbf16>
    %cst_181 = arith.constant dense<0.000000e+00> : vector<24x128xf32>
    %515 = tpu.matmul %513, %514, %cst_181 {dimension_numbers = #tpu.dot_dimension_numbers<[1], [0], [0], [1], [0, 0, 1, 1], [], []>} : vector<24x128xbf16>, vector<128x128xbf16>, vector<24x128xf32> -> vector<24x128xf32>
    %516 = vector.extract_strided_slice %492 {offsets = [0, 384], sizes = [24, 128], strides = [1, 1]} : vector<24x1536xf32> to vector<24x128xf32>
    %517 = vector.extract_strided_slice %492 {offsets = [0, 512], sizes = [24, 128], strides = [1, 1]} : vector<24x1536xf32> to vector<24x128xf32>
    %518 = vector.extract_strided_slice %492 {offsets = [0, 640], sizes = [24, 128], strides = [1, 1]} : vector<24x1536xf32> to vector<24x128xf32>
    %519 = arith.truncf %516 : vector<24x128xf32> to vector<24x128xbf16>
    %520 = arith.truncf %517 : vector<24x128xf32> to vector<24x128xbf16>
    %cst_182 = arith.constant dense<0.000000e+00> : vector<24x24xf32>
    %521 = tpu.matmul %519, %520, %cst_182 {dimension_numbers = #tpu.dot_dimension_numbers<[1], [1], [0], [0], [0, 0, 1, 0], [], []>} : vector<24x128xbf16>, vector<24x128xbf16>, vector<24x24xf32> -> vector<24x24xf32>
    %522 = arith.addf %521, %327 : vector<24x24xf32>
    %cst_183 = arith.constant dense<0xFF800000> : vector<24xf32>
    %523 = vector.multi_reduction <maximumf>, %522, %cst_183 [1] : vector<24x24xf32> to vector<24xf32>
    %524 = vector.shape_cast %523 : vector<24xf32> to vector<24x1xf32>
    %525 = vector.broadcast %524 : vector<24x1xf32> to vector<24x24xf32>
    %526 = arith.subf %522, %525 : vector<24x24xf32>
    %527 = math.exp %526 : vector<24x24xf32>
    %cst_184 = arith.constant dense<0.000000e+00> : vector<24xf32>
    %528 = vector.multi_reduction <add>, %527, %cst_184 [1] : vector<24x24xf32> to vector<24xf32>
    %529 = vector.shape_cast %528 : vector<24xf32> to vector<24x1xf32>
    %530 = tpu.reciprocal %529 {approx = true} : vector<24x1xf32> -> vector<24x1xf32>
    %531 = vector.broadcast %530 : vector<24x1xf32> to vector<24x24xf32>
    %532 = arith.mulf %527, %531 : vector<24x24xf32>
    %533 = arith.truncf %532 : vector<24x24xf32> to vector<24x24xbf16>
    %534 = arith.truncf %518 : vector<24x128xf32> to vector<24x128xbf16>
    %cst_185 = arith.constant dense<0.000000e+00> : vector<24x128xf32>
    %535 = tpu.matmul %533, %534, %cst_185 {dimension_numbers = #tpu.dot_dimension_numbers<[1], [0], [0], [1], [0, 0, 1, 1], [], []>} : vector<24x24xbf16>, vector<24x128xbf16>, vector<24x128xf32> -> vector<24x128xf32>
    %536 = arith.truncf %535 : vector<24x128xf32> to vector<24x128xbf16>
    %537 = vector.extract_strided_slice %490 {offsets = [128, 0], sizes = [128, 128], strides = [1, 1]} : vector<512x128xbf16> to vector<128x128xbf16>
    %cst_186 = arith.constant dense<0.000000e+00> : vector<24x128xf32>
    %538 = tpu.matmul %536, %537, %cst_186 {dimension_numbers = #tpu.dot_dimension_numbers<[1], [0], [0], [1], [0, 0, 1, 1], [], []>} : vector<24x128xbf16>, vector<128x128xbf16>, vector<24x128xf32> -> vector<24x128xf32>
    %539 = arith.addf %515, %538 : vector<24x128xf32>
    %540 = vector.extract_strided_slice %492 {offsets = [0, 768], sizes = [24, 128], strides = [1, 1]} : vector<24x1536xf32> to vector<24x128xf32>
    %541 = vector.extract_strided_slice %492 {offsets = [0, 896], sizes = [24, 128], strides = [1, 1]} : vector<24x1536xf32> to vector<24x128xf32>
    %542 = vector.extract_strided_slice %492 {offsets = [0, 1024], sizes = [24, 128], strides = [1, 1]} : vector<24x1536xf32> to vector<24x128xf32>
    %543 = arith.truncf %540 : vector<24x128xf32> to vector<24x128xbf16>
    %544 = arith.truncf %541 : vector<24x128xf32> to vector<24x128xbf16>
    %cst_187 = arith.constant dense<0.000000e+00> : vector<24x24xf32>
    %545 = tpu.matmul %543, %544, %cst_187 {dimension_numbers = #tpu.dot_dimension_numbers<[1], [1], [0], [0], [0, 0, 1, 0], [], []>} : vector<24x128xbf16>, vector<24x128xbf16>, vector<24x24xf32> -> vector<24x24xf32>
    %546 = arith.addf %545, %327 : vector<24x24xf32>
    %cst_188 = arith.constant dense<0xFF800000> : vector<24xf32>
    %547 = vector.multi_reduction <maximumf>, %546, %cst_188 [1] : vector<24x24xf32> to vector<24xf32>
    %548 = vector.shape_cast %547 : vector<24xf32> to vector<24x1xf32>
    %549 = vector.broadcast %548 : vector<24x1xf32> to vector<24x24xf32>
    %550 = arith.subf %546, %549 : vector<24x24xf32>
    %551 = math.exp %550 : vector<24x24xf32>
    %cst_189 = arith.constant dense<0.000000e+00> : vector<24xf32>
    %552 = vector.multi_reduction <add>, %551, %cst_189 [1] : vector<24x24xf32> to vector<24xf32>
    %553 = vector.shape_cast %552 : vector<24xf32> to vector<24x1xf32>
    %554 = tpu.reciprocal %553 {approx = true} : vector<24x1xf32> -> vector<24x1xf32>
    %555 = vector.broadcast %554 : vector<24x1xf32> to vector<24x24xf32>
    %556 = arith.mulf %551, %555 : vector<24x24xf32>
    %557 = arith.truncf %556 : vector<24x24xf32> to vector<24x24xbf16>
    %558 = arith.truncf %542 : vector<24x128xf32> to vector<24x128xbf16>
    %cst_190 = arith.constant dense<0.000000e+00> : vector<24x128xf32>
    %559 = tpu.matmul %557, %558, %cst_190 {dimension_numbers = #tpu.dot_dimension_numbers<[1], [0], [0], [1], [0, 0, 1, 1], [], []>} : vector<24x24xbf16>, vector<24x128xbf16>, vector<24x128xf32> -> vector<24x128xf32>
    %560 = arith.truncf %559 : vector<24x128xf32> to vector<24x128xbf16>
    %561 = vector.extract_strided_slice %490 {offsets = [256, 0], sizes = [128, 128], strides = [1, 1]} : vector<512x128xbf16> to vector<128x128xbf16>
    %cst_191 = arith.constant dense<0.000000e+00> : vector<24x128xf32>
    %562 = tpu.matmul %560, %561, %cst_191 {dimension_numbers = #tpu.dot_dimension_numbers<[1], [0], [0], [1], [0, 0, 1, 1], [], []>} : vector<24x128xbf16>, vector<128x128xbf16>, vector<24x128xf32> -> vector<24x128xf32>
    %563 = arith.addf %539, %562 : vector<24x128xf32>
    %564 = vector.extract_strided_slice %492 {offsets = [0, 1152], sizes = [24, 128], strides = [1, 1]} : vector<24x1536xf32> to vector<24x128xf32>
    %565 = vector.extract_strided_slice %492 {offsets = [0, 1280], sizes = [24, 128], strides = [1, 1]} : vector<24x1536xf32> to vector<24x128xf32>
    %566 = vector.extract_strided_slice %492 {offsets = [0, 1408], sizes = [24, 128], strides = [1, 1]} : vector<24x1536xf32> to vector<24x128xf32>
    %567 = arith.truncf %564 : vector<24x128xf32> to vector<24x128xbf16>
    %568 = arith.truncf %565 : vector<24x128xf32> to vector<24x128xbf16>
    %cst_192 = arith.constant dense<0.000000e+00> : vector<24x24xf32>
    %569 = tpu.matmul %567, %568, %cst_192 {dimension_numbers = #tpu.dot_dimension_numbers<[1], [1], [0], [0], [0, 0, 1, 0], [], []>} : vector<24x128xbf16>, vector<24x128xbf16>, vector<24x24xf32> -> vector<24x24xf32>
    %570 = arith.addf %569, %327 : vector<24x24xf32>
    %cst_193 = arith.constant dense<0xFF800000> : vector<24xf32>
    %571 = vector.multi_reduction <maximumf>, %570, %cst_193 [1] : vector<24x24xf32> to vector<24xf32>
    %572 = vector.shape_cast %571 : vector<24xf32> to vector<24x1xf32>
    %573 = vector.broadcast %572 : vector<24x1xf32> to vector<24x24xf32>
    %574 = arith.subf %570, %573 : vector<24x24xf32>
    %575 = math.exp %574 : vector<24x24xf32>
    %cst_194 = arith.constant dense<0.000000e+00> : vector<24xf32>
    %576 = vector.multi_reduction <add>, %575, %cst_194 [1] : vector<24x24xf32> to vector<24xf32>
    %577 = vector.shape_cast %576 : vector<24xf32> to vector<24x1xf32>
    %578 = tpu.reciprocal %577 {approx = true} : vector<24x1xf32> -> vector<24x1xf32>
    %579 = vector.broadcast %578 : vector<24x1xf32> to vector<24x24xf32>
    %580 = arith.mulf %575, %579 : vector<24x24xf32>
    %581 = arith.truncf %580 : vector<24x24xf32> to vector<24x24xbf16>
    %582 = arith.truncf %566 : vector<24x128xf32> to vector<24x128xbf16>
    %cst_195 = arith.constant dense<0.000000e+00> : vector<24x128xf32>
    %583 = tpu.matmul %581, %582, %cst_195 {dimension_numbers = #tpu.dot_dimension_numbers<[1], [0], [0], [1], [0, 0, 1, 1], [], []>} : vector<24x24xbf16>, vector<24x128xbf16>, vector<24x128xf32> -> vector<24x128xf32>
    %584 = arith.truncf %583 : vector<24x128xf32> to vector<24x128xbf16>
    %585 = vector.extract_strided_slice %490 {offsets = [384, 0], sizes = [128, 128], strides = [1, 1]} : vector<512x128xbf16> to vector<128x128xbf16>
    %cst_196 = arith.constant dense<0.000000e+00> : vector<24x128xf32>
    %586 = tpu.matmul %584, %585, %cst_196 {dimension_numbers = #tpu.dot_dimension_numbers<[1], [0], [0], [1], [0, 0, 1, 1], [], []>} : vector<24x128xbf16>, vector<128x128xbf16>, vector<24x128xf32> -> vector<24x128xf32>
    %587 = arith.addf %563, %586 : vector<24x128xf32>
    %588 = arith.addf %473, %587 : vector<24x128xf32>
    %c1_197 = arith.constant 1 : index
    %c0_198 = arith.constant 0 : index
    %589 = vector.load %arg26[%c1_197, %c0_198] : memref<2x128xf32, #tpu.memory_space<vmem>>, vector<1x128xf32>
    %590 = arith.mulf %588, %588 : vector<24x128xf32>
    %cst_199 = arith.constant dense<0.000000e+00> : vector<24xf32>
    %591 = vector.multi_reduction <add>, %590, %cst_199 [1] : vector<24x128xf32> to vector<24xf32>
    %592 = vector.shape_cast %591 : vector<24xf32> to vector<24x1xf32>
    %cst_200 = arith.constant 3.125000e-02 : f32
    %593 = vector.broadcast %cst_200 : f32 to vector<24x1xf32>
    %594 = arith.mulf %592, %593 : vector<24x1xf32>
    %cst_201 = arith.constant 9.99999997E-7 : f32
    %595 = vector.broadcast %cst_201 : f32 to vector<24x1xf32>
    %596 = arith.addf %594, %595 : vector<24x1xf32>
    %597 = math.rsqrt %596 : vector<24x1xf32>
    %598 = vector.broadcast %597 : vector<24x1xf32> to vector<24x128xf32>
    %599 = arith.mulf %588, %598 : vector<24x128xf32>
    %600 = vector.broadcast %589 : vector<1x128xf32> to vector<24x128xf32>
    %601 = arith.mulf %599, %600 : vector<24x128xf32>
    %602 = arith.truncf %601 : vector<24x128xf32> to vector<24x128xbf16>
    %c1_202 = arith.constant 1 : index
    %c0_203 = arith.constant 0 : index
    %c0_204 = arith.constant 0 : index
    %603 = vector.load %arg27[%c1_202, %c0_203, %c0_204] : memref<2x128x256xbf16, #tpu.memory_space<vmem>>, vector<1x128x256xbf16>
    %604 = vector.shape_cast %603 : vector<1x128x256xbf16> to vector<128x256xbf16>
    %cst_205 = arith.constant dense<0.000000e+00> : vector<24x256xf32>
    %605 = tpu.matmul %602, %604, %cst_205 {dimension_numbers = #tpu.dot_dimension_numbers<[1], [0], [0], [1], [0, 0, 1, 1], [], []>} : vector<24x128xbf16>, vector<128x256xbf16>, vector<24x256xf32> -> vector<24x256xf32>
    %606 = vector.extract_strided_slice %605 {offsets = [0, 0], sizes = [24, 128], strides = [1, 1]} : vector<24x256xf32> to vector<24x128xf32>
    %607 = vector.extract_strided_slice %605 {offsets = [0, 128], sizes = [24, 128], strides = [1, 1]} : vector<24x256xf32> to vector<24x128xf32>
    %608 = arith.negf %606 : vector<24x128xf32>
    %609 = math.exp %608 : vector<24x128xf32>
    %cst_206 = arith.constant 1.000000e+00 : f32
    %610 = vector.broadcast %cst_206 : f32 to vector<24x128xf32>
    %611 = arith.addf %610, %609 : vector<24x128xf32>
    %612 = arith.divf %610, %611 : vector<24x128xf32>
    %613 = arith.mulf %606, %612 : vector<24x128xf32>
    %614 = arith.mulf %613, %607 : vector<24x128xf32>
    %615 = arith.truncf %614 : vector<24x128xf32> to vector<24x128xbf16>
    %c1_207 = arith.constant 1 : index
    %c0_208 = arith.constant 0 : index
    %c0_209 = arith.constant 0 : index
    %616 = vector.load %arg28[%c1_207, %c0_208, %c0_209] : memref<2x128x128xbf16, #tpu.memory_space<vmem>>, vector<1x128x128xbf16>
    %617 = vector.shape_cast %616 : vector<1x128x128xbf16> to vector<128x128xbf16>
    %cst_210 = arith.constant dense<0.000000e+00> : vector<24x128xf32>
    %618 = tpu.matmul %615, %617, %cst_210 {dimension_numbers = #tpu.dot_dimension_numbers<[1], [0], [0], [1], [0, 0, 1, 1], [], []>} : vector<24x128xbf16>, vector<128x128xbf16>, vector<24x128xf32> -> vector<24x128xf32>
    %619 = arith.addf %588, %618 : vector<24x128xf32>
    %c0_211 = arith.constant 0 : index
    %c0_212 = arith.constant 0 : index
    %620 = vector.load %arg29[%c0_211, %c0_212] : memref<1x128xf32, #tpu.memory_space<vmem>>, vector<1x128xf32>
    %621 = arith.mulf %619, %619 : vector<24x128xf32>
    %cst_213 = arith.constant dense<0.000000e+00> : vector<24xf32>
    %622 = vector.multi_reduction <add>, %621, %cst_213 [1] : vector<24x128xf32> to vector<24xf32>
    %623 = vector.shape_cast %622 : vector<24xf32> to vector<24x1xf32>
    %cst_214 = arith.constant 3.125000e-02 : f32
    %624 = vector.broadcast %cst_214 : f32 to vector<24x1xf32>
    %625 = arith.mulf %623, %624 : vector<24x1xf32>
    %cst_215 = arith.constant 9.99999997E-7 : f32
    %626 = vector.broadcast %cst_215 : f32 to vector<24x1xf32>
    %627 = arith.addf %625, %626 : vector<24x1xf32>
    %628 = math.rsqrt %627 : vector<24x1xf32>
    %629 = vector.broadcast %628 : vector<24x1xf32> to vector<24x128xf32>
    %630 = arith.mulf %619, %629 : vector<24x128xf32>
    %631 = vector.broadcast %620 : vector<1x128xf32> to vector<24x128xf32>
    %632 = arith.mulf %630, %631 : vector<24x128xf32>
    %633 = arith.truncf %632 : vector<24x128xf32> to vector<24x128xbf16>
    %c0_216 = arith.constant 0 : index
    %c0_217 = arith.constant 0 : index
    %634 = vector.load %arg30[%c0_216, %c0_217] : memref<128x128xbf16, #tpu.memory_space<vmem>>, vector<128x128xbf16>
    %cst_218 = arith.constant dense<0.000000e+00> : vector<24x128xf32>
    %635 = tpu.matmul %633, %634, %cst_218 {dimension_numbers = #tpu.dot_dimension_numbers<[1], [0], [0], [1], [0, 0, 1, 1], [], []>} : vector<24x128xbf16>, vector<128x128xbf16>, vector<24x128xf32> -> vector<24x128xf32>
    %c0_219 = arith.constant 0 : index
    %c0_220 = arith.constant 0 : index
    %636 = vector.load %arg31[%c0_219, %c0_220] : memref<24x128xf32, #tpu.memory_space<vmem>>, vector<24x128xf32>
    tpu.vector_store %arg31[%c0_219, %c0_220], %635 {strides = array<i32>} : memref<24x128xf32, #tpu.memory_space<vmem>>, vector<24x128xf32>,
    return
  }
  func.func @transform_0(%arg0: i32) -> (i32, i32) {
    %c0_i32 = arith.constant 0 : i32
    %c0_i32_0 = arith.constant 0 : i32
    return %arg0, %c0_i32 : i32, i32
  }
  func.func @transform_1(%arg0: i32) -> (i32, i32, i32) {
    %c0_i32 = arith.constant 0 : i32
    %c0_i32_0 = arith.constant 0 : i32
    %c0_i32_1 = arith.constant 0 : i32
    return %arg0, %c0_i32, %c0_i32_0 : i32, i32, i32
  }
  func.func @transform_2(%arg0: i32) -> (i32, i32, i32) {
    %c0_i32 = arith.constant 0 : i32
    %c0_i32_0 = arith.constant 0 : i32
    %c0_i32_1 = arith.constant 0 : i32
    return %arg0, %c0_i32, %c0_i32_0 : i32, i32, i32
  }
  func.func @transform_3(%arg0: i32) -> (i32, i32) {
    %c0_i32 = arith.constant 0 : i32
    %c0_i32_0 = arith.constant 0 : i32
    %c0_i32_1 = arith.constant 0 : i32
    return %c0_i32, %c0_i32_0 : i32, i32
  }
  func.func @transform_4(%arg0: i32) -> (i32, i32) {
    %c0_i32 = arith.constant 0 : i32
    %c0_i32_0 = arith.constant 0 : i32
    %c0_i32_1 = arith.constant 0 : i32
    return %c0_i32, %c0_i32_0 : i32, i32
  }
  func.func @transform_5(%arg0: i32) -> (i32, i32) {
    %c0_i32 = arith.constant 0 : i32
    %c0_i32_0 = arith.constant 0 : i32
    %c0_i32_1 = arith.constant 0 : i32
    return %c0_i32, %c0_i32_0 : i32, i32
  }
  func.func @transform_6(%arg0: i32) -> (i32, i32) {
    %c0_i32 = arith.constant 0 : i32
    %c0_i32_0 = arith.constant 0 : i32
    %c0_i32_1 = arith.constant 0 : i32
    return %c0_i32, %c0_i32_0 : i32, i32
  }
  func.func @transform_7(%arg0: i32) -> (i32, i32) {
    %c0_i32 = arith.constant 0 : i32
    %c0_i32_0 = arith.constant 0 : i32
    %c0_i32_1 = arith.constant 0 : i32
    return %c0_i32, %c0_i32_0 : i32, i32
  }
  func.func @transform_8(%arg0: i32) -> (i32, i32) {
    %c0_i32 = arith.constant 0 : i32
    %c0_i32_0 = arith.constant 0 : i32
    %c0_i32_1 = arith.constant 0 : i32
    return %c0_i32, %c0_i32_0 : i32, i32
  }
  func.func @transform_9(%arg0: i32) -> (i32, i32) {
    %c0_i32 = arith.constant 0 : i32
    %c0_i32_0 = arith.constant 0 : i32
    %c0_i32_1 = arith.constant 0 : i32
    return %c0_i32, %c0_i32_0 : i32, i32
  }
  func.func @transform_10(%arg0: i32) -> (i32, i32) {
    %c0_i32 = arith.constant 0 : i32
    %c0_i32_0 = arith.constant 0 : i32
    %c0_i32_1 = arith.constant 0 : i32
    return %c0_i32, %c0_i32_0 : i32, i32
  }
  func.func @transform_11(%arg0: i32) -> (i32, i32) {
    %c0_i32 = arith.constant 0 : i32
    %c0_i32_0 = arith.constant 0 : i32
    %c0_i32_1 = arith.constant 0 : i32
    return %c0_i32, %c0_i32_0 : i32, i32
  }
  func.func @transform_12(%arg0: i32) -> (i32, i32) {
    %c0_i32 = arith.constant 0 : i32
    %c0_i32_0 = arith.constant 0 : i32
    %c0_i32_1 = arith.constant 0 : i32
    return %c0_i32, %c0_i32_0 : i32, i32
  }
  func.func @transform_13(%arg0: i32) -> (i32, i32) {
    %c0_i32 = arith.constant 0 : i32
    %c0_i32_0 = arith.constant 0 : i32
    %c0_i32_1 = arith.constant 0 : i32
    return %c0_i32, %c0_i32_0 : i32, i32
  }
  func.func @transform_14(%arg0: i32) -> (i32, i32) {
    %c0_i32 = arith.constant 0 : i32
    %c0_i32_0 = arith.constant 0 : i32
    %c0_i32_1 = arith.constant 0 : i32
    return %c0_i32, %c0_i32_0 : i32, i32
  }
  func.func @transform_15(%arg0: i32) -> (i32, i32) {
    %c0_i32 = arith.constant 0 : i32
    %c0_i32_0 = arith.constant 0 : i32
    %c0_i32_1 = arith.constant 0 : i32
    return %c0_i32, %c0_i32_0 : i32, i32
  }
  func.func @transform_16(%arg0: i32) -> (i32, i32) {
    %c0_i32 = arith.constant 0 : i32
    %c0_i32_0 = arith.constant 0 : i32
    %c0_i32_1 = arith.constant 0 : i32
    return %c0_i32, %c0_i32_0 : i32, i32
  }
  func.func @transform_17(%arg0: i32) -> (i32, i32) {
    %c0_i32 = arith.constant 0 : i32
    %c0_i32_0 = arith.constant 0 : i32
    %c0_i32_1 = arith.constant 0 : i32
    return %c0_i32, %c0_i32_0 : i32, i32
  }
  func.func @transform_18(%arg0: i32) -> (i32, i32) {
    %c0_i32 = arith.constant 0 : i32
    %c0_i32_0 = arith.constant 0 : i32
    %c0_i32_1 = arith.constant 0 : i32
    return %c0_i32, %c0_i32_0 : i32, i32
  }
  func.func @transform_19(%arg0: i32) -> (i32, i32) {
    %c0_i32 = arith.constant 0 : i32
    %c0_i32_0 = arith.constant 0 : i32
    %c0_i32_1 = arith.constant 0 : i32
    return %c0_i32, %c0_i32_0 : i32, i32
  }
  func.func @transform_20(%arg0: i32) -> (i32, i32) {
    %c0_i32 = arith.constant 0 : i32
    %c0_i32_0 = arith.constant 0 : i32
    %c0_i32_1 = arith.constant 0 : i32
    return %c0_i32, %c0_i32_0 : i32, i32
  }
  func.func @transform_21(%arg0: i32) -> (i32, i32) {
    %c0_i32 = arith.constant 0 : i32
    %c0_i32_0 = arith.constant 0 : i32
    %c0_i32_1 = arith.constant 0 : i32
    return %c0_i32, %c0_i32_0 : i32, i32
  }
  func.func @transform_22(%arg0: i32) -> (i32, i32) {
    %c0_i32 = arith.constant 0 : i32
    %c0_i32_0 = arith.constant 0 : i32
    %c0_i32_1 = arith.constant 0 : i32
    return %c0_i32, %c0_i32_0 : i32, i32
  }
  func.func @transform_23(%arg0: i32) -> (i32, i32, i32) {
    %c0_i32 = arith.constant 0 : i32
    %c0_i32_0 = arith.constant 0 : i32
    %c0_i32_1 = arith.constant 0 : i32
    %c0_i32_2 = arith.constant 0 : i32
    return %c0_i32, %c0_i32_0, %c0_i32_1 : i32, i32, i32
  }
  func.func @transform_24(%arg0: i32) -> (i32, i32, i32) {
    %c0_i32 = arith.constant 0 : i32
    %c0_i32_0 = arith.constant 0 : i32
    %c0_i32_1 = arith.constant 0 : i32
    %c0_i32_2 = arith.constant 0 : i32
    return %c0_i32, %c0_i32_0, %c0_i32_1 : i32, i32, i32
  }
  func.func @transform_25(%arg0: i32) -> (i32, i32) {
    %c0_i32 = arith.constant 0 : i32
    %c0_i32_0 = arith.constant 0 : i32
    %c0_i32_1 = arith.constant 0 : i32
    return %c0_i32, %c0_i32_0 : i32, i32
  }
  func.func @transform_26(%arg0: i32) -> (i32, i32, i32) {
    %c0_i32 = arith.constant 0 : i32
    %c0_i32_0 = arith.constant 0 : i32
    %c0_i32_1 = arith.constant 0 : i32
    %c0_i32_2 = arith.constant 0 : i32
    return %c0_i32, %c0_i32_0, %c0_i32_1 : i32, i32, i32
  }
  func.func @transform_27(%arg0: i32) -> (i32, i32, i32) {
    %c0_i32 = arith.constant 0 : i32
    %c0_i32_0 = arith.constant 0 : i32
    %c0_i32_1 = arith.constant 0 : i32
    %c0_i32_2 = arith.constant 0 : i32
    return %c0_i32, %c0_i32_0, %c0_i32_1 : i32, i32, i32
  }
  func.func @transform_28(%arg0: i32) -> (i32, i32) {
    %c0_i32 = arith.constant 0 : i32
    %c0_i32_0 = arith.constant 0 : i32
    %c0_i32_1 = arith.constant 0 : i32
    return %c0_i32, %c0_i32_0 : i32, i32
  }
  func.func @transform_29(%arg0: i32) -> (i32, i32) {
    %c0_i32 = arith.constant 0 : i32
    %c0_i32_0 = arith.constant 0 : i32
    %c0_i32_1 = arith.constant 0 : i32
    return %c0_i32, %c0_i32_0 : i32, i32
  }
  func.func @transform_30(%arg0: i32) -> (i32, i32) {
    %c0_i32 = arith.constant 0 : i32
    %c0_i32_0 = arith.constant 0 : i32
    %c0_i32_1 = arith.constant 0 : i32
    return %c0_i32, %c0_i32_0 : i32, i32
  }
}

</mosaic_0001>

<bundles_post_ra>
// kernel: a_call__.1
= control target key start
LH: loop header
LB: loop body
LE: loop exit
PB: predicated region body
PF: predicated region fallthrough
CT: control target
= control target key end

     0   :  { %v9969_v0 = vmov 0   ;;  %s9970_s3 = smov 3   ;;  %s9971_s7 = smov 2   ;;  %vm136_vm0 = vcmask 1043456   ;;  %vm257_vm1 = vcmask 523264   ;;  %vm9977_vm2 = vmmov 0   ;;  %s11310_s0 = inlined_call_operand.smem [shape: u32[31], index: -1, kind: input, shape index: {}] }
   0x1   :  { %261 = vmatprep.subr.bf16.mxu0 %v9969_v0  ;;  %s10013_s6 = sld [smem:[%s11310_s0 + %s9970_s3]]   ;;  %1064 = vmatprep.mubr.bf16.mxu1 %v9969_v0  ;;  %s9972_s11 = smov 7   ;;  %vm1320_vm4 = vcmask 64512  }
   0x2   :  { %9138 = vset.pattern.permute.xlu1 %v9969_v0  ;;  %9137 = vset.pattern.permute.xlu0 %v9969_v0  ;;  %s7486_s10 = sld [smem:[%s11310_s0 + %s9971_s7]]   ;;  %s9973_s15 = smov 5  }
   0x3   :  { %s10050_s14 = sld [smem:[%s11310_s0 + %s9972_s11]]   ;;  %s9974_s19 = smov 4  }
   0x4   :  { %s7489_s18 = sld [smem:[%s11310_s0 + %s9973_s15]]   ;;  %s9975_s23 = smov 6  }
   0x5   :  { %s7488_s22 = sld [smem:[%s11310_s0 + %s9974_s19]]   ;;  %s9978_s27 = smov 8  }
   0x6   :  { %s7490_s26 = sld [smem:[%s11310_s0 + %s9975_s23]]   ;;  %s9980_s1 = smov 9  }
   0x7   :  { %v9139_v1 = vld [vmem:[%s10013_s6] sm:$0xff]   ;;  %v9140_v2 = vld [vmem:[%s10013_s6 + $0x8] sm:$0xff]   ;;  %v9141_v3 = vld [vmem:[%s10013_s6 + $0x10] sm:$0xff]   ;;  %s10197_s30 = sld [smem:[%s11310_s0 + %s9978_s27]]   ;;  %s9981_s5 = smov 12  }
   0x8   :  { %262 = vmatpush1.bf16.msra.mxu0 %v9139_v1  ;;  %v9142_v4 = vld [vmem:[%s10013_s6 + $0x18] sm:$0xff]   ;;  %v127_v5 = vld [vmem:[%s7486_s10] sm:$0xff]  ;;  %v7515_v6 = vld [vmem:[%s7486_s10 + $0x8] sm:$0xff]  ;;  %s10270_s4 = sld [smem:[%s11310_s0 + %s9980_s1]]   ;;  %s9982_s9 = smov 10  }
   0x9   :  { %263 = vmatprep.subr.bf16.mxu0 %v9969_v0  ;;  %v131_v7 = vcombine.high %v127_v5, %v127_v5  ;;  %v9143_v8 = vld [vmem:[%s10013_s6 + $0x20] sm:$0xff]   ;;  %v9144_v11 = vld [vmem:[%s10013_s6 + $0x28] sm:$0xff]   ;;  %v9145_v12 = vld [vmem:[%s10013_s6 + $0x30] sm:$0xff]   ;;  %v134_v17 = vcombine.low %v7515_v6, %v7515_v6  ;;  %s10393_s8 = sld [smem:[%s11310_s0 + %s9981_s5]]   ;;  %s9983_s13 = smov 11  }
   0xa   :  { %v9146_v13 = vld [vmem:[%s10013_s6 + $0x38] sm:$0xff]   ;;  %v9147_v14 = vld [vmem:[%s10013_s6 + $0x40] sm:$0xff]   ;;  %v9148_v15 = vld [vmem:[%s10013_s6 + $0x48] sm:$0xff]   ;;  %s7494_s12 = sld [smem:[%s11310_s0 + %s9982_s9]]   ;;  %s9984_s17 = smov 14  }
   0xb   :  { %v138_v9 = vsel %vm136_vm0, %v131_v7, %v7515_v6  ;;  %v9149_v16 = vld [vmem:[%s10013_s6 + $0x50] sm:$0xff]   ;;  %v9150_v18 = vld [vmem:[%s10013_s6 + $0x58] sm:$0xff]   ;;  %v137_v19 = vsel %vm136_vm0, %v127_v5, %v134_v17  ;;  %v139_v25 = vld [vmem:[%s7489_s18] sm:$0xf]  ;;  %s7495_s16 = sld [smem:[%s11310_s0 + %s9983_s13]]   ;;  %s9985_s21 = smov 13  }
   0xc   :  { %264 = vmatpush1.bf16.msra.mxu0 %v9140_v2  ;;  %v153_v10 = vpack.c.bf16 %v138_v9, %v138_v9  ;;  %v152_v20 = vpack.c.bf16 %v137_v19, %v137_v19  ;;  %v9153_v21 = vld [vmem:[%s10050_s14 + $0x4] ss:$48 sps:$4 sm:$0xff]   ;;  %v9155_v22 = vld [vmem:[%s10050_s14 + $0x10] ss:$48 sps:$4 sm:$0xff]   ;;  %v141_v26 = vrot.slane %v139_v25, 4  ;;  %v144_v9 = vlaneseq  ;;  %s7498_s20 = sld [smem:[%s11310_s0 + %s9984_s17]]   ;;  %s9986_s25 = smov 17  }
   0xd   :  { %265 = vmatprep.subr.bf16.mxu0 %v9969_v0  ;;  %1032 = vmatprep.subr.bf16.mxu1 %v9153_v21  ;;  %v9157_v23 = vld [vmem:[%s10050_s14 + $0x14] ss:$48 sps:$4 sm:$0xff]   ;;  %v9158_v24 = vld [vmem:[%s10050_s14] ss:$48 sps:$4 sm:$0xff]   ;;  %v9203_v1 = vld [vmem:[%s10050_s14 + $0xc] ss:$48 sps:$4 sm:$0xff]   ;;  %s7497_s24 = sld [smem:[%s11310_s0 + %s9985_s21]]  }
   0xe   :  { %7529 = vmatprep.mubr.msk.bf16.mxu0 %vm257_vm1, %v153_v10  ;;  %1033 = vmatpush1.bf16.msra.mxu1 %v9158_v24  ;;  %v7516_v27 = vld [vmem:[%s7488_s22] ss:$0 sm:$0xff]  ;;  %v143_v28 = vsel %vm136_vm0, %v139_v25, %v141_v26  ;;  %v9159_v36 = vld [vmem:[%s10050_s14 + $0x64] ss:$48 sps:$4 sm:$0xff]   ;;  %v9209_v25 = vld [vmem:[%s10050_s14 + $0x6c] ss:$48 sps:$4 sm:$0xff]   ;;  %s10447_s29 = sld [smem:[%s11310_s0 + %s9986_s25]]  }
   0xf   :  { %v9163_v37 = vld [vmem:[%s10050_s14 + $0x74] ss:$48 sps:$4 sm:$0xff]   ;;  %v9161_v38 = vld [vmem:[%s10050_s14 + $0x70] ss:$48 sps:$4 sm:$0xff]   ;;  %1034 = vmatprep.subr.bf16.mxu1 %v9159_v36  ;;  %v9219_v36 = vld [vmem:[%s10050_s14 + $0x128] ss:$48 sps:$4 sm:$0xff]   ;;  %s1_s6 = sld [smem:[%s11310_s0]]  }
  0x10   :  { %266 = vmatpush1.bf16.msra.mxu0 %v9141_v3  ;;  %v9164_v39 = vld [vmem:[%s10050_s14 + $0x60] ss:$48 sps:$4 sm:$0xff]   ;;  %v9165_v40 = vld [vmem:[%s10050_s14 + $0xc4] ss:$48 sps:$4 sm:$0xff]   ;;  %s9988_s7 = smov 21   ;;  %s9989_s11 = smov 16  }
  0x11   :  { %267 = vmatprep.subr.bf16.mxu0 %v9969_v0  ;;  %v9169_v41 = vld [vmem:[%s10050_s14 + $0xd4] ss:$48 sps:$4 sm:$0xff]   ;;  %v9167_v42 = vld [vmem:[%s10050_s14 + $0xd0] ss:$48 sps:$4 sm:$0xff]   ;;  %s10475_s10 = sld [smem:[%s11310_s0 + %s9988_s7]]   ;;  %s9991_s15 = smov 19  }
  0x12   :  { %1035 = vmatpush1.bf16.msra.mxu1 %v9164_v39  ;;  %v9170_v43 = vld [vmem:[%s10050_s14 + $0xc0] ss:$48 sps:$4 sm:$0xff]   ;;  %v9171_v44 = vld [vmem:[%s10050_s14 + $0x124] ss:$48 sps:$4 sm:$0xff]   ;;  %s7503_s18 = sld [smem:[%s11310_s0 + %s9991_s15]]   ;;  %s9992_s19 = smov 18  }
  0x13   :  { %1036 = vmatprep.subr.bf16.mxu1 %v9165_v40  ;;  %v9175_v45 = vld [vmem:[%s10050_s14 + $0x134] ss:$48 sps:$4 sm:$0xff]   ;;  %v9173_v46 = vld [vmem:[%s10050_s14 + $0x130] ss:$48 sps:$4 sm:$0xff]   ;;  %v9225_v40 = vld [vmem:[%s10050_s14 + $0x188] ss:$48 sps:$4 sm:$0xff]   ;;  %s7502_s22 = sld [smem:[%s11310_s0 + %s9992_s19]]  }
  0x14   :  { %268 = vmatpush1.bf16.msra.mxu0 %v9142_v4  ;;  %v9176_v47 = vld [vmem:[%s10050_s14 + $0x120] ss:$48 sps:$4 sm:$0xff]   ;;  %v9177_v48 = vld [vmem:[%s10050_s14 + $0x184] ss:$48 sps:$4 sm:$0xff]   ;;  %s9993_s23 = smov 23   ;;  %s9994_s28 = smov 20  }
  0x15   :  { %269 = vmatprep.subr.bf16.mxu0 %v9969_v0  ;;  %v9181_v49 = vld [vmem:[%s10050_s14 + $0x194] ss:$48 sps:$4 sm:$0xff]   ;;  %v9179_v50 = vld [vmem:[%s10050_s14 + $0x190] ss:$48 sps:$4 sm:$0xff]   ;;  %s7504_s1 = sld [smem:[%s11310_s0 + %s9994_s28]]   ;;  %s9995_s2 = smov 1  }
  0x16   :  { %1037 = vmatpush1.bf16.msra.mxu1 %v9170_v43  ;;  %v9182_v51 = vld [vmem:[%s10050_s14 + $0x180] ss:$48 sps:$4 sm:$0xff]   ;;  %v9183_v52 = vld [vmem:[%s10050_s14 + $0x1e4] ss:$48 sps:$4 sm:$0xff]   ;;  %s10573_s5 = sld [smem:[%s11310_s0 + %s9995_s2]]   ;;  %s9999_s17 = smov 25  }
  0x17   :  { %1038 = vmatprep.subr.bf16.mxu1 %v9171_v44  ;;  %v9187_v53 = vld [vmem:[%s10050_s14 + $0x1f4] ss:$48 sps:$4 sm:$0xff]   ;;  %v9185_v54 = vld [vmem:[%s10050_s14 + $0x1f0] ss:$48 sps:$4 sm:$0xff]   ;;  %v9231_v44 = vld [vmem:[%s10050_s14 + $0x1e8] ss:$48 sps:$4 sm:$0xff]  }
  0x18   :  { %270 = vmatpush1.bf16.msra.mxu0 %v9143_v8  ;;  %v9188_v55 = vld [vmem:[%s10050_s14 + $0x1e0] ss:$48 sps:$4 sm:$0xff]   ;;  %v9189_v56 = vld [vmem:[%s10050_s14 + $0x244] ss:$48 sps:$4 sm:$0xff]   ;;  %s10000_s21 = smov 27   ;;  %s10001_s25 = smov 29  }
  0x19   :  { %271 = vmatprep.subr.bf16.mxu0 %v9969_v0  ;;  %v9193_v57 = vld [vmem:[%s10050_s14 + $0x254] ss:$48 sps:$4 sm:$0xff]   ;;  %v9191_v58 = vld [vmem:[%s10050_s14 + $0x250] ss:$48 sps:$4 sm:$0xff]  }
  0x1a   :  { %1039 = vmatpush1.bf16.msra.mxu1 %v9176_v47  ;;  %v9194_v59 = vld [vmem:[%s10050_s14 + $0x240] ss:$48 sps:$4 sm:$0xff]   ;;  %v9195_v60 = vld [vmem:[%s10050_s14 + $0x2a4] ss:$48 sps:$4 sm:$0xff]  }
  0x1b   :  { %1040 = vmatprep.subr.bf16.mxu1 %v9177_v48  ;;  %v9199_v61 = vld [vmem:[%s10050_s14 + $0x2b4] ss:$48 sps:$4 sm:$0xff]   ;;  %v9197_v62 = vld [vmem:[%s10050_s14 + $0x2b0] ss:$48 sps:$4 sm:$0xff]   ;;  %v9237_v48 = vld [vmem:[%s10050_s14 + $0x248] ss:$48 sps:$4 sm:$0xff]  }
  0x1c   :  { %272 = vmatpush1.bf16.msra.mxu0 %v9144_v11  ;;  %v9200_v63 = vld [vmem:[%s10050_s14 + $0x2a0] ss:$48 sps:$4 sm:$0xff]   ;;  %v9206_v2 = vld [vmem:[%s10050_s14 + $0x24] ss:$48 sps:$4 sm:$0xff]   ;;  %v10102_v11 = vshrl.u32 %v144_v9, 7 }
  0x1d   :  { %273 = vmatprep.subr.bf16.mxu0 %v9969_v0  ;;  %v9212_v26 = vld [vmem:[%s10050_s14 + $0x84] ss:$48 sps:$4 sm:$0xff]  }
  0x1e   :  { %1041 = vmatpush1.bf16.msra.mxu1 %v9182_v51  ;;  %v9230_v39 = vld [vmem:[%s10050_s14 + $0x1a4] ss:$48 sps:$4 sm:$0xff]   ;;  %vm2694_vm9 = vcmp.gt.s32.totalorder %v10102_v11, 0 }
  0x1f   :  { %1042 = vmatprep.subr.bf16.mxu1 %v9183_v52  ;;  %v9236_v43 = vld [vmem:[%s10050_s14 + $0x204] ss:$48 sps:$4 sm:$0xff]   ;;  %v9243_v52 = vld [vmem:[%s10050_s14 + $0x2a8] ss:$48 sps:$4 sm:$0xff]  }
  0x20   :  { %274 = vmatpush1.bf16.msra.mxu0 %v9145_v12  ;;  %v10105_v12 = vsub.s32 0, %v10102_v11  ;;  %v9242_v47 = vld [vmem:[%s10050_s14 + $0x264] ss:$48 sps:$4 sm:$0xff]  }
  0x21   :  { %275 = vmatprep.subr.bf16.mxu0 %v9969_v0  ;;  %v9248_v51 = vld [vmem:[%s10050_s14 + $0x2c4] ss:$48 sps:$4 sm:$0xff]  }
  0x22   :  { %1043 = vmatpush1.bf16.msra.mxu1 %v9188_v55  ;;  %v9249_v55 = vld [vmem:[%s10050_s14 + $0x18] ss:$48 sps:$4 sm:$0xff]  }
  0x23   :  { %1044 = vmatprep.subr.bf16.mxu1 %v9189_v56  ;;  %v9254_v56 = vld [vmem:[%s10050_s14 + $0x7c] ss:$48 sps:$4 sm:$0xff]  }
  0x24   :  { %276 = vmatpush1.bf16.msra.mxu0 %v9146_v13  ;;  %v302_v13 = vld [vmem:[%s7490_s26] sm:$0x3]  ;;  %s10525_s26 = sld [smem:[%s11310_s0 + %s9993_s23]]  }
  0x25   :  { %277 = vmatprep.subr.bf16.mxu0 %v9969_v0 }
  0x26   :  { %1045 = vmatpush1.bf16.msra.mxu1 %v9194_v59  ;;  %v9255_v59 = vld [vmem:[%s10050_s14 + $0xd8] ss:$48 sps:$4 sm:$0xff]  }
  0x27   :  { %1046 = vmatprep.subr.bf16.mxu1 %v9195_v60  ;;  %v9260_v60 = vld [vmem:[%s10050_s14 + $0x13c] ss:$48 sps:$4 sm:$0xff]  }
  0x28   :  { %278 = vmatpush1.bf16.msra.mxu0 %v9147_v14  ;;  %v10108_v14 = vsub.s32 1, %v10102_v11 }
  0x29   :  { %279 = vmatprep.subr.bf16.mxu0 %v9969_v0 }
  0x2a   :  { %1047 = vmatpush1.bf16.msra.mxu1 %v9200_v63  ;;  %v324_v19 = vrot.slane %v302_v13, %v10108_v14  ;;  %v9261_v63 = vld [vmem:[%s10050_s14 + $0x198] ss:$48 sps:$4 sm:$0xff]  }
  0x2b   :  { %1073 = vmatprep.subr.bf16.mxu1 %v9203_v1  ;;  %v9266_v1 = vld [vmem:[%s10050_s14 + $0x1fc] ss:$48 sps:$4 sm:$0xff]  }
  0x2c   :  { %280 = vmatpush1.bf16.msra.mxu0 %v9148_v15 }
  0x2d   :  { %281 = vmatprep.subr.bf16.mxu0 %v9969_v0 }
  0x30   :  { %282 = vmatpush1.bf16.msra.mxu0 %v9149_v16  ;;  %v319_v16 = vrot.slane %v302_v13, %v10105_v12  ;;  %v9276_v13 = vld [vmem:[%s10050_s14 + $0x88] ss:$48 sps:$4 sm:$0xff]  }
  0x31   :  { %283 = vmatprep.subr.bf16.mxu0 %v9969_v0 }
  0x34   :  { %284 = vmatpush1.bf16.msra.mxu0 %v9150_v18 }
  0x35   :  { %1114 = vmatprep.subr.bf16.mxu0 %v9157_v23  ;;  %v9204_v23 = vld [vmem:[%s10050_s14 + $0x20] ss:$48 sps:$4 sm:$0xff]  }
  0x37   :  { %294 = vmatmul.mubr.bf16.vlgmr.msra.gmra.mrb[0].mxu0 %v152_v20 }
  0x38   :  { %1146 = vmatprep.mubr.bf16.mxu0 %v9969_v0  ;;  %1115 = vmatpush1.bf16.msra.mxu0 %v9155_v22  ;;  %v9201_v22 = vld [vmem:[%s10050_s14 + $0x8] ss:$48 sps:$4 sm:$0xff]  }
  0x39   :  { %1116 = vmatprep.subr.bf16.mxu0 %v9163_v37  ;;  %v9222_v37 = vld [vmem:[%s10050_s14 + $0x140] ss:$48 sps:$4 sm:$0xff]  }
  0x3c   :  { %1117 = vmatpush1.bf16.msra.mxu0 %v9161_v38  ;;  %v9227_v38 = vld [vmem:[%s10050_s14 + $0x18c] ss:$48 sps:$4 sm:$0xff]  }
  0x3d   :  { %1118 = vmatprep.subr.bf16.mxu0 %v9169_v41  ;;  %v9228_v41 = vld [vmem:[%s10050_s14 + $0x1a0] ss:$48 sps:$4 sm:$0xff]  }
  0x40   :  { %1119 = vmatpush1.bf16.msra.mxu0 %v9167_v42  ;;  %v9233_v42 = vld [vmem:[%s10050_s14 + $0x1ec] ss:$48 sps:$4 sm:$0xff]  }
  0x41   :  { %1120 = vmatprep.subr.bf16.mxu0 %v9175_v45  ;;  %v9234_v45 = vld [vmem:[%s10050_s14 + $0x200] ss:$48 sps:$4 sm:$0xff]  }
  0x44   :  { %1121 = vmatpush1.bf16.msra.mxu0 %v9173_v46  ;;  %v9239_v46 = vld [vmem:[%s10050_s14 + $0x24c] ss:$48 sps:$4 sm:$0xff]  }
  0x45   :  { %1122 = vmatprep.subr.bf16.mxu0 %v9181_v49  ;;  %v9240_v49 = vld [vmem:[%s10050_s14 + $0x260] ss:$48 sps:$4 sm:$0xff]  }
  0x48   :  { %1123 = vmatpush1.bf16.msra.mxu0 %v9179_v50  ;;  %v9245_v50 = vld [vmem:[%s10050_s14 + $0x2ac] ss:$48 sps:$4 sm:$0xff]  }
  0x49   :  { %1124 = vmatprep.subr.bf16.mxu0 %v9187_v53  ;;  %v9246_v53 = vld [vmem:[%s10050_s14 + $0x2c0] ss:$48 sps:$4 sm:$0xff]  }
  0x4c   :  { %1125 = vmatpush1.bf16.msra.mxu0 %v9185_v54  ;;  %v9251_v54 = vld [vmem:[%s10050_s14 + $0x1c] ss:$48 sps:$4 sm:$0xff]  }
  0x4d   :  { %1126 = vmatprep.subr.bf16.mxu0 %v9193_v57  ;;  %v9252_v57 = vld [vmem:[%s10050_s14 + $0x78] ss:$48 sps:$4 sm:$0xff]  }
  0x50   :  { %1127 = vmatpush1.bf16.msra.mxu0 %v9191_v58  ;;  %v9257_v58 = vld [vmem:[%s10050_s14 + $0xdc] ss:$48 sps:$4 sm:$0xff]  }
  0x51   :  { %1128 = vmatprep.subr.bf16.mxu0 %v9199_v61  ;;  %v9258_v61 = vld [vmem:[%s10050_s14 + $0x138] ss:$48 sps:$4 sm:$0xff]  }
  0x54   :  { %1129 = vmatpush1.bf16.msra.mxu0 %v9197_v62  ;;  %v9263_v62 = vld [vmem:[%s10050_s14 + $0x19c] ss:$48 sps:$4 sm:$0xff]  }
  0x55   :  { %1196 = vmatprep.subr.bf16.mxu0 %v9206_v2  ;;  %v9264_v2 = vld [vmem:[%s10050_s14 + $0x1f8] ss:$48 sps:$4 sm:$0xff]  }
 0x10a   :  { %v295_v29 = vpop.f32.mrb[0].mxu0 }
 0x10b   :  { %v296_v30 = vadd.f32 %v7516_v27, %v295_v29  ;;  %v297_v31 = vpop.f32.mrb[1].mxu0  ;;  %v9207_v27 = vld [vmem:[%s10050_s14 + $0x68] ss:$48 sps:$4 sm:$0xff]   ;;  %v9215_v29 = vld [vmem:[%s10050_s14 + $0xcc] ss:$48 sps:$4 sm:$0xff]  }
 0x10c   :  { %v298_v32 = vpop.f32.mrb[2].mxu0  ;;  %v9213_v31 = vld [vmem:[%s10050_s14 + $0xc8] ss:$48 sps:$4 sm:$0xff]  }
 0x10d   :  { %v10063_v33 = vadd.f32 %v296_v30, %v143_v28  ;;  %v299_v34 = vpop.f32.mrb[3].mxu0  ;;  %v9210_v28 = vld [vmem:[%s10050_s14 + $0x80] ss:$48 sps:$4 sm:$0xff]   ;;  %v9218_v30 = vld [vmem:[%s10050_s14 + $0xe4] ss:$48 sps:$4 sm:$0xff]  }
 0x10e   :  { %v9216_v32 = vld [vmem:[%s10050_s14 + $0xe0] ss:$48 sps:$4 sm:$0xff]   ;;  %v9221_v34 = vld [vmem:[%s10050_s14 + $0x12c] ss:$48 sps:$4 sm:$0xff]  }
 0x10f   :  { %303 = vadd.xlane.f32.xlu0 %v10063_v33  ;;  %v305_v35 = vmul.f32 %v10063_v33, %v10063_v33 }
 0x113   :  { %306 = vadd.xlane.f32.xlu0 %v305_v35  ;;  %v9224_v35 = vld [vmem:[%s10050_s14 + $0x144] ss:$48 sps:$4 sm:$0xff]  }
 0x19c   :  { %v304_v3 = vpop.xlane.xlu0 %303 }
 0x19d   :  { %v308_v4 = vmul.f32 0.03125, %v304_v3  ;;  %v9269_v3 = vld [vmem:[%s10050_s14 + $0x25c] ss:$48 sps:$4 sm:$0xff]  }
 0x19f   :  { %v310_v6 = vmul.f32 %v308_v4, %v308_v4  ;;  %v312_v15 = vsub.f32 %v10063_v33, %v308_v4  ;;  %v9267_v4 = vld [vmem:[%s10050_s14 + $0x258] ss:$48 sps:$4 sm:$0xff]  }
 0x1a0   :  { %v307_v5 = vpop.xlane.xlu0 %306 }
 0x1a1   :  { %v309_v7 = vmul.f32 0.03125, %v307_v5  ;;  %v9272_v5 = vld [vmem:[%s10050_s14 + $0x2bc] ss:$48 sps:$4 sm:$0xff]  }
 0x1a3   :  { %v311_v8 = vsub.f32 %v309_v7, %v310_v6  ;;  %v9270_v6 = vld [vmem:[%s10050_s14 + $0x2b8] ss:$48 sps:$4 sm:$0xff]   ;;  %v9275_v7 = vld [vmem:[%s10050_s14 + $0x2c] ss:$48 sps:$4 sm:$0xff]  }
 0x1a5   :  { %v313_v10 = vadd.f32 1e-05, %v311_v8  ;;  %v9273_v8 = vld [vmem:[%s10050_s14 + $0x28] ss:$48 sps:$4 sm:$0xff]  }
 0x1a7   :  { %9793 = vrsqrt.f32 %v313_v10  ;;  %v9278_v10 = vld [vmem:[%s10050_s14 + $0x8c] ss:$48 sps:$4 sm:$0xff]  }
 0x1b1   :  { %v9794_v17 = vpop.eup %9793 }
 0x1b2   :  { %v315_v18 = vmul.f32 %v9794_v17, %v312_v15  ;;  %v9281_v15 = vld [vmem:[%s10050_s14 + $0xec] ss:$48 sps:$4 sm:$0xff]  }
 0x1b3   :  { %v9284_v17 = vld [vmem:[%s10050_s14 + $0x14c] ss:$48 sps:$4 sm:$0xff]  }
 0x1b4   :  { %v320_v20 = vmul.f32 %v319_v16, %v315_v18  ;;  %v9279_v16 = vld [vmem:[%s10050_s14 + $0xe8] ss:$48 sps:$4 sm:$0xff]  }
 0x1b5   :  { %v9282_v18 = vld [vmem:[%s10050_s14 + $0x148] ss:$48 sps:$4 sm:$0xff]  }
 0x1b6   :  { %v325_v21 = vadd.f32 %v324_v19, %v320_v20  ;;  %v9287_v19 = vld [vmem:[%s10050_s14 + $0x1ac] ss:$48 sps:$4 sm:$0xff]   ;;  %v9285_v20 = vld [vmem:[%s10050_s14 + $0x1a8] ss:$48 sps:$4 sm:$0xff]  }
 0x1b8   :  { %v10115_v24 = vpack.c.bf16 %v325_v21, %v325_v21  ;;  %v9290_v21 = vld [vmem:[%s10050_s14 + $0x20c] ss:$48 sps:$4 sm:$0xff]  }
 0x1ba   :  { %1065 = vmatmul.mubr.bf16.vlgmr.msra.gmra.mrb[0].mxu1 %v10115_v24  ;;  %1147 = vmatmul.mubr.bf16.vlgmr.msra.gmra.mrb[4].mxu0 %v10115_v24 }
 0x1bb   :  { %1074 = vmatpush1.bf16.msra.mxu1 %v9201_v22  ;;  %1197 = vmatpush1.bf16.msra.mxu0 %v9204_v23  ;;  %v9288_v22 = vld [vmem:[%s10050_s14 + $0x208] ss:$48 sps:$4 sm:$0xff]   ;;  %v9293_v23 = vld [vmem:[%s10050_s14 + $0x26c] ss:$48 sps:$4 sm:$0xff]  }
 0x1bc   :  { %1075 = vmatprep.subr.bf16.mxu1 %v9209_v25  ;;  %1198 = vmatprep.subr.bf16.mxu0 %v9212_v26  ;;  %v9291_v25 = vld [vmem:[%s10050_s14 + $0x268] ss:$48 sps:$4 sm:$0xff]   ;;  %v9296_v26 = vld [vmem:[%s10050_s14 + $0x2cc] ss:$48 sps:$4 sm:$0xff]  }
 0x1bd   :  { %1105 = vmatprep.mubr.bf16.mxu1 %v9969_v0  ;;  %1228 = vmatprep.mubr.bf16.mxu0 %v9969_v0 }
 0x1bf   :  { %1076 = vmatpush1.bf16.msra.mxu1 %v9207_v27  ;;  %1199 = vmatpush1.bf16.msra.mxu0 %v9210_v28  ;;  %v9294_v27 = vld [vmem:[%s10050_s14 + $0x2c8] ss:$48 sps:$4 sm:$0xff]   ;;  %v9976_v28 = vmov 0.0   ;;  %s7500_s14 = sld [smem:[%s11310_s0 + %s9989_s11]]  }
 0x1c0   :  { %1077 = vmatprep.subr.bf16.mxu1 %v9215_v29  ;;  %1200 = vmatprep.subr.bf16.mxu0 %v9218_v30  ;;  %v514_v29 = vsub.s32 5, %v10102_v11  ;;  %v10201_v30 = vld [vmem:[%s10197_s30] sm:$0xff] }
 0x1c3   :  { %1078 = vmatpush1.bf16.msra.mxu1 %v9213_v31  ;;  %1201 = vmatpush1.bf16.msra.mxu0 %v9216_v32  ;;  %v499_v31 = vrot.slane %v10201_v30, %v10108_v14 }
 0x1c4   :  { %1079 = vmatprep.subr.bf16.mxu1 %v9221_v34  ;;  %1202 = vmatprep.subr.bf16.mxu0 %v9224_v35 }
 0x1c7   :  { %1080 = vmatpush1.bf16.msra.mxu1 %v9219_v36  ;;  %1203 = vmatpush1.bf16.msra.mxu0 %v9222_v37 }
 0x1c8   :  { %1081 = vmatprep.subr.bf16.mxu1 %v9227_v38  ;;  %1204 = vmatprep.subr.bf16.mxu0 %v9230_v39 }
 0x1cb   :  { %1082 = vmatpush1.bf16.msra.mxu1 %v9225_v40  ;;  %1205 = vmatpush1.bf16.msra.mxu0 %v9228_v41  ;;  %v495_v41 = vrot.slane %v10201_v30, %v10105_v12 }
 0x1cc   :  { %1083 = vmatprep.subr.bf16.mxu1 %v9233_v42  ;;  %1206 = vmatprep.subr.bf16.mxu0 %v9236_v43 }
 0x1cf   :  { %1084 = vmatpush1.bf16.msra.mxu1 %v9231_v44  ;;  %1207 = vmatpush1.bf16.msra.mxu0 %v9234_v45 }
 0x1d0   :  { %1085 = vmatprep.subr.bf16.mxu1 %v9239_v46  ;;  %1208 = vmatprep.subr.bf16.mxu0 %v9242_v47 }
 0x1d3   :  { %1086 = vmatpush1.bf16.msra.mxu1 %v9237_v48  ;;  %1209 = vmatpush1.bf16.msra.mxu0 %v9240_v49  ;;  %v502_v49 = vsub.s32 2, %v10102_v11 }
 0x1d4   :  { %1087 = vmatprep.subr.bf16.mxu1 %v9245_v50  ;;  %1210 = vmatprep.subr.bf16.mxu0 %v9248_v51 }
 0x1d5   :  { %v503_v50 = vrot.slane %v10201_v30, %v502_v49 }
 0x1d7   :  { %1088 = vmatpush1.bf16.msra.mxu1 %v9243_v52  ;;  %1211 = vmatpush1.bf16.msra.mxu0 %v9246_v53 }
 0x1d8   :  { %1155 = vmatprep.subr.bf16.mxu1 %v9251_v54  ;;  %8518 = vmatprep.subr.bf16.mxu0 %v9976_v28 }
 0x1da   :  { %1106 = vmatmul.mubr.bf16.vlgmr.msra.gmra.mrb[4].mxu1 %v10115_v24  ;;  %1229 = vmatmul.mubr.bf16.vlgmr.msra.gmra.mrb[8].mxu0 %v10115_v24 }
 0x1db   :  { %1156 = vmatpush1.bf16.msra.mxu1 %v9249_v55  ;;  %1187 = vmatprep.mubr.bf16.mxu1 %v9969_v0 }
 0x1dc   :  { %1157 = vmatprep.subr.bf16.mxu1 %v9254_v56  ;;  %8520 = vmatprep.mubr.msk.bf16.mxu0 %vm9977_vm2, %v9976_v28 }
 0x1df   :  { %1158 = vmatpush1.bf16.msra.mxu1 %v9252_v57 }
 0x1e0   :  { %1159 = vmatprep.subr.bf16.mxu1 %v9257_v58 }
 0x1e3   :  { %1160 = vmatpush1.bf16.msra.mxu1 %v9255_v59 }
 0x1e4   :  { %1161 = vmatprep.subr.bf16.mxu1 %v9260_v60 }
 0x1e7   :  { %1162 = vmatpush1.bf16.msra.mxu1 %v9258_v61 }
 0x1e8   :  { %1163 = vmatprep.subr.bf16.mxu1 %v9263_v62 }
 0x1eb   :  { %1164 = vmatpush1.bf16.msra.mxu1 %v9261_v63 }
 0x1ec   :  { %1165 = vmatprep.subr.bf16.mxu1 %v9266_v1 }
 0x1ef   :  { %1166 = vmatpush1.bf16.msra.mxu1 %v9264_v2 }
 0x1f0   :  { %1167 = vmatprep.subr.bf16.mxu1 %v9269_v3  ;;  %v10228_v3 = vld [vmem:[%s10197_s30 + $0x8] sm:$0xf]  ;;  %s9987_s30 = smov 15  }
 0x1f1   :  { %s7499_s3 = sld [smem:[%s11310_s0 + %s9987_s30]]   ;;  %s10002_s30 = smov 28  }
 0x1f3   :  { %1168 = vmatpush1.bf16.msra.mxu1 %v9267_v4  ;;  %v506_v4 = vsub.s32 3, %v10102_v11 }
 0x1f4   :  { %1169 = vmatprep.subr.bf16.mxu1 %v9272_v5  ;;  %v535_v5 = vrot.slane %v10228_v3, %v502_v49 }
 0x1f7   :  { %1170 = vmatpush1.bf16.msra.mxu1 %v9270_v6  ;;  %v539_v6 = vrot.slane %v10228_v3, %v506_v4 }
 0x1f8   :  { %1237 = vmatprep.subr.bf16.mxu1 %v9275_v7 }
 0x1fa   :  { %1188 = vmatmul.mubr.bf16.vlgmr.msra.gmra.mrb[8].mxu1 %v10115_v24 }
 0x1fb   :  { %1238 = vmatpush1.bf16.msra.mxu1 %v9273_v8  ;;  %1269 = vmatprep.mubr.bf16.mxu1 %v9969_v0 }
 0x1fc   :  { %1239 = vmatprep.subr.bf16.mxu1 %v9278_v10 }
 0x1ff   :  { %1240 = vmatpush1.bf16.msra.mxu1 %v9276_v13 }
 0x200   :  { %1241 = vmatprep.subr.bf16.mxu1 %v9281_v15 }
 0x203   :  { %1242 = vmatpush1.bf16.msra.mxu1 %v9279_v16 }
 0x204   :  { %1243 = vmatprep.subr.bf16.mxu1 %v9284_v17  ;;  %v10238_v17 = vand.u32 127, %v144_v9 }
 0x206   :  { %vm2718_vm10 = vcmp.lt.s32.totalorder %v10238_v17, 8 }
 0x207   :  { %1244 = vmatpush1.bf16.msra.mxu1 %v9282_v18  ;;  %v146_v18 = vshra.s32 %v10102_v11, 2 }
 0x208   :  { %1245 = vmatprep.subr.bf16.mxu1 %v9287_v19  ;;  %v149_v19 = vshra.s32 %v10238_v17, 2 }
 0x20a   :  { %vm150_vm3 = vcmp.eq.s32.totalorder %v146_v18, %v149_v19 }
 0x20b   :  { %1246 = vmatpush1.bf16.msra.mxu1 %v9285_v20  ;;  %v9979_v20 = vmov -1e+09  }
 0x20c   :  { %1247 = vmatprep.subr.bf16.mxu1 %v9290_v21  ;;  %v10247_v21 = vsel %vm150_vm3, 0.0, %v9979_v20 }
 0x20f   :  { %1248 = vmatpush1.bf16.msra.mxu1 %v9288_v22 }
 0x210   :  { %1249 = vmatprep.subr.bf16.mxu1 %v9293_v23 }
 0x213   :  { %1250 = vmatpush1.bf16.msra.mxu1 %v9291_v25 }
 0x214   :  { %1251 = vmatprep.subr.bf16.mxu1 %v9296_v26 }
 0x217   :  { %1252 = vmatpush1.bf16.msra.mxu1 %v9294_v27 }
 0x218   :  { %8536 = vmatprep.subr.bf16.mxu1 %v9976_v28 }
 0x21a   :  { %1270 = vmatmul.mubr.bf16.vlgmr.msra.gmra.mrb[12].mxu1 %v10115_v24  ;;  %v515_v24 = vrot.slane %v10201_v30, %v514_v29 }
 0x21b   :  { %8538 = vmatprep.mubr.msk.bf16.mxu1 %vm9977_vm2, %v9976_v28 }
 0x28d   :  { %v1066_v32 = vpop.f32.mrb[0].mxu1  ;;  %v10206_v34 = vpop.f32.mrb[4].mxu0 }
 0x28e   :  { %v1068_v35 = vpop.f32.mrb[1].mxu1  ;;  %v1150_v36 = vpop.f32.mrb[5].mxu0  ;;  %v1067_v47 = vadd.f32 %v1066_v32, %v495_v41 }
 0x28f   :  { %v1069_v37 = vadd.f32 %v1068_v35, %v499_v31  ;;  %v1151_v38 = vadd.f32 %v1150_v36, %v515_v24  ;;  %v1070_v39 = vpop.f32.mrb[2].mxu1  ;;  %v1152_v40 = vpop.f32.mrb[6].mxu0 }
 0x290   :  { %v1071_v42 = vpop.f32.mrb[3].mxu1  ;;  %v1153_v43 = vpop.f32.mrb[7].mxu0  ;;  %v1278_v48 = vpack.c.bf16 %v1067_v47, %v1067_v47 }
 0x291   :  { %v1279_v44 = vpack.c.bf16 %v1069_v37, %v1069_v37  ;;  %v1435_v45 = vpack.c.bf16 %v1151_v38, %v1151_v38  ;;  %v510_v37 = vsub.s32 4, %v10102_v11  ;;  %v507_v42 = vrot.slane %v10201_v30, %v506_v4  ;;  %v9306_v4 = vld [vmem:[%s10270_s4 + $0x48] sm:$0xff]  }
 0x293   :  { %v1440_v46 = vsel %vm136_vm0, %v1435_v45, 0  ;;  %8519 = vmatpush3.bf16.xpose.msra.mxu0 %v1279_v44  ;;  %v511_v38 = vrot.slane %v10201_v30, %v510_v37 }
 0x294   :  { %8537 = vmatpush3.bf16.msra.mxu1 %v1440_v46  ;;  %8524 = vmatprep.subr.bf16.mxu0 %v9976_v28 }
 0x295   :  { %8562 = vmatprep.subr.bf16.mxu1 %v9976_v28  ;;  %v1149_v40 = vadd.f32 %v10206_v34, %v511_v38  ;;  %v9304_v38 = vld [vmem:[%s10270_s4 + $0x38] sm:$0xff]  }
 0x297   :  { %v1382_v44 = vpack.c.bf16 %v1149_v40, %v1149_v40 }
 0x29a   :  { %8521 = vmatmul.mubr.bf16.vlgmr.msra.gmra.mrb[12].mxu0 %v1278_v48 }
 0x29b   :  { %8526 = vmatprep.mubr.msk.bf16.mxu0 %vm9977_vm2, %v9976_v28 }
 0x2ad   :  { %v1107_v51 = vpop.f32.mrb[4].mxu1  ;;  %v10217_v52 = vpop.f32.mrb[8].mxu0 }
 0x2ae   :  { %v1108_v53 = vadd.f32 %v1107_v51, %v503_v50  ;;  %v1109_v54 = vpop.f32.mrb[5].mxu1  ;;  %v10219_v55 = vpop.f32.mrb[9].mxu0 }
 0x2af   :  { %v1111_v56 = vpop.f32.mrb[6].mxu1  ;;  %v1234_v57 = vpop.f32.mrb[10].mxu0  ;;  %v1110_v45 = vadd.f32 %v1109_v54, %v507_v42 }
 0x2b0   :  { %v1333_v58 = vpack.c.bf16 %v1108_v53, %v1108_v53  ;;  %v1112_v59 = vpop.f32.mrb[7].mxu1  ;;  %v1235_v60 = vpop.f32.mrb[11].mxu0 }
 0x2b1   :  { %v1381_v46 = vpack.c.bf16 %v1110_v45, %v1110_v45 }
 0x2b2   :  { %v1338_v61 = vsel %vm136_vm0, %v1333_v58, 0 }
 0x2b3   :  { %8525 = vmatpush3.bf16.msra.mxu0 %v1338_v61 }
 0x2b4   :  { %8530 = vmatprep.subr.bf16.mxu0 %v9976_v28 }
 0x2cd   :  { %v10223_v62 = vpop.f32.mrb[8].mxu1 }
 0x2ce   :  { %v10225_v63 = vpop.f32.mrb[9].mxu1 }
 0x2cf   :  { %v1193_v1 = vpop.f32.mrb[10].mxu1 }
 0x2d0   :  { %v1194_v2 = vpop.f32.mrb[11].mxu1 }
 0x2d1   :  { %v9305_v2 = vld [vmem:[%s10270_s4 + $0x40] sm:$0xff]  }
 0x2ed   :  { %v1271_v7 = vpop.f32.mrb[12].mxu1 }
 0x2ee   :  { %v10233_v8 = vadd.f32 %v1271_v7, %v535_v5  ;;  %v1273_v10 = vpop.f32.mrb[13].mxu1  ;;  %v9307_v5 = vld [vmem:[%s10270_s4 + $0x50] sm:$0xff]   ;;  %v9309_v7 = vld [vmem:[%s10270_s4 + $0x60] sm:$0xff]  }
 0x2ef   :  { %v10235_v13 = vadd.f32 %v1273_v10, %v539_v6  ;;  %v1275_v15 = vpop.f32.mrb[14].mxu1  ;;  %v9308_v6 = vld [vmem:[%s10270_s4 + $0x58] sm:$0xff]   ;;  %v9310_v10 = vld [vmem:[%s10270_s4 + $0x68] sm:$0xff]  }
 0x2f0   :  { %v1276_v16 = vpop.f32.mrb[15].mxu1  ;;  %v9311_v15 = vld [vmem:[%s10270_s4 + $0x70] sm:$0xff]  }
 0x2f1   :  { %v9312_v16 = vld [vmem:[%s10270_s4 + $0x78] sm:$0xff]  }
 0x36d   :  { %v1314_v22 = vpop.f32.mrb[12].mxu0 }
 0x36e   :  { %v1315_v23 = vadd.f32 %v1314_v22, %v10247_v21  ;;  %v8522_v25 = vpop.f32.mrb[13].mxu0 }
 0x36f   :  { %v1317_v9 = vpop.f32.mrb[14].mxu0 }
 0x370   :  { %v8523_v26 = vpop.f32.mrb[15].mxu0  ;;  %v1321_v27 = vsel %vm1320_vm4, %v1315_v23, -inf  ;;  %v9297_v9 = vld [vmem:[%s10270_s4] sm:$0xff]  }
 0x371   :  { %1322 = vmax.xlane.f32.xlu1 %v1321_v27  ;;  %v9298_v27 = vld [vmem:[%s10270_s4 + $0x8] sm:$0xff]  }
 0x3fe   :  { %v1323_v29 = vpop.xlane.xlu1 %1322 }
 0x3ff   :  { %v1324_v31 = vsub.f32 %v1315_v23, %v1323_v29  ;;  %v9299_v29 = vld [vmem:[%s10270_s4 + $0x10] sm:$0xff]  }
 0x401   :  { %v1325_v24 = vmul.f32 1.442695, %v1324_v31  ;;  %v9300_v31 = vld [vmem:[%s10270_s4 + $0x18] sm:$0xff]  }
 0x403   :  { %9795 = vpow2.f32 %v1325_v24  ;;  %v9301_v24 = vld [vmem:[%s10270_s4 + $0x20] sm:$0xff]  }
 0x40d   :  { %v9796_v32 = vpop.eup %9795 }
 0x40e   :  { %v1327_v35 = vsel %vm1320_vm4, %v9796_v32, 0.0 }
 0x40f   :  { %1328 = vadd.xlane.f32.xlu1 %v1327_v35  ;;  %v527_v35 = vrot.slane %v10228_v3, %v10105_v12 }
 0x411   :  { %v1231_v37 = vadd.f32 %v10217_v52, %v527_v35  ;;  %v522_v52 = vsub.s32 7, %v10102_v11 }
 0x413   :  { %v523_v42 = vrot.slane %v10201_v30, %v522_v52 }
 0x49c   :  { %v1329_v36 = vpop.xlane.xlu1 %1328 }
 0x49d   :  { %9797 = vrcp.f32 %v1329_v36  ;;  %v9303_v36 = vld [vmem:[%s10270_s4 + $0x30] sm:$0xff]  }
 0x4a7   :  { %v9798_v39 = vpop.eup %9797 }
 0x4a8   :  { %v1331_v41 = vmul.f32 %v9798_v39, %v9796_v32  ;;  %v9302_v32 = vld [vmem:[%s10270_s4 + $0x28] sm:$0xff]   ;;  %v1713_v39 = vpack.c.bf16 %v1231_v37, %v1231_v37 }
 0x4aa   :  { %v1332_v43 = vpack.c.bf16 %v1331_v41, %v1331_v41  ;;  %v1718_v41 = vsel %vm136_vm0, %v1713_v39, 0 }
 0x4ac   :  { %8527 = vmatmul.mubr.msk.bf16.vlgmr.msra.gmra.mrb[16].mxu0 %vm1320_vm4, %v1332_v43  ;;  %v518_v43 = vsub.s32 6, %v10102_v11 }
 0x4ad   :  { %8531 = vmatpush3.bf16.xpose.msra.mxu0 %v1382_v44  ;;  %8532 = vmatprep.mubr.msk.bf16.mxu0 %vm9977_vm2, %v9976_v28  ;;  %v1192_v44 = vadd.f32 %v10225_v63, %v523_v42 }
 0x4ae   :  { %8542 = vmatprep.subr.bf16.mxu0 %v9976_v28 }
 0x4b4   :  { %8533 = vmatmul.mubr.bf16.vlgmr.msra.gmra.mrb[20].mxu0 %v1381_v46  ;;  %v519_v46 = vrot.slane %v10201_v30, %v518_v43 }
 0x4b5   :  { %8558 = vmatprep.mubr.msk.bf16.mxu0 %vm9977_vm2, %v9976_v28  ;;  %8543 = vmatpush3.bf16.msra.mxu0 %v9305_v2 }
 0x4b6   :  { %8544 = vmatprep.subr.bf16.mxu0 %v9976_v28 }
 0x4b9   :  { %8545 = vmatpush3.bf16.msra.mxu0 %v9306_v4 }
 0x4ba   :  { %8546 = vmatprep.subr.bf16.mxu0 %v9976_v28 }
 0x4bd   :  { %8547 = vmatpush3.bf16.msra.mxu0 %v9307_v5 }
 0x4be   :  { %8548 = vmatprep.subr.bf16.mxu0 %v9976_v28 }
 0x4c1   :  { %8549 = vmatpush3.bf16.msra.mxu0 %v9308_v6 }
 0x4c2   :  { %8550 = vmatprep.subr.bf16.mxu0 %v9976_v28 }
 0x4c5   :  { %8551 = vmatpush3.bf16.msra.mxu0 %v9309_v7 }
 0x4c6   :  { %8552 = vmatprep.subr.bf16.mxu0 %v9976_v28 }
 0x4c9   :  { %8553 = vmatpush3.bf16.msra.mxu0 %v9310_v10 }
 0x4ca   :  { %8554 = vmatprep.subr.bf16.mxu0 %v9976_v28 }
 0x4cd   :  { %8555 = vmatpush3.bf16.msra.mxu0 %v9311_v15 }
 0x4ce   :  { %8556 = vmatprep.subr.bf16.mxu0 %v9976_v28 }
 0x4d1   :  { %8557 = vmatpush3.bf16.msra.mxu0 %v9312_v16 }
 0x4d2   :  { %8582 = vmatprep.subr.bf16.mxu0 %v9976_v28 }
 0x57f   :  { %v10262_v34 = vpop.f32.mrb[16].mxu0 }
 0x580   :  { %v8528_v47 = vpop.f32.mrb[17].mxu0  ;;  %v1380_v40 = vpack.c.bf16 %v10262_v34, %v10262_v34 }
 0x581   :  { %v1377_v48 = vpop.f32.mrb[18].mxu0 }
 0x582   :  { %v8529_v49 = vpop.f32.mrb[19].mxu0  ;;  %v1660_v48 = vpack.c.bf16 %v1192_v44, %v1192_v44 }
 0x587   :  { %v1417_v50 = vpop.f32.mrb[20].mxu0 }
 0x588   :  { %v1418_v51 = vadd.f32 %v1417_v50, %v10247_v21  ;;  %v8534_v53 = vpop.f32.mrb[21].mxu0 }
 0x589   :  { %v1420_v56 = vpop.f32.mrb[22].mxu0 }
 0x58a   :  { %v8535_v57 = vpop.f32.mrb[23].mxu0  ;;  %v1423_v54 = vsel %vm1320_vm4, %v1418_v51, -inf }
 0x58b   :  { %1424 = vmax.xlane.f32.xlu0 %v1423_v54 }
 0x618   :  { %v1425_v58 = vpop.xlane.xlu0 %1424 }
 0x619   :  { %v1426_v59 = vsub.f32 %v1418_v51, %v1425_v58  ;;  %v1190_v51 = vadd.f32 %v10223_v62, %v519_v46 }
 0x61b   :  { %v1427_v60 = vmul.f32 1.442695, %v1426_v59  ;;  %v1659_v53 = vpack.c.bf16 %v1190_v51, %v1190_v51 }
 0x61d   :  { %9799 = vpow2.f32 %v1427_v60 }
 0x627   :  { %v9800_v61 = vpop.eup %9799 }
 0x628   :  { %v1429_v1 = vsel %vm1320_vm4, %v9800_v61, 0.0 }
 0x629   :  { %1430 = vadd.xlane.f32.xlu1 %v1429_v1 }
 0x6b6   :  { %v1431_v22 = vpop.xlane.xlu1 %1430 }
 0x6b7   :  { %9801 = vrcp.f32 %v1431_v22 }
 0x6c1   :  { %v9802_v23 = vpop.eup %9801 }
 0x6c2   :  { %v1433_v25 = vmul.f32 %v9802_v23, %v9800_v61  ;;  %v9313_v23 = vld [vmem:[%s10270_s4 + $0x80] sm:$0xff]  }
 0x6c4   :  { %v1434_v26 = vpack.c.bf16 %v1433_v25, %v1433_v25  ;;  %v9314_v25 = vld [vmem:[%s10270_s4 + $0x88] sm:$0xff]  }
 0x6c6   :  { %8539 = vmatmul.mubr.msk.bf16.vlgmr.msra.gmra.mrb[16].mxu1 %vm1320_vm4, %v1434_v26  ;;  %v9316_v26 = vld [vmem:[%s10270_s4 + $0x98] sm:$0xff]  }
 0x6c7   :  { %8563 = vmatpush3.bf16.msra.mxu1 %v9297_v9  ;;  %8578 = vmatprep.mubr.msk.bf16.mxu1 %vm9977_vm2, %v9976_v28  ;;  %v9315_v9 = vld [vmem:[%s10270_s4 + $0x90] sm:$0xff]  }
 0x6c8   :  { %8564 = vmatprep.subr.bf16.mxu1 %v9976_v28 }
 0x6cb   :  { %8565 = vmatpush3.bf16.msra.mxu1 %v9298_v27  ;;  %v9317_v27 = vld [vmem:[%s10270_s4 + $0xa0] sm:$0xff]  }
 0x6cc   :  { %8566 = vmatprep.subr.bf16.mxu1 %v9976_v28 }
 0x6cf   :  { %8567 = vmatpush3.bf16.msra.mxu1 %v9299_v29  ;;  %v9318_v29 = vld [vmem:[%s10270_s4 + $0xa8] sm:$0xff]  }
 0x6d0   :  { %8568 = vmatprep.subr.bf16.mxu1 %v9976_v28 }
 0x6d3   :  { %8569 = vmatpush3.bf16.msra.mxu1 %v9300_v31  ;;  %v9319_v31 = vld [vmem:[%s10270_s4 + $0xb0] sm:$0xff]  }
 0x6d4   :  { %8570 = vmatprep.subr.bf16.mxu1 %v9976_v28 }
 0x6d7   :  { %8571 = vmatpush3.bf16.msra.mxu1 %v9301_v24 }
 0x6d8   :  { %8572 = vmatprep.subr.bf16.mxu1 %v9976_v28 }
 0x6db   :  { %8573 = vmatpush3.bf16.msra.mxu1 %v9302_v32 }
 0x6dc   :  { %8574 = vmatprep.subr.bf16.mxu1 %v9976_v28 }
 0x6df   :  { %8575 = vmatpush3.bf16.msra.mxu1 %v9303_v36  ;;  %v531_v36 = vrot.slane %v10228_v3, %v10108_v14 }
 0x6e0   :  { %8576 = vmatprep.subr.bf16.mxu1 %v9976_v28 }
 0x6e1   :  { %v1233_v39 = vadd.f32 %v10219_v55, %v531_v36 }
 0x6e3   :  { %8577 = vmatpush3.bf16.msra.mxu1 %v9304_v38  ;;  %v1851_v38 = vpack.c.bf16 %v10233_v8, %v10233_v8  ;;  %v9320_v8 = vld [vmem:[%s10270_s4 + $0xb8] sm:$0xff]  }
 0x6e4   :  { %8588 = vmatprep.subr.bf16.mxu1 %v9976_v28 }
 0x6e6   :  { %8579 = vmatmul.mubr.bf16.vlgmr.msra.gmra.mrb[20].mxu1 %v1380_v40  ;;  %v1904_v40 = vpack.c.bf16 %v10235_v13, %v10235_v13 }
 0x6e7   :  { %8589 = vmatpush3.bf16.msra.mxu1 %v1718_v41  ;;  %8590 = vmatprep.mubr.msk.bf16.mxu1 %vm9977_vm2, %v9976_v28  ;;  %v1850_v41 = vpack.c.bf16 %v1233_v39, %v1233_v39  ;;  %v9331_v39 = vld [vmem:[%s10393_s8 + $0x10] sm:$0xff]  }
 0x6e8   :  { %8614 = vmatprep.subr.bf16.mxu1 %v9976_v28  ;;  %v1909_v3 = vsel %vm136_vm0, %v1904_v40, 0  ;;  %v9332_v40 = vld [vmem:[%s10393_s8 + $0x18] sm:$0xff]  }
 0x799   :  { %v1476_v45 = vpop.f32.mrb[16].mxu1 }
 0x79a   :  { %v1482_v34 = vpack.c.bf16 %v1476_v45, %v1476_v45  ;;  %v8540_v47 = vpop.f32.mrb[17].mxu1 }
 0x79b   :  { %v1479_v49 = vpop.f32.mrb[18].mxu1 }
 0x79c   :  { %v8541_v50 = vpop.f32.mrb[19].mxu1  ;;  %8559 = vmatmul.mubr.bf16.vlgmr.msra.gmra.mrb[24].mxu0 %v1482_v34 }
 0x79d   :  { %8583 = vmatpush3.bf16.xpose.msra.mxu0 %v1660_v48  ;;  %8584 = vmatprep.mubr.msk.bf16.mxu0 %vm9977_vm2, %v9976_v28 }
 0x79e   :  { %8594 = vmatprep.subr.bf16.mxu0 %v9976_v28 }
 0x7a4   :  { %8585 = vmatmul.mubr.bf16.vlgmr.msra.gmra.mrb[28].mxu0 %v1659_v53 }
 0x7a5   :  { %8610 = vmatprep.mubr.msk.bf16.mxu0 %vm9977_vm2, %v9976_v28  ;;  %8595 = vmatpush3.bf16.msra.mxu0 %v9313_v23 }
 0x7a6   :  { %8596 = vmatprep.subr.bf16.mxu0 %v9976_v28 }
 0x7a9   :  { %8597 = vmatpush3.bf16.msra.mxu0 %v9314_v25 }
 0x7aa   :  { %8598 = vmatprep.subr.bf16.mxu0 %v9976_v28 }
 0x7ad   :  { %8599 = vmatpush3.bf16.msra.mxu0 %v9315_v9  ;;  %v9329_v9 = vld [vmem:[%s10393_s8] sm:$0xff]  }
 0x7ae   :  { %8600 = vmatprep.subr.bf16.mxu0 %v9976_v28 }
 0x7b1   :  { %8601 = vmatpush3.bf16.msra.mxu0 %v9316_v26  ;;  %v7662_v26 = vld [vmem:[%s7494_s12] ss:$0 sm:$0xff] }
 0x7b2   :  { %8602 = vmatprep.subr.bf16.mxu0 %v9976_v28 }
 0x7b5   :  { %8603 = vmatpush3.bf16.msra.mxu0 %v9317_v27 }
 0x7b6   :  { %8604 = vmatprep.subr.bf16.mxu0 %v9976_v28 }
 0x7b9   :  { %v1653_v30 = vpop.f32.mrb[20].mxu1  ;;  %8605 = vmatpush3.bf16.msra.mxu0 %v9318_v29 }
 0x7ba   :  { %v8580_v63 = vpop.f32.mrb[21].mxu1  ;;  %8606 = vmatprep.subr.bf16.mxu0 %v9976_v28 }
 0x7bb   :  { %v1656_v56 = vpop.f32.mrb[22].mxu1 }
 0x7bc   :  { %v8581_v57 = vpop.f32.mrb[23].mxu1 }
 0x7bd   :  { %8607 = vmatpush3.bf16.msra.mxu0 %v9319_v31 }
 0x7be   :  { %8608 = vmatprep.subr.bf16.mxu0 %v9976_v28 }
 0x7c1   :  { %8609 = vmatpush3.bf16.msra.mxu0 %v9320_v8  ;;  %v9336_v8 = vld [vmem:[%s10393_s8 + $0x38] sm:$0xff]  }
 0x7c2   :  { %8646 = vmatprep.subr.bf16.mxu0 %v9976_v28 }
 0x86f   :  { %v1565_v54 = vpop.f32.mrb[24].mxu0 }
 0x870   :  { %v10327_v58 = vadd.f32 %v1653_v30, %v1565_v54  ;;  %v8560_v59 = vpop.f32.mrb[25].mxu0 }
 0x871   :  { %v1568_v60 = vpop.f32.mrb[26].mxu0 }
 0x872   :  { %v8561_v61 = vpop.f32.mrb[27].mxu0 }
 0x877   :  { %v1695_v1 = vpop.f32.mrb[28].mxu0 }
 0x878   :  { %v1696_v62 = vadd.f32 %v1695_v1, %v10247_v21  ;;  %v8586_v2 = vpop.f32.mrb[29].mxu0  ;;  %v9321_v1 = vld [vmem:[%s10270_s4 + $0xc0] sm:$0xff]  }
 0x879   :  { %v1698_v4 = vpop.f32.mrb[30].mxu0  ;;  %v9322_v2 = vld [vmem:[%s10270_s4 + $0xc8] sm:$0xff]  }
 0x87a   :  { %v8587_v5 = vpop.f32.mrb[31].mxu0  ;;  %v1701_v6 = vsel %vm1320_vm4, %v1696_v62, -inf  ;;  %v9324_v4 = vld [vmem:[%s10270_s4 + $0xd8] sm:$0xff]  }
 0x87b   :  { %1702 = vmax.xlane.f32.xlu0 %v1701_v6  ;;  %v9325_v5 = vld [vmem:[%s10270_s4 + $0xe0] sm:$0xff]   ;;  %v9326_v6 = vld [vmem:[%s10270_s4 + $0xe8] sm:$0xff]  }
 0x908   :  { %v1703_v7 = vpop.xlane.xlu0 %1702 }
 0x909   :  { %v1704_v10 = vsub.f32 %v1696_v62, %v1703_v7  ;;  %v9327_v7 = vld [vmem:[%s10270_s4 + $0xf0] sm:$0xff]  }
 0x90b   :  { %v1705_v15 = vmul.f32 1.442695, %v1704_v10  ;;  %v9328_v10 = vld [vmem:[%s10270_s4 + $0xf8] sm:$0xff]  }
 0x90d   :  { %9803 = vpow2.f32 %v1705_v15 }
 0x917   :  { %v9804_v16 = vpop.eup %9803 }
 0x918   :  { %v1707_v22 = vsel %vm1320_vm4, %v9804_v16, 0.0 }
 0x919   :  { %1708 = vadd.xlane.f32.xlu1 %v1707_v22 }
 0x9a6   :  { %v1709_v24 = vpop.xlane.xlu1 %1708 }
 0x9a7   :  { %9805 = vrcp.f32 %v1709_v24 }
 0x9b1   :  { %v9806_v32 = vpop.eup %9805 }
 0x9b2   :  { %v1711_v35 = vmul.f32 %v9806_v32, %v9804_v16 }
 0x9b4   :  { %v1712_v37 = vpack.c.bf16 %v1711_v35, %v1711_v35 }
 0x9b6   :  { %8591 = vmatmul.mubr.msk.bf16.vlgmr.msra.gmra.mrb[24].mxu1 %vm1320_vm4, %v1712_v37 }
 0x9b7   :  { %8615 = vmatpush3.bf16.xpose.msra.mxu1 %v1851_v38  ;;  %8616 = vmatprep.mubr.msk.bf16.mxu1 %vm9977_vm2, %v9976_v28  ;;  %v9330_v38 = vld [vmem:[%s10393_s8 + $0x8] sm:$0xff]  }
 0x9b8   :  { %8620 = vmatprep.subr.bf16.mxu1 %v9976_v28 }
 0x9be   :  { %8617 = vmatmul.mubr.bf16.vlgmr.msra.gmra.mrb[28].mxu1 %v1850_v41  ;;  %v9334_v41 = vld [vmem:[%s10393_s8 + $0x28] sm:$0xff]  }
 0x9bf   :  { %8621 = vmatpush3.bf16.msra.mxu1 %v1909_v3  ;;  %8622 = vmatprep.mubr.msk.bf16.mxu1 %vm9977_vm2, %v9976_v28  ;;  %v9335_v3 = vld [vmem:[%s10393_s8 + $0x30] sm:$0xff]  }
 0x9c0   :  { %8626 = vmatprep.subr.bf16.mxu1 %v9976_v28 }
 0xa89   :  { %v1754_v55 = vpop.f32.mrb[24].mxu1 }
 0xa8a   :  { %v1760_v52 = vpack.c.bf16 %v1754_v55, %v1754_v55  ;;  %v8592_v42 = vpop.f32.mrb[25].mxu1 }
 0xa8b   :  { %v1757_v43 = vpop.f32.mrb[26].mxu1 }
 0xa8c   :  { %v8593_v44 = vpop.f32.mrb[27].mxu1  ;;  %8611 = vmatmul.mubr.bf16.vlgmr.msra.gmra.mrb[32].mxu0 %v1760_v52 }
 0xa8d   :  { %8662 = vmatprep.mubr.msk.bf16.mxu0 %vm9977_vm2, %v9976_v28  ;;  %8647 = vmatpush3.bf16.msra.mxu0 %v9329_v9 }
 0xa8e   :  { %8648 = vmatprep.subr.bf16.mxu0 %v9976_v28 }
 0xa91   :  { %v1886_v13 = vpop.f32.mrb[28].mxu1  ;;  %8649 = vmatpush3.bf16.msra.mxu0 %v9330_v38 }
 0xa92   :  { %v1887_v45 = vadd.f32 %v1886_v13, %v10247_v21  ;;  %v8618_v46 = vpop.f32.mrb[29].mxu1  ;;  %8650 = vmatprep.subr.bf16.mxu0 %v9976_v28 }
 0xa93   :  { %v1889_v34 = vpop.f32.mrb[30].mxu1  ;;  %v2049_v46 = vld [vmem:[%s7495_s16] sm:$0x3] }
 0xa94   :  { %v8619_v47 = vpop.f32.mrb[31].mxu1  ;;  %v1892_v48 = vsel %vm1320_vm4, %v1887_v45, -inf }
 0xa95   :  { %1893 = vmax.xlane.f32.xlu0 %v1892_v48  ;;  %8651 = vmatpush3.bf16.msra.mxu0 %v9331_v39  ;;  %v2066_v47 = vrot.slane %v2049_v46, %v10105_v12 }
 0xa96   :  { %8652 = vmatprep.subr.bf16.mxu0 %v9976_v28 }
 0xa99   :  { %8653 = vmatpush3.bf16.msra.mxu0 %v9332_v40  ;;  %v9346_v40 = vld [vmem:[%s10447_s29 + $0x8] sm:$0xff]  }
 0xa9a   :  { %8654 = vmatprep.subr.bf16.mxu0 %v9976_v28 }
 0xb22   :  { %v1894_v49 = vpop.xlane.xlu0 %1893 }
 0xb23   :  { %v1895_v50 = vsub.f32 %v1887_v45, %v1894_v49 }
 0xb25   :  { %v1896_v51 = vmul.f32 1.442695, %v1895_v50  ;;  %v2071_v50 = vrot.slane %v2049_v46, %v10108_v14 }
 0xb27   :  { %9807 = vpow2.f32 %v1896_v51 }
 0xb31   :  { %v9808_v53 = vpop.eup %9807 }
 0xb32   :  { %v1898_v30 = vsel %vm1320_vm4, %v9808_v53, 0.0 }
 0xb33   :  { %1899 = vadd.xlane.f32.xlu1 %v1898_v30 }
 0xb5f   :  { %v1843_v63 = vpop.f32.mrb[32].mxu0 }
 0xb60   :  { %v1849_v56 = vadd.f32 %v1843_v63, %v10327_v58  ;;  %v8612_v21 = vpop.f32.mrb[33].mxu0  ;;  %v9323_v58 = vld [vmem:[%s10270_s4 + $0xd0] sm:$0xff]   ;;  %v9337_v63 = vld [vmem:[%s7498_s20] sm:$0xff]   ;;  %s10003_s4 = smov 30  }
 0xb61   :  { %v1846_v57 = vpop.f32.mrb[34].mxu0  ;;  %v9339_v21 = vld [vmem:[%s7498_s20 + $0x10] sm:$0xff]   ;;  %s7514_s7 = sld [smem:[%s11310_s0 + %s10003_s4]]  }
 0xb62   :  { %v8613_v54 = vpop.f32.mrb[35].mxu0  ;;  %v9340_v57 = vld [vmem:[%s7498_s20 + $0x18] sm:$0xff]  }
 0xb63   :  { %v9341_v54 = vld [vmem:[%s7498_s20 + $0x20] sm:$0xff]  }
 0xbc0   :  { %v1900_v59 = vpop.xlane.xlu1 %1899 }
 0xbc1   :  { %9809 = vrcp.f32 %v1900_v59  ;;  %v9342_v59 = vld [vmem:[%s7498_s20 + $0x28] sm:$0xff]  }
 0xbcb   :  { %v9810_v60 = vpop.eup %9809 }
 0xbcc   :  { %v1902_v61 = vmul.f32 %v9810_v60, %v9808_v53  ;;  %v9343_v60 = vld [vmem:[%s7498_s20 + $0x30] sm:$0xff]  }
 0xbce   :  { %v1903_v62 = vpack.c.bf16 %v1902_v61, %v1902_v61  ;;  %v9344_v61 = vld [vmem:[%s7498_s20 + $0x38] sm:$0xff]  }
 0xbd0   :  { %8623 = vmatmul.mubr.msk.bf16.vlgmr.msra.gmra.mrb[32].mxu1 %vm1320_vm4, %v1903_v62 }
 0xbd1   :  { %8627 = vmatpush3.bf16.msra.mxu1 %v9321_v1  ;;  %8642 = vmatprep.mubr.msk.bf16.mxu1 %vm9977_vm2, %v9976_v28  ;;  %v7663_v1 = vld [vmem:[%s7497_s24] ss:$0 sm:$0xff]  ;;  %s10915_s24 = sld [smem:[%s11310_s0 + %s10000_s21]]  }
 0xbd2   :  { %8628 = vmatprep.subr.bf16.mxu1 %v9976_v28 }
 0xbd5   :  { %8629 = vmatpush3.bf16.msra.mxu1 %v9322_v2 }
 0xbd6   :  { %8630 = vmatprep.subr.bf16.mxu1 %v9976_v28 }
 0xbd9   :  { %8631 = vmatpush3.bf16.msra.mxu1 %v9323_v58 }
 0xbda   :  { %8632 = vmatprep.subr.bf16.mxu1 %v9976_v28 }
 0xbdd   :  { %8633 = vmatpush3.bf16.msra.mxu1 %v9324_v4 }
 0xbde   :  { %8634 = vmatprep.subr.bf16.mxu1 %v9976_v28 }
 0xbe1   :  { %8635 = vmatpush3.bf16.msra.mxu1 %v9325_v5 }
 0xbe2   :  { %8636 = vmatprep.subr.bf16.mxu1 %v9976_v28 }
 0xbe5   :  { %8637 = vmatpush3.bf16.msra.mxu1 %v9326_v6 }
 0xbe6   :  { %8638 = vmatprep.subr.bf16.mxu1 %v9976_v28 }
 0xbe9   :  { %8639 = vmatpush3.bf16.msra.mxu1 %v9327_v7 }
 0xbea   :  { %8640 = vmatprep.subr.bf16.mxu1 %v9976_v28 }
 0xbed   :  { %8641 = vmatpush3.bf16.msra.mxu1 %v9328_v10 }
 0xbee   :  { %8666 = vmatprep.subr.bf16.mxu1 %v9976_v28 }
 0xca3   :  { %v1945_v15 = vpop.f32.mrb[32].mxu1 }
 0xca4   :  { %v1951_v16 = vpack.c.bf16 %v1945_v15, %v1945_v15  ;;  %v8624_v22 = vpop.f32.mrb[33].mxu1 }
 0xca5   :  { %v1948_v23 = vpop.f32.mrb[34].mxu1 }
 0xca6   :  { %v8625_v25 = vpop.f32.mrb[35].mxu1  ;;  %8643 = vmatmul.mubr.bf16.vlgmr.msra.gmra.mrb[36].mxu1 %v1951_v16 }
 0xca7   :  { %8682 = vmatprep.mubr.msk.bf16.mxu1 %vm9977_vm2, %v9976_v28  ;;  %8667 = vmatpush3.bf16.msra.mxu1 %v9337_v63 }
 0xca8   :  { %8668 = vmatprep.subr.bf16.mxu1 %v9976_v28 }
 0xd79   :  { %v2034_v27 = vpop.f32.mrb[36].mxu1 }
 0xd7a   :  { %v2040_v29 = vadd.f32 %v2034_v27, %v1849_v56  ;;  %v8644_v31 = vpop.f32.mrb[37].mxu1  ;;  %v9338_v56 = vld [vmem:[%s7498_s20 + $0x8] sm:$0xff]   ;;  %v9345_v27 = vld [vmem:[%s10447_s29] sm:$0xff]   ;;  %s10904_s20 = sld [smem:[%s11310_s0 + %s9999_s17]]  }
 0xd7b   :  { %v2037_v24 = vpop.f32.mrb[38].mxu1  ;;  %8669 = vmatpush3.bf16.msra.mxu1 %v9338_v56  ;;  %v7680_v31 = vld [vmem:[%s7499_s3] ss:$0 sm:$0xff]  ;;  %s7512_s3 = sld [smem:[%s11310_s0 + %s10002_s30]]  }
 0xd7c   :  { %v2047_v32 = vadd.f32 %v7662_v26, %v2040_v29  ;;  %v8645_v35 = vpop.f32.mrb[39].mxu1  ;;  %8670 = vmatprep.subr.bf16.mxu1 %v9976_v28 }
 0xd7e   :  { %v10401_v36 = vadd.f32 %v2047_v32, %v10063_v33  ;;  %v9333_v33 = vld [vmem:[%s10393_s8 + $0x20] sm:$0xff]  }
 0xd7f   :  { %8655 = vmatpush3.bf16.msra.mxu0 %v9333_v33  ;;  %8671 = vmatpush3.bf16.msra.mxu1 %v9339_v21  ;;  %v2566_v33 = vld [vmem:[%s1_s6 + $0x8] sm:$0xff]  ;;  %v9353_v21 = vld [vmem:[%s10475_s10] sm:$0xff]  }
 0xd80   :  { %2050 = vadd.xlane.f32.xlu0 %v10401_v36  ;;  %v2052_v37 = vmul.f32 %v10401_v36, %v10401_v36  ;;  %8656 = vmatprep.subr.bf16.mxu0 %v9976_v28 }
 0xd81   :  { %8672 = vmatprep.subr.bf16.mxu1 %v9976_v28 }
 0xd82   :  { %2053 = vadd.xlane.f32.xlu1 %v2052_v37 }
 0xd83   :  { %8657 = vmatpush3.bf16.msra.mxu0 %v9334_v41  ;;  %8673 = vmatpush3.bf16.msra.mxu1 %v9340_v57  ;;  %v2565_v41 = vld [vmem:[%s1_s6] sm:$0xff]  ;;  %s9996_s6 = smov 22  }
 0xd84   :  { %8658 = vmatprep.subr.bf16.mxu0 %v9976_v28  ;;  %8674 = vmatprep.subr.bf16.mxu1 %v9976_v28  ;;  %s10580_s9 = sld [smem:[%s11310_s0 + %s9996_s6]]  }
 0xd87   :  { %8659 = vmatpush3.bf16.msra.mxu0 %v9335_v3  ;;  %8675 = vmatpush3.bf16.msra.mxu1 %v9341_v54  ;;  %v9348_v3 = vld [vmem:[%s10447_s29 + $0x18] sm:$0xff]   ;;  %v9354_v54 = vld [vmem:[%s10475_s10 + $0x8] sm:$0xff]  }
 0xd88   :  { %8660 = vmatprep.subr.bf16.mxu0 %v9976_v28  ;;  %8676 = vmatprep.subr.bf16.mxu1 %v9976_v28 }
 0xd8b   :  { %8661 = vmatpush3.bf16.msra.mxu0 %v9336_v8  ;;  %8677 = vmatpush3.bf16.msra.mxu1 %v9342_v59  ;;  %v9349_v8 = vld [vmem:[%s10447_s29 + $0x20] sm:$0xff]   ;;  %v9355_v59 = vld [vmem:[%s10475_s10 + $0x10] sm:$0xff]  }
 0xd8c   :  { %8686 = vmatprep.subr.bf16.mxu0 %v9976_v28  ;;  %8678 = vmatprep.subr.bf16.mxu1 %v9976_v28 }
 0xd8f   :  { %8679 = vmatpush3.bf16.msra.mxu1 %v9343_v60  ;;  %v9357_v60 = vld [vmem:[%s10475_s10 + $0x20] sm:$0xff]  }
 0xd90   :  { %8680 = vmatprep.subr.bf16.mxu1 %v9976_v28 }
 0xd93   :  { %8681 = vmatpush3.bf16.msra.mxu1 %v9344_v61  ;;  %v9358_v61 = vld [vmem:[%s10475_s10 + $0x28] sm:$0xff]  }
 0xd94   :  { %8706 = vmatprep.subr.bf16.mxu1 %v9976_v28 }
 0xe0d   :  { %v2051_v55 = vpop.xlane.xlu0 %2050 }
 0xe0e   :  { %v2055_v52 = vmul.f32 0.03125, %v2051_v55  ;;  %v9350_v55 = vld [vmem:[%s10447_s29 + $0x28] sm:$0xff]  }
 0xe0f   :  { %v2054_v42 = vpop.xlane.xlu1 %2053 }
 0xe10   :  { %v2057_v43 = vmul.f32 %v2055_v52, %v2055_v52  ;;  %v2056_v44 = vmul.f32 0.03125, %v2054_v42  ;;  %v2059_v34 = vsub.f32 %v10401_v36, %v2055_v52  ;;  %v9351_v52 = vld [vmem:[%s10447_s29 + $0x30] sm:$0xff]   ;;  %v9352_v42 = vld [vmem:[%s10447_s29 + $0x38] sm:$0xff]  }
 0xe12   :  { %v2058_v13 = vsub.f32 %v2056_v44, %v2057_v43 }
 0xe14   :  { %v2060_v45 = vadd.f32 1e-05, %v2058_v13 }
 0xe16   :  { %9811 = vrsqrt.f32 %v2060_v45 }
 0xe20   :  { %v9812_v48 = vpop.eup %9811 }
 0xe21   :  { %v2062_v49 = vmul.f32 %v9812_v48, %v2059_v34  ;;  %v2308_v48 = vld [vmem:[%s7500_s14] sm:$0x3] }
 0xe23   :  { %v2067_v51 = vmul.f32 %v2066_v47, %v2062_v49 }
 0xe25   :  { %v2072_v53 = vadd.f32 %v2071_v50, %v2067_v51  ;;  %v2325_v50 = vrot.slane %v2308_v48, %v10105_v12 }
 0xe27   :  { %v2073_v30 = vpack.c.bf16 %v2072_v53, %v2072_v53 }
 0xe29   :  { %8663 = vmatmul.mubr.bf16.vlgmr.msra.gmra.mrb[36].mxu0 %v2073_v30  ;;  %v2330_v30 = vrot.slane %v2308_v48, %v10108_v14  ;;  %v9356_v14 = vld [vmem:[%s10475_s10 + $0x18] sm:$0xff]  }
 0xe2a   :  { %8702 = vmatprep.mubr.msk.bf16.mxu0 %vm9977_vm2, %v9976_v28  ;;  %8687 = vmatpush3.bf16.msra.mxu0 %v9345_v27  ;;  %v9380_v48 = vld [vmem:[%s10525_s26 + $0x6c] ss:$48 sps:$4 sm:$0xff]  }
 0xe2b   :  { %8688 = vmatprep.subr.bf16.mxu0 %v9976_v28 }
 0xe2e   :  { %8689 = vmatpush3.bf16.msra.mxu0 %v9346_v40 }
 0xe2f   :  { %8690 = vmatprep.subr.bf16.mxu0 %v9976_v28 }
 0xefc   :  { %v2179_v62 = vpop.f32.mrb[36].mxu0 }
 0xefd   :  { %v2180_v2 = vadd.f32 %v7663_v1, %v2179_v62  ;;  %v8664_v58 = vpop.f32.mrb[37].mxu0  ;;  %v9359_v1 = vld [vmem:[%s10475_s10 + $0x30] sm:$0xff]  }
 0xefe   :  { %v2182_v4 = vpop.f32.mrb[38].mxu0  ;;  %v9360_v58 = vld [vmem:[%s10475_s10 + $0x38] sm:$0xff]   ;;  %s9997_s10 = smov 24  }
 0xeff   :  { %v2185_v5 = vmul.f32 %v2180_v2, %v2180_v2  ;;  %v8665_v6 = vpop.f32.mrb[39].mxu0  ;;  %v9990_v4 = vmov 1.0|1.0   ;;  %s10677_s13 = sld [smem:[%s11310_s0 + %s9997_s10]]  }
 0xf00   :  { %v9362_v6 = vld [vmem:[%s7503_s18 + $0x8] sm:$0xff]  }
 0xf01   :  { %v2186_v7 = vmul.f32 %v2185_v5, %v2180_v2  ;;  %v9361_v5 = vld [vmem:[%s7503_s18] sm:$0xff]  }
 0xf03   :  { %v2187_v10 = vmul.f32 0.044715, %v2186_v7  ;;  %v9363_v7 = vld [vmem:[%s7503_s18 + $0x10] sm:$0xff]  }
 0xf05   :  { %v2188_v15 = vadd.f32 %v2187_v10, %v2180_v2  ;;  %v9364_v10 = vld [vmem:[%s7503_s18 + $0x18] sm:$0xff]  }
 0xf07   :  { %v2189_v16 = vmul.f32 0.7978846, %v2188_v15  ;;  %v9365_v15 = vld [vmem:[%s7503_s18 + $0x20] sm:$0xff]  }
 0xf09   :  { %9813 = vtanh.f32 %v2189_v16  ;;  %v9366_v16 = vld [vmem:[%s7503_s18 + $0x28] sm:$0xff]  }
 0xf13   :  { %v9814_v22 = vpop.eup %9813 }
 0xf14   :  { %v2191_v23 = vadd.f32 1.0, %v9814_v22  ;;  %v9367_v22 = vld [vmem:[%s7503_s18 + $0x30] sm:$0xff]  }
 0xf16   :  { %v2192_v25 = vmul.f32 0.5, %v2191_v23  ;;  %v9368_v23 = vld [vmem:[%s7503_s18 + $0x38] sm:$0xff]  }
 0xf18   :  { %v2193_v9 = vmul.f32 %v2192_v25, %v2180_v2  ;;  %v7681_v25 = vld [vmem:[%s7502_s22] ss:$0 sm:$0xff] }
 0xf1a   :  { %v2194_v26 = vpack.c.bf16 %v2193_v9, %v2193_v9 }
 0xf1c   :  { %8683 = vmatmul.mubr.bf16.vlgmr.msra.gmra.mrb[40].mxu1 %v2194_v26 }
 0xf1d   :  { %8722 = vmatprep.mubr.msk.bf16.mxu1 %vm9977_vm2, %v9976_v28  ;;  %8707 = vmatpush3.bf16.msra.mxu1 %v9361_v5  ;;  %v9396_v5 = vld [vmem:[%s10525_s26 + $0x188] ss:$48 sps:$4 sm:$0xff]  }
 0xf1e   :  { %8708 = vmatprep.subr.bf16.mxu1 %v9976_v28 }
 0xf21   :  { %8709 = vmatpush3.bf16.msra.mxu1 %v9362_v6  ;;  %v9401_v6 = vld [vmem:[%s10525_s26 + $0x1e4] ss:$48 sps:$4 sm:$0xff]  }
 0xf22   :  { %8710 = vmatprep.subr.bf16.mxu1 %v9976_v28 }
 0xf25   :  { %8711 = vmatpush3.bf16.msra.mxu1 %v9363_v7  ;;  %v9404_v7 = vld [vmem:[%s10525_s26 + $0x1ec] ss:$48 sps:$4 sm:$0xff]  }
 0xf26   :  { %8712 = vmatprep.subr.bf16.mxu1 %v9976_v28 }
 0xf29   :  { %8713 = vmatpush3.bf16.msra.mxu1 %v9364_v10  ;;  %v9399_v10 = vld [vmem:[%s10525_s26 + $0x1e0] ss:$48 sps:$4 sm:$0xff]  }
 0xf2a   :  { %8714 = vmatprep.subr.bf16.mxu1 %v9976_v28 }
 0xf2d   :  { %8715 = vmatpush3.bf16.msra.mxu1 %v9365_v15  ;;  %v9402_v15 = vld [vmem:[%s10525_s26 + $0x1e8] ss:$48 sps:$4 sm:$0xff]  }
 0xf2e   :  { %8716 = vmatprep.subr.bf16.mxu1 %v9976_v28 }
 0xf31   :  { %8717 = vmatpush3.bf16.msra.mxu1 %v9366_v16  ;;  %v9407_v16 = vld [vmem:[%s10525_s26 + $0x244] ss:$48 sps:$4 sm:$0xff]  }
 0xf32   :  { %8718 = vmatprep.subr.bf16.mxu1 %v9976_v28 }
 0xf35   :  { %8719 = vmatpush3.bf16.msra.mxu1 %v9367_v22  ;;  %v9410_v22 = vld [vmem:[%s10525_s26 + $0x24c] ss:$48 sps:$4 sm:$0xff]  }
 0xf36   :  { %8720 = vmatprep.subr.bf16.mxu1 %v9976_v28 }
 0xf39   :  { %8721 = vmatpush3.bf16.msra.mxu1 %v9368_v23  ;;  %v9405_v23 = vld [vmem:[%s10525_s26 + $0x240] ss:$48 sps:$4 sm:$0xff]  }
 0xfef   :  { %v2293_v29 = vpop.f32.mrb[40].mxu1 }
 0xff0   :  { %v2299_v24 = vadd.f32 %v2293_v29, %v10401_v36  ;;  %v8684_v32 = vpop.f32.mrb[41].mxu1  ;;  %v9347_v36 = vld [vmem:[%s10447_s29 + $0x10] sm:$0xff]   ;;  %s11291_s29 = sld [smem:[%s11310_s0 + %s10001_s25]]  }
 0xff1   :  { %v2296_v35 = vpop.f32.mrb[42].mxu1  ;;  %8691 = vmatpush3.bf16.msra.mxu0 %v9347_v36 }
 0xff2   :  { %v2307_v37 = vadd.f32 %v7680_v31, %v2299_v24  ;;  %v8685_v38 = vpop.f32.mrb[43].mxu1  ;;  %8692 = vmatprep.subr.bf16.mxu0 %v9976_v28 }
 0xff4   :  { %2309 = vadd.xlane.f32.xlu0 %v2307_v37  ;;  %v2311_v39 = vmul.f32 %v2307_v37, %v2307_v37 }
 0xff5   :  { %8693 = vmatpush3.bf16.msra.mxu0 %v9348_v3 }
 0xff6   :  { %2312 = vadd.xlane.f32.xlu1 %v2311_v39  ;;  %8694 = vmatprep.subr.bf16.mxu0 %v9976_v28 }
 0xff9   :  { %8695 = vmatpush3.bf16.msra.mxu0 %v9349_v8 }
 0xffa   :  { %8696 = vmatprep.subr.bf16.mxu0 %v9976_v28 }
 0xffd   :  { %8697 = vmatpush3.bf16.msra.mxu0 %v9350_v55 }
 0xffe   :  { %8698 = vmatprep.subr.bf16.mxu0 %v9976_v28 }
0x1001   :  { %8699 = vmatpush3.bf16.msra.mxu0 %v9351_v52 }
0x1002   :  { %8700 = vmatprep.subr.bf16.mxu0 %v9976_v28 }
0x1005   :  { %8701 = vmatpush3.bf16.msra.mxu0 %v9352_v42 }
0x1006   :  { %8726 = vmatprep.subr.bf16.mxu0 %v9976_v28 }
0x1007   :  { %2571 = vperm.xlu1 %9138, %v2566_v33  }
0x100a   :  { %2568 = vperm.xlu0 %9137, %v2565_v41  }
0x1081   :  { %v2310_v43 = vpop.xlane.xlu0 %2309 }
0x1082   :  { %v2314_v44 = vmul.f32 0.03125, %v2310_v43  ;;  %v9369_v43 = vld [vmem:[%s10525_s26] ss:$48 sps:$4 sm:$0xff]  }
0x1083   :  { %v2313_v13 = vpop.xlane.xlu1 %2312 }
0x1084   :  { %v2316_v45 = vmul.f32 %v2314_v44, %v2314_v44  ;;  %v2315_v46 = vmul.f32 0.03125, %v2313_v13  ;;  %v2318_v49 = vsub.f32 %v2307_v37, %v2314_v44  ;;  %v9371_v44 = vld [vmem:[%s10525_s26 + $0x4] ss:$48 sps:$4 sm:$0xff]   ;;  %v9372_v13 = vld [vmem:[%s10525_s26 + $0x8] ss:$48 sps:$4 sm:$0xff]  }
0x1085   :  { %3437 = vmatprep.subr.bf16.mxu1 %v9371_v44  ;;  %v7716_v44 = vld [vmem:[%s10580_s9] ss:$0 sm:$0xff] }
0x1086   :  { %v2317_v34 = vsub.f32 %v2315_v46, %v2316_v45  ;;  %v9374_v45 = vld [vmem:[%s10525_s26 + $0xc] ss:$48 sps:$4 sm:$0xff]   ;;  %v9375_v46 = vld [vmem:[%s10525_s26 + $0x60] ss:$48 sps:$4 sm:$0xff]  }
0x1087   :  { %v2572_v62 = vpop.permute.xlu1 %2571 }
0x1088   :  { %v2319_v47 = vadd.f32 1e-05, %v2317_v34  ;;  %vm2574_vm5 = vcmp.eq.s32.totalorder %v10238_v17, %v2572_v62  ;;  %v9377_v34 = vld [vmem:[%s10525_s26 + $0x64] ss:$48 sps:$4 sm:$0xff]   ;;  %v9390_v62 = vld [vmem:[%s10525_s26 + $0x128] ss:$48 sps:$4 sm:$0xff]  }
0x1089   :  { %v2569_v2 = vpop.permute.xlu0 %2568 }
0x108a   :  { %9815 = vrsqrt.f32 %v2319_v47  ;;  %vm2573_vm6 = vcmp.eq.s32.totalorder %v10238_v17, %v2569_v2  ;;  %v9378_v47 = vld [vmem:[%s10525_s26 + $0x68] ss:$48 sps:$4 sm:$0xff]   ;;  %v9395_v2 = vld [vmem:[%s10525_s26 + $0x184] ss:$48 sps:$4 sm:$0xff]  }
0x108b   :  { %vm7709_vm7 = vmpackc.low %vm2574_vm5, %vm2573_vm6  ;;  %vm3795_vm6 = vcmask 195584  }
0x1094   :  { %v9816_v51 = vpop.eup %9815 }
0x1095   :  { %v2321_v53 = vmul.f32 %v9816_v51, %v2318_v49  ;;  %v9381_v49 = vld [vmem:[%s10525_s26 + $0xc0] ss:$48 sps:$4 sm:$0xff]   ;;  %v9384_v51 = vld [vmem:[%s10525_s26 + $0xc8] ss:$48 sps:$4 sm:$0xff]  }
0x1097   :  { %v2326_v63 = vmul.f32 %v2325_v50, %v2321_v53  ;;  %v9383_v50 = vld [vmem:[%s10525_s26 + $0xc4] ss:$48 sps:$4 sm:$0xff]   ;;  %v9386_v53 = vld [vmem:[%s10525_s26 + $0xcc] ss:$48 sps:$4 sm:$0xff]  }
0x1099   :  { %v2331_v56 = vadd.f32 %v2330_v30, %v2326_v63  ;;  %v7690_v30 = vld [vmem:[%s7504_s1] ss:$0 sm:$0xff] }
0x109b   :  { %v2332_v57 = vpack.c.bf16 %v2331_v56, %v2331_v56 }
0x109d   :  { %8703 = vmatmul.mubr.bf16.vlgmr.msra.gmra.mrb[40].mxu0 %v2332_v57 }
0x109e   :  { %8727 = vmatpush3.bf16.msra.mxu0 %v9353_v21  ;;  %8742 = vmatprep.mubr.msk.bf16.mxu0 %vm9977_vm2, %v9976_v28 }
0x109f   :  { %8728 = vmatprep.subr.bf16.mxu0 %v9976_v28 }
0x10a2   :  { %8729 = vmatpush3.bf16.msra.mxu0 %v9354_v54 }
0x10a3   :  { %8730 = vmatprep.subr.bf16.mxu0 %v9976_v28 }
0x10a6   :  { %8731 = vmatpush3.bf16.msra.mxu0 %v9355_v59 }
0x10a7   :  { %8732 = vmatprep.subr.bf16.mxu0 %v9976_v28 }
0x10aa   :  { %8733 = vmatpush3.bf16.msra.mxu0 %v9356_v14 }
0x10ab   :  { %8734 = vmatprep.subr.bf16.mxu0 %v9976_v28 }
0x10ae   :  { %8735 = vmatpush3.bf16.msra.mxu0 %v9357_v60  ;;  %v9389_v60 = vld [vmem:[%s10525_s26 + $0x124] ss:$48 sps:$4 sm:$0xff]  }
0x10af   :  { %8736 = vmatprep.subr.bf16.mxu0 %v9976_v28 }
0x10b2   :  { %8737 = vmatpush3.bf16.msra.mxu0 %v9358_v61  ;;  %v9392_v61 = vld [vmem:[%s10525_s26 + $0x12c] ss:$48 sps:$4 sm:$0xff]  }
0x10b3   :  { %8738 = vmatprep.subr.bf16.mxu0 %v9976_v28 }
0x10b6   :  { %8739 = vmatpush3.bf16.msra.mxu0 %v9359_v1  ;;  %v9387_v1 = vld [vmem:[%s10525_s26 + $0x120] ss:$48 sps:$4 sm:$0xff]  }
0x10b7   :  { %8740 = vmatprep.subr.bf16.mxu0 %v9976_v28 }
0x10ba   :  { %8741 = vmatpush3.bf16.msra.mxu0 %v9360_v58  ;;  %v9398_v58 = vld [vmem:[%s10525_s26 + $0x18c] ss:$48 sps:$4 sm:$0xff]  }
0x10bb   :  { %3488 = vmatprep.subr.bf16.mxu0 %v9374_v45 }
0x10bd   :  { %8743 = vmatmul.mubr.msk.bf16.vlgmr.msra.gmra.mrb[44].mxu0 %vm7709_vm7, %v9990_v4  ;;  %v9393_v4 = vld [vmem:[%s10525_s26 + $0x180] ss:$48 sps:$4 sm:$0xff]  }
0x10be   :  { %3520 = vmatprep.mubr.bf16.mxu0 %v9969_v0  ;;  %3489 = vmatpush1.bf16.msra.mxu0 %v9372_v13 }
0x10bf   :  { %3490 = vmatprep.subr.bf16.mxu0 %v9380_v48  ;;  %v9420_v48 = vld [vmem:[%s10525_s26 + $0x18] ss:$48 sps:$4 sm:$0xff]  }
0x10c2   :  { %3491 = vmatpush1.bf16.msra.mxu0 %v9378_v47  ;;  %v9417_v47 = vld [vmem:[%s10525_s26 + $0x10] ss:$48 sps:$4 sm:$0xff]  }
0x10c3   :  { %3492 = vmatprep.subr.bf16.mxu0 %v9386_v53  ;;  %v9428_v53 = vld [vmem:[%s10525_s26 + $0x7c] ss:$48 sps:$4 sm:$0xff]  }
0x10c6   :  { %3493 = vmatpush1.bf16.msra.mxu0 %v9384_v51  ;;  %v9425_v51 = vld [vmem:[%s10525_s26 + $0x74] ss:$48 sps:$4 sm:$0xff]  }
0x10c7   :  { %3494 = vmatprep.subr.bf16.mxu0 %v9392_v61  ;;  %v9437_v61 = vld [vmem:[%s10525_s26 + $0x134] ss:$48 sps:$4 sm:$0xff]  }
0x10ca   :  { %3495 = vmatpush1.bf16.msra.mxu0 %v9390_v62  ;;  %v9435_v62 = vld [vmem:[%s10525_s26 + $0x130] ss:$48 sps:$4 sm:$0xff]  }
0x10cb   :  { %3496 = vmatprep.subr.bf16.mxu0 %v9398_v58  ;;  %v9443_v58 = vld [vmem:[%s10525_s26 + $0x194] ss:$48 sps:$4 sm:$0xff]  }
0x10ce   :  { %3497 = vmatpush1.bf16.msra.mxu0 %v9396_v5  ;;  %v9441_v5 = vld [vmem:[%s10525_s26 + $0x190] ss:$48 sps:$4 sm:$0xff]  }
0x10cf   :  { %3498 = vmatprep.subr.bf16.mxu0 %v9404_v7  ;;  %v9449_v7 = vld [vmem:[%s10525_s26 + $0x1f4] ss:$48 sps:$4 sm:$0xff]  }
0x10d2   :  { %3499 = vmatpush1.bf16.msra.mxu0 %v9402_v15  ;;  %v9447_v15 = vld [vmem:[%s10525_s26 + $0x1f0] ss:$48 sps:$4 sm:$0xff]  }
0x10d3   :  { %3500 = vmatprep.subr.bf16.mxu0 %v9410_v22  ;;  %v9455_v22 = vld [vmem:[%s10525_s26 + $0x254] ss:$48 sps:$4 sm:$0xff]  }
0x1170   :  { %v2438_v9 = vpop.f32.mrb[40].mxu0 }
0x1171   :  { %v2439_v26 = vadd.f32 %v7681_v25, %v2438_v9  ;;  %v8704_v27 = vpop.f32.mrb[41].mxu0  ;;  %v9408_v25 = vld [vmem:[%s10525_s26 + $0x248] ss:$48 sps:$4 sm:$0xff]   ;;  %v9413_v9 = vld [vmem:[%s10525_s26 + $0x2a4] ss:$48 sps:$4 sm:$0xff]  }
0x1172   :  { %v2441_v29 = vpop.f32.mrb[42].mxu0  ;;  %3501 = vmatpush1.bf16.msra.mxu0 %v9408_v25  ;;  %v9411_v27 = vld [vmem:[%s10525_s26 + $0x2a0] ss:$48 sps:$4 sm:$0xff]  }
0x1173   :  { %v2444_v31 = vmul.f32 %v2439_v26, %v2439_v26  ;;  %v8705_v24 = vpop.f32.mrb[43].mxu0  ;;  %v9414_v29 = vld [vmem:[%s10525_s26 + $0x2a8] ss:$48 sps:$4 sm:$0xff]   ;;  %v9453_v25 = vld [vmem:[%s10525_s26 + $0x250] ss:$48 sps:$4 sm:$0xff]  }
0x1174   :  { %v9422_v24 = vld [vmem:[%s10525_s26 + $0x1c] ss:$48 sps:$4 sm:$0xff]  }
0x1175   :  { %v2445_v32 = vmul.f32 %v2444_v31, %v2439_v26  ;;  %v9419_v31 = vld [vmem:[%s10525_s26 + $0x14] ss:$48 sps:$4 sm:$0xff]  }
0x1177   :  { %v2446_v35 = vmul.f32 0.044715, %v2445_v32  ;;  %v7715_v32 = vld [vmem:[%s10573_s5 + $0x1] ss:$0 sm:$0xff] }
0x1179   :  { %v2447_v37 = vadd.f32 %v2446_v35, %v2439_v26 }
0x117b   :  { %v2448_v38 = vmul.f32 0.7978846, %v2447_v37 }
0x117d   :  { %9817 = vtanh.f32 %v2448_v38 }
0x1187   :  { %v9818_v39 = vpop.eup %9817 }
0x1188   :  { %v2450_v40 = vadd.f32 1.0, %v9818_v39 }
0x118a   :  { %v2451_v33 = vmul.f32 0.5, %v2450_v40 }
0x118c   :  { %v2452_v36 = vmul.f32 %v2451_v33, %v2439_v26  ;;  %v9416_v26 = vld [vmem:[%s10525_s26 + $0x2ac] ss:$48 sps:$4 sm:$0xff]  }
0x118d   :  { %3502 = vmatprep.subr.bf16.mxu0 %v9416_v26  ;;  %v9461_v26 = vld [vmem:[%s10525_s26 + $0x2b4] ss:$48 sps:$4 sm:$0xff]  }
0x118e   :  { %v2453_v41 = vpack.c.bf16 %v2452_v36, %v2452_v36  ;;  %3503 = vmatpush1.bf16.msra.mxu0 %v9414_v29  ;;  %v9459_v29 = vld [vmem:[%s10525_s26 + $0x2b0] ss:$48 sps:$4 sm:$0xff]  }
0x118f   :  { %3590 = vmatprep.subr.bf16.mxu0 %v9422_v24  ;;  %v9467_v24 = vld [vmem:[%s10525_s26 + $0x24] ss:$48 sps:$4 sm:$0xff]  }
0x1190   :  { %8723 = vmatmul.mubr.bf16.vlgmr.msra.gmra.mrb[44].mxu1 %v2453_v41  ;;  %v10515_v3 = vpop.f32.mrb[44].mxu0 }
0x1191   :  { %v2768_v8 = vmul.f32 %v10515_v3, %v10515_v3  ;;  %v8744_v55 = vpop.f32.mrb[45].mxu0  ;;  %3469 = vmatprep.mubr.bf16.mxu1 %v9969_v0  ;;  %3438 = vmatpush1.bf16.msra.mxu1 %v9369_v43 }
0x1192   :  { %v10520_v52 = vpop.f32.mrb[46].mxu0  ;;  %3439 = vmatprep.subr.bf16.mxu1 %v9377_v34 }
0x1193   :  { %2772 = vadd.xlane.f32.xlu0 %v2768_v8  ;;  %v8745_v42 = vpop.f32.mrb[47].mxu0  ;;  %v2769_v14 = vmul.f32 %v10520_v52, %v10520_v52 }
0x1195   :  { %3440 = vmatpush1.bf16.msra.mxu1 %v9375_v46 }
0x1196   :  { %3441 = vmatprep.subr.bf16.mxu1 %v9383_v50 }
0x1199   :  { %3442 = vmatpush1.bf16.msra.mxu1 %v9381_v49 }
0x119a   :  { %3443 = vmatprep.subr.bf16.mxu1 %v9389_v60 }
0x119d   :  { %3444 = vmatpush1.bf16.msra.mxu1 %v9387_v1  ;;  %v9440_v1 = vld [vmem:[%s10525_s26 + $0x13c] ss:$48 sps:$4 sm:$0xff]  }
0x119e   :  { %3445 = vmatprep.subr.bf16.mxu1 %v9395_v2  ;;  %v9438_v2 = vld [vmem:[%s10525_s26 + $0x138] ss:$48 sps:$4 sm:$0xff]  }
0x11a1   :  { %3446 = vmatpush1.bf16.msra.mxu1 %v9393_v4  ;;  %v9446_v4 = vld [vmem:[%s10525_s26 + $0x19c] ss:$48 sps:$4 sm:$0xff]  }
0x11a2   :  { %3447 = vmatprep.subr.bf16.mxu1 %v9401_v6  ;;  %v9444_v6 = vld [vmem:[%s10525_s26 + $0x198] ss:$48 sps:$4 sm:$0xff]  }
0x11a5   :  { %3448 = vmatpush1.bf16.msra.mxu1 %v9399_v10  ;;  %v9452_v10 = vld [vmem:[%s10525_s26 + $0x1fc] ss:$48 sps:$4 sm:$0xff]  }
0x11a6   :  { %3449 = vmatprep.subr.bf16.mxu1 %v9407_v16  ;;  %v9450_v16 = vld [vmem:[%s10525_s26 + $0x1f8] ss:$48 sps:$4 sm:$0xff]  }
0x11a9   :  { %3450 = vmatpush1.bf16.msra.mxu1 %v9405_v23  ;;  %v9458_v23 = vld [vmem:[%s10525_s26 + $0x25c] ss:$48 sps:$4 sm:$0xff]  }
0x11aa   :  { %3451 = vmatprep.subr.bf16.mxu1 %v9413_v9  ;;  %v9456_v9 = vld [vmem:[%s10525_s26 + $0x258] ss:$48 sps:$4 sm:$0xff]  }
0x11ad   :  { %3452 = vmatpush1.bf16.msra.mxu1 %v9411_v27  ;;  %v9464_v27 = vld [vmem:[%s10525_s26 + $0x2bc] ss:$48 sps:$4 sm:$0xff]  }
0x11ae   :  { %3539 = vmatprep.subr.bf16.mxu1 %v9419_v31  ;;  %v9462_v31 = vld [vmem:[%s10525_s26 + $0x2b8] ss:$48 sps:$4 sm:$0xff]  }
0x1220   :  { %v2773_v35 = vpop.xlane.xlu0 %2772 }
0x1221   :  { %v2777_v37 = vmul.f32 0.03125, %v2773_v35  ;;  %v9465_v35 = vld [vmem:[%s10525_s26 + $0x20] ss:$48 sps:$4 sm:$0xff]  }
0x1223   :  { %v2780_v38 = vadd.f32 1e-06, %v2777_v37  ;;  %v9468_v37 = vld [vmem:[%s10525_s26 + $0x28] ss:$48 sps:$4 sm:$0xff]  }
0x1225   :  { %9819 = vrsqrt.f32 %v2780_v38  ;;  %v9473_v38 = vld [vmem:[%s10525_s26 + $0x84] ss:$48 sps:$4 sm:$0xff]  }
0x122f   :  { %v9820_v55 = vpop.eup %9819 }
0x1230   :  { %v2786_v42 = vmul.f32 %v9820_v55, %v10515_v3  ;;  %v9480_v55 = vld [vmem:[%s10525_s26 + $0xe8] ss:$48 sps:$4 sm:$0xff]  }
0x1232   :  { %v2793_v45 = vmul.f32 %v7716_v44, %v2786_v42  ;;  %v9485_v42 = vld [vmem:[%s10525_s26 + $0x144] ss:$48 sps:$4 sm:$0xff]  }
0x1263   :  { %v2559_v63 = vpop.f32.mrb[44].mxu1 }
0x1264   :  { %v10542_v56 = vadd.f32 %v7690_v30, %v2559_v63  ;;  %v8724_v21 = vpop.f32.mrb[45].mxu1  ;;  %v9423_v30 = vld [vmem:[%s10525_s26 + $0x70] ss:$48 sps:$4 sm:$0xff]   ;;  %v9426_v63 = vld [vmem:[%s10525_s26 + $0x78] ss:$48 sps:$4 sm:$0xff]  }
0x1265   :  { %v2562_v57 = vpop.f32.mrb[46].mxu1 }
0x1266   :  { %v8725_v54 = vpop.f32.mrb[47].mxu1  ;;  %v2767_v59 = vmul.f32 %v10542_v56, %v10542_v56  ;;  %v9431_v57 = vld [vmem:[%s10525_s26 + $0xd4] ss:$48 sps:$4 sm:$0xff]  }
0x1267   :  { %v9434_v54 = vld [vmem:[%s10525_s26 + $0xdc] ss:$48 sps:$4 sm:$0xff]  }
0x1268   :  { %2770 = vadd.xlane.f32.xlu1 %v2767_v59  ;;  %v9429_v59 = vld [vmem:[%s10525_s26 + $0xd0] ss:$48 sps:$4 sm:$0xff]  }
0x126c   :  { %2774 = vadd.xlane.f32.xlu1 %v2769_v14  ;;  %v9432_v14 = vld [vmem:[%s10525_s26 + $0xd8] ss:$48 sps:$4 sm:$0xff]  }
0x127d   :  { %2736 = vrot.lane.b32.xlu1 %v7715_v32, %s9978_s27  ;;  %v9470_v32 = vld [vmem:[%s10525_s26 + $0x2c] ss:$48 sps:$4 sm:$0xff]  }
0x12f5   :  { %v2771_v39 = vpop.xlane.xlu1 %2770 }
0x12f6   :  { %v2776_v40 = vmul.f32 0.03125, %v2771_v39  ;;  %v9476_v39 = vld [vmem:[%s10525_s26 + $0x8c] ss:$48 sps:$4 sm:$0xff]  }
0x12f8   :  { %v2779_v33 = vadd.f32 1e-06, %v2776_v40  ;;  %v9471_v40 = vld [vmem:[%s10525_s26 + $0x80] ss:$48 sps:$4 sm:$0xff]  }
0x12f9   :  { %v2775_v36 = vpop.xlane.xlu1 %2774 }
0x12fa   :  { %9821 = vrsqrt.f32 %v2779_v33  ;;  %v2778_v41 = vmul.f32 0.03125, %v2775_v36  ;;  %v9474_v33 = vld [vmem:[%s10525_s26 + $0x88] ss:$48 sps:$4 sm:$0xff]   ;;  %v9479_v36 = vld [vmem:[%s10525_s26 + $0xe4] ss:$48 sps:$4 sm:$0xff]  }
0x12fc   :  { %v2781_v8 = vadd.f32 1e-06, %v2778_v41  ;;  %v9482_v41 = vld [vmem:[%s10525_s26 + $0xec] ss:$48 sps:$4 sm:$0xff]  }
0x12fe   :  { %9823 = vrsqrt.f32 %v2781_v8  ;;  %v9477_v8 = vld [vmem:[%s10525_s26 + $0xe0] ss:$48 sps:$4 sm:$0xff]  }
0x1304   :  { %v9822_v43 = vpop.eup %9821 }
0x1305   :  { %v2785_v13 = vmul.f32 %v9822_v43, %v10542_v56  ;;  %v9488_v43 = vld [vmem:[%s10525_s26 + $0x14c] ss:$48 sps:$4 sm:$0xff]  }
0x1307   :  { %v2792_v46 = vmul.f32 %v7716_v44, %v2785_v13  ;;  %v9486_v13 = vld [vmem:[%s10525_s26 + $0x148] ss:$48 sps:$4 sm:$0xff]  }
0x1308   :  { %v9824_v34 = vpop.eup %9823 }
0x1309   :  { %v10587_v49 = vpack.c.bf16 %v2793_v45, %v2792_v46  ;;  %v2787_v50 = vmul.f32 %v9824_v34, %v10520_v52  ;;  %v9491_v45 = vld [vmem:[%s10525_s26 + $0x1a4] ss:$48 sps:$4 sm:$0xff]   ;;  %v9494_v46 = vld [vmem:[%s10525_s26 + $0x1ac] ss:$48 sps:$4 sm:$0xff]   ;;  %v9489_v34 = vld [vmem:[%s10525_s26 + $0x1a0] ss:$48 sps:$4 sm:$0xff]  }
0x130b   :  { %3470 = vmatmul.mubr.bf16.vlgmr.msra.gmra.mrb[48].mxu1 %v10587_v49  ;;  %3521 = vmatmul.mubr.bf16.vlgmr.msra.gmra.mrb[48].mxu0 %v10587_v49  ;;  %v2794_v21 = vmul.f32 %v7716_v44, %v2787_v50  ;;  %v9483_v44 = vld [vmem:[%s10525_s26 + $0x140] ss:$48 sps:$4 sm:$0xff]   ;;  %v9500_v50 = vld [vmem:[%s10525_s26 + $0x20c] ss:$48 sps:$4 sm:$0xff]  }
0x130c   :  { %3540 = vmatpush1.bf16.msra.mxu1 %v9417_v47  ;;  %3591 = vmatpush1.bf16.msra.mxu0 %v9420_v48  ;;  %v9492_v47 = vld [vmem:[%s10525_s26 + $0x1a8] ss:$48 sps:$4 sm:$0xff]   ;;  %v9497_v48 = vld [vmem:[%s10525_s26 + $0x204] ss:$48 sps:$4 sm:$0xff]  }
0x130d   :  { %3541 = vmatprep.subr.bf16.mxu1 %v9425_v51  ;;  %3592 = vmatprep.subr.bf16.mxu0 %v9428_v53  ;;  %v10602_v60 = vpack.c.bf16 %v2794_v21, %v2794_v21  ;;  %v9495_v51 = vld [vmem:[%s10525_s26 + $0x200] ss:$48 sps:$4 sm:$0xff]   ;;  %v9498_v53 = vld [vmem:[%s10525_s26 + $0x208] ss:$48 sps:$4 sm:$0xff]  }
0x130e   :  { %3479 = vmatprep.mubr.bf16.mxu1 %v9969_v0  ;;  %3530 = vmatprep.mubr.bf16.mxu0 %v9969_v0  ;;  %v9501_v21 = vld [vmem:[%s10525_s26 + $0x260] ss:$48 sps:$4 sm:$0xff]  }
0x1310   :  { %3542 = vmatpush1.bf16.msra.mxu1 %v9423_v30  ;;  %3593 = vmatpush1.bf16.msra.mxu0 %v9426_v63  ;;  %v9503_v30 = vld [vmem:[%s10525_s26 + $0x264] ss:$48 sps:$4 sm:$0xff]   ;;  %v9506_v63 = vld [vmem:[%s10525_s26 + $0x26c] ss:$48 sps:$4 sm:$0xff]  }
0x1311   :  { %3543 = vmatprep.subr.bf16.mxu1 %v9431_v57  ;;  %3594 = vmatprep.subr.bf16.mxu0 %v9434_v54  ;;  %v9504_v57 = vld [vmem:[%s10525_s26 + $0x268] ss:$48 sps:$4 sm:$0xff]   ;;  %v9509_v54 = vld [vmem:[%s10525_s26 + $0x2c4] ss:$48 sps:$4 sm:$0xff]  }
0x1313   :  { %3480 = vmatmul.mubr.bf16.gmra.mrb[52].mxu1 %v10602_v60  ;;  %3531 = vmatmul.mubr.bf16.gmra.mrb[52].mxu0 %v10602_v60 }
0x1314   :  { %3544 = vmatpush1.bf16.msra.mxu1 %v9429_v59  ;;  %3595 = vmatpush1.bf16.msra.mxu0 %v9432_v14  ;;  %v9512_v59 = vld [vmem:[%s10525_s26 + $0x2cc] ss:$48 sps:$4 sm:$0xff]   ;;  %v9507_v14 = vld [vmem:[%s10525_s26 + $0x2c0] ss:$48 sps:$4 sm:$0xff]  }
0x1315   :  { %3545 = vmatprep.subr.bf16.mxu1 %v9437_v61  ;;  %3596 = vmatprep.subr.bf16.mxu0 %v9440_v1  ;;  %v9510_v61 = vld [vmem:[%s10525_s26 + $0x2c8] ss:$48 sps:$4 sm:$0xff]   ;;  %v2737_v1 = vpop.permute.xlu1 %2736 }
0x1316   :  { %3571 = vmatprep.mubr.bf16.mxu1 %v9969_v0  ;;  %3622 = vmatprep.mubr.bf16.mxu0 %v9969_v0 }
0x1318   :  { %3546 = vmatpush1.bf16.msra.mxu1 %v9435_v62  ;;  %3597 = vmatpush1.bf16.msra.mxu0 %v9438_v2  ;;  %v2728_v62 = vld [vmem:[%s10573_s5] sm:$0x1] }
0x1319   :  { %3547 = vmatprep.subr.bf16.mxu1 %v9443_v58  ;;  %3598 = vmatprep.subr.bf16.mxu0 %v9446_v4  ;;  %v2739_v2 = vsel %vm1320_vm4, %v2728_v62, %v2737_v1  ;;  %v9517_v1 = vld [vmem:[%s10677_s13 + $0x60] sm:$0xff]  }
0x131a   :  { %2741 = vrot.lane.b32.xlu1 %v2739_v2, %s9978_s27  ;;  %s9998_s27 = smov 26  }
0x131b   :  { %s10865_s16 = sld [smem:[%s11310_s0 + %s9998_s27]]  }
0x131c   :  { %3548 = vmatpush1.bf16.msra.mxu1 %v9441_v5  ;;  %3599 = vmatpush1.bf16.msra.mxu0 %v9444_v6 }
0x131d   :  { %3549 = vmatprep.subr.bf16.mxu1 %v9449_v7  ;;  %3600 = vmatprep.subr.bf16.mxu0 %v9452_v10 }
0x1320   :  { %3550 = vmatpush1.bf16.msra.mxu1 %v9447_v15  ;;  %3601 = vmatpush1.bf16.msra.mxu0 %v9450_v16 }
0x1321   :  { %3551 = vmatprep.subr.bf16.mxu1 %v9455_v22  ;;  %3602 = vmatprep.subr.bf16.mxu0 %v9458_v23 }
0x1324   :  { %3552 = vmatpush1.bf16.msra.mxu1 %v9453_v25  ;;  %3603 = vmatpush1.bf16.msra.mxu0 %v9456_v9 }
0x1325   :  { %3553 = vmatprep.subr.bf16.mxu1 %v9461_v26  ;;  %3604 = vmatprep.subr.bf16.mxu0 %v9464_v27 }
0x1328   :  { %3554 = vmatpush1.bf16.msra.mxu1 %v9459_v29  ;;  %3605 = vmatpush1.bf16.msra.mxu0 %v9462_v31 }
0x1329   :  { %3641 = vmatprep.subr.bf16.mxu1 %v9467_v24  ;;  %3692 = vmatprep.subr.bf16.mxu0 %v9470_v32 }
0x132b   :  { %3572 = vmatmul.mubr.bf16.vlgmr.msra.gmra.mrb[56].mxu1 %v10587_v49  ;;  %3623 = vmatmul.mubr.bf16.vlgmr.msra.gmra.mrb[56].mxu0 %v10587_v49 }
0x132c   :  { %3642 = vmatpush1.bf16.msra.mxu1 %v9465_v35  ;;  %3693 = vmatpush1.bf16.msra.mxu0 %v9468_v37 }
0x132d   :  { %3643 = vmatprep.subr.bf16.mxu1 %v9473_v38  ;;  %3694 = vmatprep.subr.bf16.mxu0 %v9476_v39 }
0x132e   :  { %3581 = vmatprep.mubr.bf16.mxu1 %v9969_v0  ;;  %3632 = vmatprep.mubr.bf16.mxu0 %v9969_v0 }
0x1330   :  { %3644 = vmatpush1.bf16.msra.mxu1 %v9471_v40  ;;  %3695 = vmatpush1.bf16.msra.mxu0 %v9474_v33 }
0x1331   :  { %3645 = vmatprep.subr.bf16.mxu1 %v9479_v36  ;;  %3696 = vmatprep.subr.bf16.mxu0 %v9482_v41 }
0x1333   :  { %3582 = vmatmul.mubr.bf16.gmra.mrb[60].mxu1 %v10602_v60  ;;  %3633 = vmatmul.mubr.bf16.gmra.mrb[60].mxu0 %v10602_v60 }
0x1334   :  { %3646 = vmatpush1.bf16.msra.mxu1 %v9477_v8  ;;  %3697 = vmatpush1.bf16.msra.mxu0 %v9480_v55 }
0x1335   :  { %3647 = vmatprep.subr.bf16.mxu1 %v9485_v42  ;;  %3698 = vmatprep.subr.bf16.mxu0 %v9488_v43 }
0x1336   :  { %3673 = vmatprep.mubr.bf16.mxu1 %v9969_v0  ;;  %3724 = vmatprep.mubr.bf16.mxu0 %v9969_v0 }
0x1338   :  { %3648 = vmatpush1.bf16.msra.mxu1 %v9483_v44  ;;  %3699 = vmatpush1.bf16.msra.mxu0 %v9486_v13 }
0x1339   :  { %3649 = vmatprep.subr.bf16.mxu1 %v9491_v45  ;;  %3700 = vmatprep.subr.bf16.mxu0 %v9494_v46 }
0x133c   :  { %3650 = vmatpush1.bf16.msra.mxu1 %v9489_v34  ;;  %3701 = vmatpush1.bf16.msra.mxu0 %v9492_v47 }
0x133d   :  { %3651 = vmatprep.subr.bf16.mxu1 %v9497_v48  ;;  %3702 = vmatprep.subr.bf16.mxu0 %v9500_v50 }
0x1340   :  { %3652 = vmatpush1.bf16.msra.mxu1 %v9495_v51  ;;  %3703 = vmatpush1.bf16.msra.mxu0 %v9498_v53 }
0x1341   :  { %3653 = vmatprep.subr.bf16.mxu1 %v9503_v30  ;;  %3704 = vmatprep.subr.bf16.mxu0 %v9506_v63 }
0x1344   :  { %3654 = vmatpush1.bf16.msra.mxu1 %v9501_v21  ;;  %3705 = vmatpush1.bf16.msra.mxu0 %v9504_v57  ;;  %v9513_v57 = vld [vmem:[%s10677_s13 + $0x40] sm:$0xff]  }
0x1345   :  { %3655 = vmatprep.subr.bf16.mxu1 %v9509_v54  ;;  %3706 = vmatprep.subr.bf16.mxu0 %v9512_v59  ;;  %v9514_v59 = vld [vmem:[%s10677_s13 + $0x48] sm:$0xff]  }
0x1348   :  { %3656 = vmatpush1.bf16.msra.mxu1 %v9507_v14  ;;  %3707 = vmatpush1.bf16.msra.mxu0 %v9510_v61  ;;  %v9515_v14 = vld [vmem:[%s10677_s13 + $0x50] sm:$0xff]   ;;  %v9516_v61 = vld [vmem:[%s10677_s13 + $0x58] sm:$0xff]  }
0x134b   :  { %3674 = vmatmul.mubr.bf16.vlgmr.msra.gmra.mrb[64].mxu1 %v10587_v49  ;;  %3725 = vmatmul.mubr.bf16.vlgmr.msra.gmra.mrb[64].mxu0 %v10587_v49 }
0x134c   :  { %3683 = vmatprep.mubr.bf16.mxu1 %v9969_v0  ;;  %3734 = vmatprep.mubr.bf16.mxu0 %v9969_v0 }
0x1353   :  { %3684 = vmatmul.mubr.bf16.gmra.mrb[68].mxu1 %v10602_v60  ;;  %3735 = vmatmul.mubr.bf16.gmra.mrb[68].mxu0 %v10602_v60 }
0x13de   :  { %v3471_v49 = vpop.f32.mrb[48].mxu1  ;;  %v3522_v58 = vpop.f32.mrb[48].mxu0 }
0x13df   :  { %v3473_v4 = vpop.f32.mrb[49].mxu1  ;;  %v3524_v5 = vpop.f32.mrb[49].mxu0 }
0x13e0   :  { %v3475_v6 = vpop.f32.mrb[50].mxu1  ;;  %v3526_v7 = vpop.f32.mrb[50].mxu0 }
0x13e1   :  { %v3743_v10 = vpack.c.bf16 %v3475_v6, %v3471_v49  ;;  %v3831_v60 = vpack.c.bf16 %v3526_v7, %v3522_v58  ;;  %v3477_v15 = vpop.f32.mrb[51].mxu1  ;;  %v3528_v16 = vpop.f32.mrb[51].mxu0 }
0x13e2   :  { %v3745_v22 = vpack.c.bf16 %v3477_v15, %v3473_v4  ;;  %v3892_v23 = vpack.c.bf16 %v3528_v16, %v3524_v5  ;;  %v9518_v15 = vld [vmem:[%s10677_s13 + $0x68] sm:$0xff]  }
0x13e3   :  { %8750 = vmatprep.mubr.bf16.mxu1 %v3743_v10 }
0x13e4   :  { %8746 = vmatprep.subr.bf16.mxu1 %v3745_v22  ;;  %8766 = vmatprep.mubr.bf16.mxu0 %v3892_v23  ;;  %v9519_v23 = vld [vmem:[%s10677_s13 + $0x70] sm:$0xff]  }
0x13e5   :  { %8747 = vmatpush3.bf16.xpose.msra.mxu1 %v3745_v22 }
0x13e6   :  { %v3481_v25 = vpop.f32.mrb[52].mxu1  ;;  %v3532_v9 = vpop.f32.mrb[52].mxu0 }
0x13e7   :  { %v3483_v26 = vpop.f32.mrb[53].mxu1  ;;  %v3534_v27 = vpop.f32.mrb[53].mxu0  ;;  %v3744_v37 = vpack.c.bf16 %v3481_v25, %v3481_v25  ;;  %v3832_v38 = vpack.c.bf16 %v3532_v9, %v3532_v9 }
0x13e8   :  { %v3746_v29 = vpack.c.bf16 %v3483_v26, %v3483_v26  ;;  %v3485_v31 = vpop.f32.mrb[54].mxu1  ;;  %v3536_v24 = vpop.f32.mrb[54].mxu0  ;;  %v3893_v54 = vpack.c.bf16 %v3534_v27, %v3534_v27 }
0x13e9   :  { %v3486_v32 = vpop.f32.mrb[55].mxu1  ;;  %v3537_v35 = vpop.f32.mrb[55].mxu0  ;;  %v3840_v39 = vsel %vm136_vm0, %v3832_v38, 0 }
0x13ea   :  { %8748 = vmatprep.subr.bf16.mxu1 %v3746_v29  ;;  %v9520_v35 = vld [vmem:[%s10677_s13 + $0x78] sm:$0xff]  }
0x13ed   :  { %8749 = vmatpush3.bf16.xpose.msra.mxu1 %v3746_v29 }
0x13ee   :  { %8754 = vmatprep.subr.bf16.mxu1 %v3831_v60 }
0x13f4   :  { %8751 = vmatmul.mubr.bf16.vlgmr.msra.gmra.mrb[72].mxu1 %v3744_v37  ;;  %v7713_v37 = vadd.s32 4294967288, %v10238_v17 }
0x13f5   :  { %8755 = vmatpush3.bf16.msra.mxu1 %v3831_v60 }
0x13f6   :  { %9094 = vmatprep.subr.msk.bf16.mxu1 %vm136_vm0, %v3832_v38  ;;  %vm2720_vm8 = vcmp.gt.s32.totalorder %v7713_v37, 0 }
0x13f7   :  { %v2721_v38 = vsel %vm2720_vm8, %v7713_v37, 0 }
0x13f9   :  { %8757 = vmatpush3.bf16.msra.mxu1 %v3840_v39  ;;  %v2686_v39 = vadd.s32 16, %v10102_v11 }
0x13fe   :  { %v3573_v40 = vpop.f32.mrb[56].mxu1  ;;  %v10684_v33 = vpop.f32.mrb[56].mxu0 }
0x13ff   :  { %v3575_v36 = vpop.f32.mrb[57].mxu1  ;;  %v3626_v41 = vpop.f32.mrb[57].mxu0 }
0x1400   :  { %v3577_v8 = vpop.f32.mrb[58].mxu1  ;;  %v10686_v55 = vpop.f32.mrb[58].mxu0 }
0x1401   :  { %v3894_v42 = vpack.c.bf16 %v3577_v8, %v3573_v40  ;;  %v4232_v43 = vpack.c.bf16 %v10686_v55, %v10684_v33  ;;  %v3579_v44 = vpop.f32.mrb[59].mxu1  ;;  %v3630_v13 = vpop.f32.mrb[59].mxu0  ;;  %v2725_v40 = vand.u32 7, %v2721_v38  ;;  %v2722_v8 = vshra.s32 %v2721_v38, 3 }
0x1402   :  { %v10690_v45 = vpack.c.bf16 %v3579_v44, %v3575_v36  ;;  %v10692_v46 = vpack.c.bf16 %v3630_v13, %v3626_v41  ;;  %v7712_v36 = vadd.s32 4294967288, %v2686_v39  ;;  %v2695_v41 = vsel %vm2694_vm9, %v10102_v11, 0 }
0x1403   :  { %8762 = vmatprep.subr.bf16.mxu0 %v3894_v42  ;;  %v2724_v44 = vand.u32 3, %v10238_v17  ;;  %v2726_v13 = vadd.s32 4, %v2725_v40 }
0x1404   :  { %8763 = vmatpush3.bf16.xpose.msra.mxu0 %v3894_v42  ;;  %8770 = vmatprep.subr.bf16.mxu1 %v10690_v45  ;;  %v2710_v42 = vand.u32 7, %v2695_v41 }
0x1406   :  { %v3583_v34 = vpop.f32.mrb[60].mxu1  ;;  %v10695_v47 = vpop.f32.mrb[60].mxu0 }
0x1407   :  { %v3895_v48 = vpack.c.bf16 %v3583_v34, %v3583_v34  ;;  %v10697_v50 = vpop.f32.mrb[61].mxu1  ;;  %v10699_v51 = vpop.f32.mrb[61].mxu0 }
0x1408   :  { %v3587_v53 = vpop.f32.mrb[62].mxu1  ;;  %v3638_v30 = vpop.f32.mrb[62].mxu0 }
0x1409   :  { %v3588_v63 = vpop.f32.mrb[63].mxu1  ;;  %v3639_v21 = vpop.f32.mrb[63].mxu0  ;;  %8764 = vmatprep.subr.bf16.mxu0 %v3895_v48  ;;  %v2706_v53 = vand.u32 3, %v10102_v11 }
0x140a   :  { %v2742_v34 = vpop.permute.xlu1 %2741  ;;  %v2723_v63 = vsel %vm2718_vm10, %v149_v19, %v2722_v8  ;;  %v2701_v21 = vshra.s32 %v2695_v41, 3 }
0x140b   :  { %v2744_v30 = vsel %vm1320_vm4, 1.0, %v2742_v34  ;;  %vm2747_vm12 = vcmp.eq.s32.totalorder %v146_v18, %v2723_v63 }
0x140c   :  { %8765 = vmatpush3.bf16.xpose.msra.mxu0 %v3895_v48  ;;  %v2711_v48 = vand.u32 7, %v7712_v36  ;;  %vm2745_vm11 = vcmp.eq.f32.partialorder %v2744_v30, 0.0  ;;  %vm2748_vm14 = vcmp.eq.s32.totalorder %v2701_v21, %v2723_v63 }
0x140d   :  { %8778 = vmatprep.subr.bf16.mxu0 %v9513_v57 }
0x1413   :  { %8767 = vmatmul.mubr.bf16.vlgmr.msra.gmra.mrb[72].mxu0 %v3893_v54  ;;  %v2727_v54 = vsel %vm2718_vm10, %v2724_v44, %v2726_v13 }
0x1414   :  { %8779 = vmatpush3.bf16.msra.mxu0 %v9513_v57  ;;  %v2713_v57 = vadd.s32 4, %v2710_v42  ;;  %vm2750_vm13 = vcmp.le.s32.totalorder %v2727_v54, %v2706_v53 }
0x1415   :  { %8780 = vmatprep.subr.bf16.mxu0 %v9514_v59  ;;  %vm2753_vm3 = vmand %vm2747_vm12, %vm2750_vm13 }
0x1416   :  { %vm2751_vm15 = vcmp.le.s32.totalorder %v2727_v54, %v2713_v57  ;;  %v2756_v19 = vsel %vm2753_vm3, 0.0, %v9979_v20 }
0x1417   :  { %vm2754_vm4 = vmand %vm2748_vm14, %vm2751_vm15 }
0x1418   :  { %8781 = vmatpush3.bf16.msra.mxu0 %v9514_v59  ;;  %v2702_v59 = vshra.s32 %v7712_v36, 3 }
0x1419   :  { %8782 = vmatprep.subr.bf16.mxu0 %v9515_v14 }
0x141a   :  { %vm2749_vm1 = vcmp.eq.s32.totalorder %v2702_v59, %v2723_v63 }
0x141c   :  { %8783 = vmatpush3.bf16.msra.mxu0 %v9515_v14  ;;  %v2714_v14 = vadd.s32 4, %v2711_v48 }
0x141d   :  { %8784 = vmatprep.subr.bf16.mxu0 %v9516_v61 }
0x141e   :  { %v3675_v62 = vpop.f32.mrb[64].mxu1  ;;  %v3726_v2 = vpop.f32.mrb[64].mxu0  ;;  %vm2752_vm2 = vcmp.le.s32.totalorder %v2727_v54, %v2714_v14 }
0x141f   :  { %v10706_v49 = vpop.f32.mrb[65].mxu1  ;;  %v3728_v58 = vpop.f32.mrb[65].mxu0  ;;  %vm2755_vm5 = vmand %vm2749_vm1, %vm2752_vm2 }
0x1420   :  { %v3679_v4 = vpop.f32.mrb[66].mxu1  ;;  %v3730_v5 = vpop.f32.mrb[66].mxu0  ;;  %8785 = vmatpush3.bf16.msra.mxu0 %v9516_v61  ;;  %v2746_v61 = vsel %vm2745_vm11, -1e+09, %v9976_v28 }
0x1421   :  { %v10708_v6 = vpack.c.bf16 %v3679_v4, %v3675_v62  ;;  %v10710_v7 = vpack.c.bf16 %v3730_v5, %v3726_v2  ;;  %v10712_v10 = vpop.f32.mrb[67].mxu1  ;;  %v3732_v60 = vpop.f32.mrb[67].mxu0  ;;  %8786 = vmatprep.subr.bf16.mxu0 %v9517_v1  ;;  %v2762_v17 = vrot.slane %v2746_v61, %v10105_v12  ;;  %v2758_v62 = vsel %vm2755_vm5, 0.0, %v9979_v20 }
0x1422   :  { %v4479_v16 = vpack.c.bf16 %v10712_v10, %v10706_v49  ;;  %v10717_v22 = vpack.c.bf16 %v3732_v60, %v3728_v58 }
0x1423   :  { %v10747_v11 = vadd.f32 %v2762_v17, %v2756_v19  ;;  %v10751_v2 = vadd.f32 %v2762_v17, %v2758_v62 }
0x1424   :  { %8787 = vmatpush3.bf16.msra.mxu0 %v9517_v1  ;;  %v2757_v1 = vsel %vm2754_vm4, 0.0, %v9979_v20 }
0x1425   :  { %8788 = vmatprep.subr.bf16.mxu0 %v9518_v15  ;;  %v10749_v18 = vadd.f32 %v2762_v17, %v2757_v1 }
0x1426   :  { %v10720_v25 = vpop.f32.mrb[68].mxu1  ;;  %v10722_v9 = vpop.f32.mrb[68].mxu0 }
0x1427   :  { %v10724_v26 = vpop.f32.mrb[69].mxu1  ;;  %v10726_v27 = vpop.f32.mrb[69].mxu0 }
0x1428   :  { %v3689_v29 = vpop.f32.mrb[70].mxu1  ;;  %v3740_v31 = vpop.f32.mrb[70].mxu0  ;;  %8789 = vmatpush3.bf16.msra.mxu0 %v9518_v15  ;;  %v4480_v33 = vpack.c.bf16 %v10724_v26, %v10724_v26  ;;  %v4567_v55 = vpack.c.bf16 %v10726_v27, %v10726_v27 }
0x1429   :  { %v3690_v24 = vpop.f32.mrb[71].mxu1  ;;  %v3741_v32 = vpop.f32.mrb[71].mxu0  ;;  %8790 = vmatprep.subr.bf16.mxu0 %v9519_v23 }
0x142c   :  { %8791 = vmatpush3.bf16.msra.mxu0 %v9519_v23 }
0x142d   :  { %8792 = vmatprep.subr.bf16.mxu0 %v9520_v35 }
0x1430   :  { %8793 = vmatpush3.bf16.msra.mxu0 %v9520_v35 }
0x1431   :  { %8818 = vmatprep.subr.bf16.mxu0 %v10692_v46 }
0x14c7   :  { %v8752_v58 = vpop.f32.mrb[72].mxu1 }
0x14c8   :  { %v3781_v4 = vpop.f32.mrb[73].mxu1  ;;  %v3790_v12 = vadd.f32 %v8752_v58, %v10751_v2 }
0x14c9   :  { %v3782_v28 = vadd.f32 %v3781_v4, %v10747_v11  ;;  %v8753_v5 = vpop.f32.mrb[74].mxu1 }
0x14ca   :  { %v3784_v60 = vpop.f32.mrb[75].mxu1  ;;  %v3802_v29 = vsel %vm3795_vm6, %v3790_v12, -inf }
0x14cb   :  { %v3785_v15 = vadd.f32 %v3784_v60, %v10749_v18  ;;  %v3796_v23 = vsel %vm3795_vm6, %v3782_v28, -inf }
0x14cc   :  { %3797 = vmax.xlane.f32.xlu0 %v3796_v23 }
0x14cd   :  { %v3799_v20 = vsel %vm3795_vm6, %v3785_v15, -inf }
0x14ce   :  { %3800 = vmax.xlane.f32.xlu1 %v3799_v20 }
0x14d0   :  { %3803 = vmax.xlane.f32.xlu0 %v3802_v29 }
0x14e6   :  { %v8768_v31 = vpop.f32.mrb[72].mxu0 }
0x14e7   :  { %v3930_v24 = vpop.f32.mrb[73].mxu0  ;;  %v3939_v40 = vadd.f32 %v8768_v31, %v10751_v2 }
0x14e8   :  { %v3931_v32 = vadd.f32 %v3930_v24, %v10747_v11  ;;  %v8769_v35 = vpop.f32.mrb[74].mxu0 }
0x14e9   :  { %v3933_v37 = vpop.f32.mrb[75].mxu0  ;;  %v3950_v41 = vsel %vm3795_vm6, %v3939_v40, -inf }
0x14ea   :  { %v3934_v38 = vadd.f32 %v3933_v37, %v10749_v18  ;;  %v3944_v39 = vsel %vm3795_vm6, %v3931_v32, -inf }
0x14eb   :  { %3945 = vmax.xlane.f32.xlu0 %v3944_v39 }
0x14ec   :  { %v3947_v36 = vsel %vm3795_vm6, %v3934_v38, -inf }
0x14ef   :  { %3948 = vmax.xlane.f32.xlu0 %v3947_v36 }
0x14f3   :  { %3951 = vmax.xlane.f32.xlu0 %v3950_v41 }
0x1559   :  { %v3798_v8 = vpop.xlane.xlu0 %3797 }
0x155a   :  { %v3805_v42 = vsub.f32 %v3782_v28, %v3798_v8 }
0x155b   :  { %v3801_v44 = vpop.xlane.xlu1 %3800 }
0x155c   :  { %v3808_v48 = vmul.f32 1.442695, %v3805_v42  ;;  %v3806_v53 = vsub.f32 %v3785_v15, %v3801_v44  ;;  %v3980_v44 = vpack.c.bf16 %v10697_v50, %v10697_v50 }
0x155d   :  { %v3804_v13 = vpop.xlane.xlu0 %3803 }
0x155e   :  { %v3807_v34 = vsub.f32 %v3790_v12, %v3804_v13  ;;  %v3810_v63 = vmul.f32 1.442695, %v3806_v53 }
0x1560   :  { %v3812_v30 = vmul.f32 1.442695, %v3807_v34  ;;  %v9521_v34 = vld [vmem:[%s10677_s13] sm:$0xff]  }
0x1562   :  { %9825 = vpow2.f32 %v3812_v30 }
0x1563   :  { %9827 = vpow2.f32 %v3808_v48  ;;  %v3988_v48 = vsel %vm136_vm0, %v3980_v44, 0 }
0x1564   :  { %9829 = vpow2.f32 %v3810_v63 }
0x156c   :  { %v9826_v21 = vpop.eup %9825 }
0x156d   :  { %v3820_v57 = vsel %vm3795_vm6, %v9826_v21, 0.0  ;;  %v9828_v54 = vpop.eup %9827 }
0x156e   :  { %3821 = vadd.xlane.f32.xlu0 %v3820_v57  ;;  %v3814_v59 = vsel %vm3795_vm6, %v9828_v54, 0.0  ;;  %v9830_v14 = vpop.eup %9829 }
0x156f   :  { %v3817_v61 = vsel %vm3795_vm6, %v9830_v14, 0.0 }
0x1572   :  { %3815 = vadd.xlane.f32.xlu0 %v3814_v59 }
0x1576   :  { %3818 = vadd.xlane.f32.xlu0 %v3817_v61  ;;  %v9522_v61 = vld [vmem:[%s10677_s13 + $0x8] sm:$0xff]  }
0x1578   :  { %v3946_v17 = vpop.xlane.xlu0 %3945 }
0x1579   :  { %v3953_v19 = vsub.f32 %v3931_v32, %v3946_v17  ;;  %v9523_v17 = vld [vmem:[%s10677_s13 + $0x10] sm:$0xff]  }
0x157b   :  { %v3956_v1 = vmul.f32 1.442695, %v3953_v19  ;;  %v9524_v19 = vld [vmem:[%s10677_s13 + $0x18] sm:$0xff]  }
0x157c   :  { %v3949_v62 = vpop.xlane.xlu0 %3948 }
0x157d   :  { %9831 = vpow2.f32 %v3956_v1  ;;  %v3954_v58 = vsub.f32 %v3934_v38, %v3949_v62  ;;  %v9525_v1 = vld [vmem:[%s10677_s13 + $0x20] sm:$0xff]   ;;  %v9526_v62 = vld [vmem:[%s10677_s13 + $0x28] sm:$0xff]  }
0x157f   :  { %v3958_v4 = vmul.f32 1.442695, %v3954_v58  ;;  %v9527_v58 = vld [vmem:[%s10677_s13 + $0x30] sm:$0xff]  }
0x1580   :  { %v3952_v28 = vpop.xlane.xlu0 %3951 }
0x1581   :  { %9833 = vpow2.f32 %v3958_v4  ;;  %v3955_v5 = vsub.f32 %v3939_v40, %v3952_v28  ;;  %v9528_v4 = vld [vmem:[%s10677_s13 + $0x38] sm:$0xff]  }
0x1583   :  { %v3960_v60 = vmul.f32 1.442695, %v3955_v5 }
0x1585   :  { %9835 = vpow2.f32 %v3960_v60 }
0x1587   :  { %v9832_v12 = vpop.eup %9831 }
0x1588   :  { %v3962_v15 = vsel %vm3795_vm6, %v9832_v12, 0.0 }
0x1589   :  { %3963 = vadd.xlane.f32.xlu0 %v3962_v15 }
0x158b   :  { %v9834_v23 = vpop.eup %9833 }
0x158c   :  { %v3965_v20 = vsel %vm3795_vm6, %v9834_v23, 0.0 }
0x158d   :  { %3966 = vadd.xlane.f32.xlu0 %v3965_v20  ;;  %v4320_v20 = vpack.c.bf16 %v10720_v25, %v10720_v25  ;;  %v4482_v25 = vpack.c.bf16 %v10722_v9, %v10722_v9 }
0x158f   :  { %v9836_v29 = vpop.eup %9835 }
0x1590   :  { %v3968_v31 = vsel %vm3795_vm6, %v9836_v29, 0.0 }
0x1591   :  { %3969 = vadd.xlane.f32.xlu1 %v3968_v31 }
0x15fb   :  { %v3822_v24 = vpop.xlane.xlu0 %3821 }
0x15fc   :  { %9837 = vrcp.f32 %v3822_v24 }
0x15ff   :  { %v3816_v32 = vpop.xlane.xlu0 %3815 }
0x1600   :  { %9839 = vrcp.f32 %v3816_v32 }
0x1603   :  { %v3819_v35 = vpop.xlane.xlu0 %3818 }
0x1604   :  { %9841 = vrcp.f32 %v3819_v35 }
0x1606   :  { %v9838_v37 = vpop.eup %9837 }
0x1607   :  { %v3828_v40 = vmul.f32 %v9838_v37, %v9826_v21 }
0x1609   :  { %v3830_v42 = vpack.c.bf16 %v3828_v40, %v3828_v40 }
0x160a   :  { %v9840_v38 = vpop.eup %9839 }
0x160b   :  { %v3826_v36 = vmul.f32 %v9840_v38, %v9828_v54 }
0x160e   :  { %v9842_v39 = vpop.eup %9841 }
0x160f   :  { %v3827_v41 = vmul.f32 %v9842_v39, %v9830_v14  ;;  %v4235_v39 = vpack.c.bf16 %v10699_v51, %v10699_v51 }
0x1611   :  { %v3829_v8 = vpack.c.bf16 %v3827_v41, %v3826_v36 }
0x1613   :  { %8758 = vmatprep.mubr.msk.bf16.mxu1 %vm3795_vm6, %v3829_v8 }
0x1614   :  { %8759 = vmatmul.mubr.msk.bf16.vlgmr.msra.gmra.mrb[76].mxu1 %vm3795_vm6, %v3830_v42 }
0x1615   :  { %8771 = vmatpush3.bf16.msra.mxu1 %v10690_v45 }
0x1616   :  { %9095 = vmatprep.subr.msk.bf16.mxu1 %vm136_vm0, %v3980_v44  ;;  %v3964_v13 = vpop.xlane.xlu0 %3963 }
0x1617   :  { %9843 = vrcp.f32 %v3964_v13 }
0x1619   :  { %8773 = vmatpush3.bf16.msra.mxu1 %v3988_v48 }
0x161a   :  { %v3967_v53 = vpop.xlane.xlu0 %3966  ;;  %8798 = vmatprep.subr.bf16.mxu1 %v9521_v34 }
0x161b   :  { %9845 = vrcp.f32 %v3967_v53 }
0x161e   :  { %v3970_v30 = vpop.xlane.xlu1 %3969 }
0x161f   :  { %9847 = vrcp.f32 %v3970_v30 }
0x1621   :  { %v9844_v50 = vpop.eup %9843 }
0x1622   :  { %v3974_v21 = vmul.f32 %v9844_v50, %v9832_v12 }
0x1625   :  { %v9846_v63 = vpop.eup %9845 }
0x1626   :  { %v3975_v45 = vmul.f32 %v9846_v63, %v9834_v23 }
0x1628   :  { %v3977_v57 = vpack.c.bf16 %v3975_v45, %v3974_v21 }
0x1629   :  { %v9848_v54 = vpop.eup %9847 }
0x162a   :  { %v3976_v59 = vmul.f32 %v9848_v54, %v9836_v29  ;;  %8774 = vmatprep.mubr.msk.bf16.mxu1 %vm3795_vm6, %v3977_v57  ;;  %v4328_v29 = vsel %vm136_vm0, %v4320_v20, 0 }
0x162c   :  { %v3978_v14 = vpack.c.bf16 %v3976_v59, %v3976_v59 }
0x162e   :  { %8775 = vmatmul.mubr.msk.bf16.vlgmr.msra.gmra.mrb[80].mxu1 %vm3795_vm6, %v3978_v14 }
0x162f   :  { %8799 = vmatpush3.bf16.msra.mxu1 %v9521_v34 }
0x1630   :  { %8800 = vmatprep.subr.bf16.mxu1 %v9522_v61 }
0x1633   :  { %8801 = vmatpush3.bf16.msra.mxu1 %v9522_v61 }
0x1634   :  { %8802 = vmatprep.subr.bf16.mxu1 %v9523_v17 }
0x1637   :  { %8803 = vmatpush3.bf16.msra.mxu1 %v9523_v17 }
0x1638   :  { %8804 = vmatprep.subr.bf16.mxu1 %v9524_v19 }
0x163b   :  { %8805 = vmatpush3.bf16.msra.mxu1 %v9524_v19 }
0x163c   :  { %8806 = vmatprep.subr.bf16.mxu1 %v9525_v1 }
0x163f   :  { %8807 = vmatpush3.bf16.msra.mxu1 %v9525_v1 }
0x1640   :  { %8808 = vmatprep.subr.bf16.mxu1 %v9526_v62 }
0x1643   :  { %8809 = vmatpush3.bf16.msra.mxu1 %v9526_v62 }
0x1644   :  { %8810 = vmatprep.subr.bf16.mxu1 %v9527_v58 }
0x1647   :  { %8811 = vmatpush3.bf16.msra.mxu1 %v9527_v58 }
0x1648   :  { %8812 = vmatprep.subr.bf16.mxu1 %v9528_v4 }
0x164b   :  { %8813 = vmatpush3.bf16.msra.mxu1 %v9528_v4 }
0x164c   :  { %8826 = vmatprep.subr.bf16.mxu1 %v10708_v6 }
0x16e7   :  { %v8760_v28 = vpop.f32.mrb[76].mxu1 }
0x16e8   :  { %v3876_v5 = vpop.f32.mrb[77].mxu1  ;;  %v3891_v23 = vpack.c.bf16 %v8760_v28, %v8760_v28 }
0x16e9   :  { %v8761_v60 = vpop.f32.mrb[78].mxu1 }
0x16ea   :  { %v3879_v12 = vpop.f32.mrb[79].mxu1 }
0x16eb   :  { %v3890_v15 = vpack.c.bf16 %v3879_v12, %v3876_v5 }
0x16ed   :  { %8814 = vmatprep.mubr.bf16.mxu1 %v3890_v15 }
0x16ee   :  { %8815 = vmatmul.mubr.bf16.vlgmr.msra.gmra.mrb[84].mxu1 %v3891_v23 }
0x16ef   :  { %8827 = vmatpush3.bf16.msra.mxu1 %v10708_v6  ;;  %v4233_v6 = vpack.c.bf16 %v10695_v47, %v10695_v47 }
0x16f0   :  { %9096 = vmatprep.subr.msk.bf16.mxu1 %vm136_vm0, %v4320_v20 }
0x16f3   :  { %8829 = vmatpush3.bf16.msra.mxu1 %v4328_v29 }
0x1701   :  { %v8776_v31 = vpop.f32.mrb[80].mxu1 }
0x1702   :  { %v4024_v24 = vpop.f32.mrb[81].mxu1  ;;  %v4039_v38 = vpack.c.bf16 %v8776_v31, %v8776_v31 }
0x1703   :  { %v8777_v32 = vpop.f32.mrb[82].mxu1 }
0x1704   :  { %v4027_v35 = vpop.f32.mrb[83].mxu1 }
0x1705   :  { %v4038_v37 = vpack.c.bf16 %v4027_v35, %v4024_v24 }
0x1707   :  { %8794 = vmatprep.mubr.bf16.mxu0 %v4038_v37 }
0x1708   :  { %8795 = vmatmul.mubr.bf16.vlgmr.msra.gmra.mrb[76].mxu0 %v4039_v38 }
0x1709   :  { %8819 = vmatpush3.bf16.xpose.msra.mxu0 %v10692_v46  ;;  %8822 = vmatprep.mubr.bf16.mxu0 %v4232_v43  ;;  %v4575_v43 = vsel %vm136_vm0, %v4567_v55, 0 }
0x170a   :  { %8820 = vmatprep.subr.bf16.mxu0 %v4235_v39 }
0x1711   :  { %8821 = vmatpush3.bf16.xpose.msra.mxu0 %v4235_v39 }
0x1712   :  { %8854 = vmatprep.subr.bf16.mxu0 %v10710_v7 }
0x1718   :  { %8823 = vmatmul.mubr.bf16.vlgmr.msra.gmra.mrb[80].mxu0 %v4233_v6 }
0x1719   :  { %8855 = vmatpush3.bf16.xpose.msra.mxu0 %v10710_v7  ;;  %8858 = vmatprep.mubr.bf16.mxu0 %v4479_v16 }
0x171a   :  { %8856 = vmatprep.subr.bf16.mxu0 %v4482_v25 }
0x1721   :  { %8857 = vmatpush3.bf16.xpose.msra.mxu0 %v4482_v25 }
0x1722   :  { %8862 = vmatprep.subr.bf16.mxu0 %v10717_v22 }
0x1728   :  { %8859 = vmatmul.mubr.bf16.vlgmr.msra.gmra.mrb[84].mxu0 %v4480_v33 }
0x1729   :  { %8863 = vmatpush3.bf16.msra.mxu0 %v10717_v22 }
0x172a   :  { %9097 = vmatprep.subr.msk.bf16.mxu0 %vm136_vm0, %v4567_v55 }
0x172d   :  { %8865 = vmatpush3.bf16.msra.mxu0 %v4575_v43 }
0x17c1   :  { %v8816_v46 = vpop.f32.mrb[84].mxu1 }
0x17c2   :  { %v4218_v47 = vpop.f32.mrb[85].mxu1 }
0x17c3   :  { %v8817_v51 = vpop.f32.mrb[86].mxu1 }
0x17c4   :  { %v4221_v49 = vpop.f32.mrb[87].mxu1 }
0x17db   :  { %v8796_v7 = vpop.f32.mrb[76].mxu0 }
0x17dc   :  { %v10817_v10 = vadd.f32 %v8816_v46, %v8796_v7  ;;  %v4122_v16 = vpop.f32.mrb[77].mxu0  ;;  %v9529_v7 = vld [vmem:[%s10677_s13 + $0x80] sm:$0xff]  }
0x17dd   :  { %v10819_v9 = vadd.f32 %v4218_v47, %v4122_v16  ;;  %v8797_v26 = vpop.f32.mrb[78].mxu0  ;;  %v9534_v16 = vld [vmem:[%s10677_s13 + $0xc0] sm:$0xff]   ;;  %8834 = vmatprep.subr.bf16.mxu1 %v9529_v7 }
0x17de   :  { %v4125_v27 = vpop.f32.mrb[79].mxu0  ;;  %8870 = vmatprep.subr.bf16.mxu0 %v9534_v16 }
0x17df   :  { %v10821_v40 = vadd.f32 %v4221_v49, %v4125_v27 }
0x17eb   :  { %v8824_v22 = vpop.f32.mrb[80].mxu0 }
0x17ec   :  { %v4279_v36 = vadd.f32 %v8824_v22, %v10751_v2  ;;  %v4270_v41 = vpop.f32.mrb[81].mxu0 }
0x17ed   :  { %v8825_v8 = vpop.f32.mrb[82].mxu0  ;;  %v4271_v42 = vadd.f32 %v4270_v41, %v10747_v11 }
0x17ee   :  { %v4273_v44 = vpop.f32.mrb[83].mxu0  ;;  %v4290_v13 = vsel %vm3795_vm6, %v4279_v36, -inf }
0x17ef   :  { %v4274_v34 = vadd.f32 %v4273_v44, %v10749_v18  ;;  %4291 = vmax.xlane.f32.xlu0 %v4290_v13  ;;  %v4284_v53 = vsel %vm3795_vm6, %v4271_v42, -inf }
0x17f1   :  { %v4287_v48 = vsel %vm3795_vm6, %v4274_v34, -inf }
0x17f2   :  { %4288 = vmax.xlane.f32.xlu1 %v4287_v48 }
0x17f3   :  { %4285 = vmax.xlane.f32.xlu0 %v4284_v53 }
0x17fb   :  { %v8860_v30 = vpop.f32.mrb[84].mxu0 }
0x17fc   :  { %v4517_v50 = vpop.f32.mrb[85].mxu0  ;;  %v4526_v57 = vadd.f32 %v8860_v30, %v10751_v2 }
0x17fd   :  { %v4518_v63 = vadd.f32 %v4517_v50, %v10747_v11  ;;  %v8861_v21 = vpop.f32.mrb[86].mxu0  ;;  %v9530_v50 = vld [vmem:[%s10677_s13 + $0x88] sm:$0xff]  }
0x17fe   :  { %v4520_v45 = vpop.f32.mrb[87].mxu0  ;;  %v4537_v61 = vsel %vm3795_vm6, %v4526_v57, -inf  ;;  %v9531_v21 = vld [vmem:[%s10677_s13 + $0x90] sm:$0xff]  }
0x17ff   :  { %v4521_v54 = vadd.f32 %v4520_v45, %v10749_v18  ;;  %v4531_v59 = vsel %vm3795_vm6, %v4518_v63, -inf  ;;  %v9532_v45 = vld [vmem:[%s10677_s13 + $0x98] sm:$0xff]  }
0x1800   :  { %4532 = vmax.xlane.f32.xlu1 %v4531_v59 }
0x1801   :  { %v4534_v14 = vsel %vm3795_vm6, %v4521_v54, -inf }
0x1802   :  { %4535 = vmax.xlane.f32.xlu0 %v4534_v14 }
0x1804   :  { %4538 = vmax.xlane.f32.xlu1 %v4537_v61  ;;  %v9533_v61 = vld [vmem:[%s10677_s13 + $0xa0] sm:$0xff]  }
0x187c   :  { %v4292_v17 = vpop.xlane.xlu0 %4291 }
0x187d   :  { %v4295_v19 = vsub.f32 %v4279_v36, %v4292_v17 }
0x187f   :  { %v4300_v1 = vmul.f32 1.442695, %v4295_v19  ;;  %v4289_v62 = vpop.xlane.xlu1 %4288 }
0x1880   :  { %v4294_v58 = vsub.f32 %v4274_v34, %v4289_v62  ;;  %v4286_v4 = vpop.xlane.xlu0 %4285 }
0x1881   :  { %9849 = vpow2.f32 %v4300_v1  ;;  %v4293_v28 = vsub.f32 %v4271_v42, %v4286_v4  ;;  %v9536_v4 = vld [vmem:[%s10677_s13 + $0xc8] sm:$0xff]  }
0x1882   :  { %v4298_v5 = vmul.f32 1.442695, %v4294_v58  ;;  %v9535_v58 = vld [vmem:[%s10677_s13 + $0xa8] sm:$0xff]  }
0x1883   :  { %v4296_v60 = vmul.f32 1.442695, %v4293_v28  ;;  %v9537_v28 = vld [vmem:[%s10677_s13 + $0xb0] sm:$0xff]  }
0x1884   :  { %9851 = vpow2.f32 %v4298_v5  ;;  %v9538_v5 = vld [vmem:[%s10677_s13 + $0xd0] sm:$0xff]  }
0x1885   :  { %9853 = vpow2.f32 %v4296_v60  ;;  %v9539_v60 = vld [vmem:[%s10677_s13 + $0xb8] sm:$0xff]  }
0x188b   :  { %v9850_v12 = vpop.eup %9849 }
0x188c   :  { %v4308_v15 = vsel %vm3795_vm6, %v9850_v12, 0.0 }
0x188d   :  { %v4533_v23 = vpop.xlane.xlu1 %4532  ;;  %4309 = vadd.xlane.f32.xlu0 %v4308_v15  ;;  %v9541_v15 = vld [vmem:[%s10677_s13 + $0xe0] sm:$0xff]  }
0x188e   :  { %v9852_v20 = vpop.eup %9851  ;;  %v4540_v29 = vsub.f32 %v4518_v63, %v4533_v23  ;;  %v9542_v23 = vld [vmem:[%s10677_s13 + $0xe8] sm:$0xff]  }
0x188f   :  { %v9854_v31 = vpop.eup %9853  ;;  %v4536_v24 = vpop.xlane.xlu0 %4535  ;;  %v4305_v32 = vsel %vm3795_vm6, %v9852_v20, 0.0 }
0x1890   :  { %v4543_v35 = vmul.f32 1.442695, %v4540_v29  ;;  %v4541_v37 = vsub.f32 %v4521_v54, %v4536_v24  ;;  %4306 = vadd.xlane.f32.xlu1 %v4305_v32  ;;  %v4302_v38 = vsel %vm3795_vm6, %v9854_v31, 0.0  ;;  %v9544_v29 = vld [vmem:[%s10677_s13 + $0xf8] sm:$0xff]  }
0x1891   :  { %v4539_v39 = vpop.xlane.xlu1 %4538  ;;  %4303 = vadd.xlane.f32.xlu0 %v4302_v38 }
0x1892   :  { %9855 = vpow2.f32 %v4543_v35  ;;  %v4545_v6 = vmul.f32 1.442695, %v4541_v37  ;;  %v4542_v25 = vsub.f32 %v4526_v57, %v4539_v39 }
0x1894   :  { %9857 = vpow2.f32 %v4545_v6  ;;  %v4547_v33 = vmul.f32 1.442695, %v4542_v25 }
0x1896   :  { %9859 = vpow2.f32 %v4547_v33 }
0x189c   :  { %v9856_v55 = vpop.eup %9855 }
0x189d   :  { %v4549_v43 = vsel %vm3795_vm6, %v9856_v55, 0.0 }
0x189e   :  { %v9858_v46 = vpop.eup %9857  ;;  %4550 = vadd.xlane.f32.xlu1 %v4549_v43 }
0x189f   :  { %v4552_v47 = vsel %vm3795_vm6, %v9858_v46, 0.0 }
0x18a0   :  { %v9860_v51 = vpop.eup %9859  ;;  %4553 = vadd.xlane.f32.xlu0 %v4552_v47  ;;  %v9547_v47 = vld [vmem:[%s10865_s16 + $0x4] ss:$8 sps:$4 sm:$0xff]  }
0x18a1   :  { %v4555_v49 = vsel %vm3795_vm6, %v9860_v51, 0.0 }
0x18a2   :  { %4556 = vadd.xlane.f32.xlu1 %v4555_v49  ;;  %v9548_v49 = vld [vmem:[%s10865_s16 + $0x10] ss:$8 sps:$4 sm:$0xff]  }
0x191a   :  { %v4310_v26 = vpop.xlane.xlu0 %4309 }
0x191b   :  { %9861 = vrcp.f32 %v4310_v26 }
0x191d   :  { %v4307_v27 = vpop.xlane.xlu1 %4306 }
0x191e   :  { %9863 = vrcp.f32 %v4307_v27  ;;  %v4304_v22 = vpop.xlane.xlu0 %4303 }
0x191f   :  { %9865 = vrcp.f32 %v4304_v22 }
0x1925   :  { %v9862_v36 = vpop.eup %9861 }
0x1926   :  { %v4316_v42 = vmul.f32 %v9862_v36, %v9850_v12  ;;  %v9540_v12 = vld [vmem:[%s10677_s13 + $0xd8] sm:$0xff]  }
0x1928   :  { %v9864_v41 = vpop.eup %9863  ;;  %v4318_v30 = vpack.c.bf16 %v4316_v42, %v4316_v42 }
0x1929   :  { %v9866_v8 = vpop.eup %9865  ;;  %v4315_v44 = vmul.f32 %v9864_v41, %v9852_v20  ;;  %v9543_v20 = vld [vmem:[%s10677_s13 + $0xf0] sm:$0xff]  }
0x192a   :  { %v4314_v13 = vmul.f32 %v9866_v8, %v9854_v31 }
0x192b   :  { %v4551_v34 = vpop.xlane.xlu1 %4550 }
0x192c   :  { %9867 = vrcp.f32 %v4551_v34  ;;  %v4317_v48 = vpack.c.bf16 %v4315_v44, %v4314_v13 }
0x192d   :  { %v4554_v53 = vpop.xlane.xlu0 %4553 }
0x192e   :  { %9869 = vrcp.f32 %v4554_v53  ;;  %8830 = vmatprep.mubr.msk.bf16.mxu1 %vm3795_vm6, %v4317_v48 }
0x192f   :  { %v4557_v63 = vpop.xlane.xlu1 %4556  ;;  %8831 = vmatmul.mubr.msk.bf16.vlgmr.msra.gmra.mrb[88].mxu1 %vm3795_vm6, %v4318_v30 }
0x1930   :  { %9871 = vrcp.f32 %v4557_v63  ;;  %8835 = vmatpush3.bf16.msra.mxu1 %v9529_v7  ;;  %v9553_v7 = vld [vmem:[%s10865_s16 + $0x24] ss:$8 sps:$4 sm:$0xff]  }
0x1931   :  { %8836 = vmatprep.subr.bf16.mxu1 %v9530_v50 }
0x1934   :  { %8837 = vmatpush3.bf16.msra.mxu1 %v9530_v50 }
0x1935   :  { %8838 = vmatprep.subr.bf16.mxu1 %v9531_v21 }
0x1936   :  { %v9868_v57 = vpop.eup %9867 }
0x1937   :  { %v4561_v59 = vmul.f32 %v9868_v57, %v9856_v55  ;;  %v9557_v57 = vld [vmem:[%s10865_s16 + $0x40] ss:$8 sps:$4 sm:$0xff]  }
0x1938   :  { %v9870_v54 = vpop.eup %9869  ;;  %8839 = vmatpush3.bf16.msra.mxu1 %v9531_v21  ;;  %v9556_v21 = vld [vmem:[%s10865_s16 + $0x34] ss:$8 sps:$4 sm:$0xff]  }
0x1939   :  { %v4562_v14 = vmul.f32 %v9870_v54, %v9858_v46  ;;  %8840 = vmatprep.subr.bf16.mxu1 %v9532_v45  ;;  %v9545_v46 = vld [vmem:[%s10865_s16] ss:$8 sps:$4 sm:$0xff]   ;;  %v9560_v54 = vld [vmem:[%s10865_s16 + $0x50] ss:$8 sps:$4 sm:$0xff]  }
0x193a   :  { %v9872_v17 = vpop.eup %9871 }
0x193b   :  { %v4563_v19 = vmul.f32 %v9872_v17, %v9860_v51  ;;  %v4564_v1 = vpack.c.bf16 %v4562_v14, %v4561_v59  ;;  %v9550_v51 = vld [vmem:[%s10865_s16 + $0x14] ss:$8 sps:$4 sm:$0xff]   ;;  %v9565_v14 = vld [vmem:[%s10865_s16 + $0x64] ss:$8 sps:$4 sm:$0xff]  }
0x193c   :  { %8841 = vmatpush3.bf16.msra.mxu1 %v9532_v45  ;;  %v9554_v45 = vld [vmem:[%s10865_s16 + $0x30] ss:$8 sps:$4 sm:$0xff]   ;;  %v9562_v59 = vld [vmem:[%s10865_s16 + $0x54] ss:$8 sps:$4 sm:$0xff]  }
0x193d   :  { %8866 = vmatprep.mubr.msk.bf16.mxu0 %vm3795_vm6, %v4564_v1  ;;  %v4565_v62 = vpack.c.bf16 %v4563_v19, %v4563_v19  ;;  %8842 = vmatprep.subr.bf16.mxu1 %v9533_v61  ;;  %v9568_v17 = vld [vmem:[%s10865_s16 + $0x74] ss:$8 sps:$4 sm:$0xff]   ;;  %v9566_v19 = vld [vmem:[%s10865_s16 + $0x70] ss:$8 sps:$4 sm:$0xff]  }
0x193f   :  { %8867 = vmatmul.mubr.msk.bf16.vlgmr.msra.gmra.mrb[88].mxu0 %vm3795_vm6, %v4565_v62 }
0x1940   :  { %8843 = vmatpush3.bf16.msra.mxu1 %v9533_v61  ;;  %8871 = vmatpush3.bf16.msra.mxu0 %v9534_v16  ;;  %v9551_v16 = vld [vmem:[%s10865_s16 + $0x20] ss:$8 sps:$4 sm:$0xff]  }
0x1941   :  { %8844 = vmatprep.subr.bf16.mxu1 %v9535_v58  ;;  %8872 = vmatprep.subr.bf16.mxu0 %v9536_v4  ;;  %v9563_v61 = vld [vmem:[%s10865_s16 + $0x60] ss:$8 sps:$4 sm:$0xff]  }
0x1944   :  { %8845 = vmatpush3.bf16.msra.mxu1 %v9535_v58  ;;  %8873 = vmatpush3.bf16.msra.mxu0 %v9536_v4 }
0x1945   :  { %8846 = vmatprep.subr.bf16.mxu1 %v9537_v28  ;;  %8874 = vmatprep.subr.bf16.mxu0 %v9538_v5 }
0x1948   :  { %8847 = vmatpush3.bf16.msra.mxu1 %v9537_v28  ;;  %8875 = vmatpush3.bf16.msra.mxu0 %v9538_v5 }
0x1949   :  { %8848 = vmatprep.subr.bf16.mxu1 %v9539_v60  ;;  %8876 = vmatprep.subr.bf16.mxu0 %v9540_v12 }
0x194c   :  { %8849 = vmatpush3.bf16.msra.mxu1 %v9539_v60  ;;  %8877 = vmatpush3.bf16.msra.mxu0 %v9540_v12 }
0x194d   :  { %8878 = vmatprep.subr.bf16.mxu0 %v9541_v15  ;;  %4856 = vmatprep.subr.bf16.mxu1 %v9547_v47  ;;  %v9573_v47 = vld [vmem:[%s10915_s24 + $0x20] sm:$0xff]  }
0x1950   :  { %8879 = vmatpush3.bf16.msra.mxu0 %v9541_v15 }
0x1951   :  { %8880 = vmatprep.subr.bf16.mxu0 %v9542_v23 }
0x1954   :  { %8881 = vmatpush3.bf16.msra.mxu0 %v9542_v23 }
0x1955   :  { %8882 = vmatprep.subr.bf16.mxu0 %v9543_v20 }
0x1958   :  { %8883 = vmatpush3.bf16.msra.mxu0 %v9543_v20 }
0x1959   :  { %8884 = vmatprep.subr.bf16.mxu0 %v9544_v29 }
0x195c   :  { %8885 = vmatpush3.bf16.msra.mxu0 %v9544_v29 }
0x1a02   :  { %v8832_v31 = vpop.f32.mrb[88].mxu1 }
0x1a03   :  { %v4364_v24 = vpop.f32.mrb[89].mxu1  ;;  %v4379_v38 = vpack.c.bf16 %v8832_v31, %v8832_v31  ;;  %v7853_v31 = vld [vmem:[%s10904_s20] ss:$0 sm:$0xff] }
0x1a04   :  { %v8833_v32 = vpop.f32.mrb[90].mxu1 }
0x1a05   :  { %v4367_v35 = vpop.f32.mrb[91].mxu1 }
0x1a06   :  { %v4378_v37 = vpack.c.bf16 %v4367_v35, %v4364_v24 }
0x1a08   :  { %8850 = vmatprep.mubr.bf16.mxu1 %v4378_v37 }
0x1a09   :  { %8851 = vmatmul.mubr.bf16.vlgmr.msra.gmra.mrb[92].mxu1 %v4379_v38 }
0x1a0a   :  { %4888 = vmatprep.mubr.bf16.mxu1 %v9969_v0  ;;  %4857 = vmatpush1.bf16.msra.mxu1 %v9545_v46  ;;  %v9572_v46 = vld [vmem:[%s10915_s24 + $0x18] sm:$0xff]  }
0x1a0b   :  { %4858 = vmatprep.subr.bf16.mxu1 %v9550_v51  ;;  %v9574_v51 = vld [vmem:[%s10915_s24 + $0x28] sm:$0xff]  }
0x1a0e   :  { %4859 = vmatpush1.bf16.msra.mxu1 %v9548_v49  ;;  %v9575_v49 = vld [vmem:[%s10915_s24 + $0x30] sm:$0xff]  }
0x1a0f   :  { %4860 = vmatprep.subr.bf16.mxu1 %v9553_v7  ;;  %v9576_v7 = vld [vmem:[%s10915_s24 + $0x38] sm:$0xff]  }
0x1a12   :  { %v8868_v39 = vpop.f32.mrb[88].mxu0  ;;  %4861 = vmatpush1.bf16.msra.mxu1 %v9551_v16 }
0x1a13   :  { %v4611_v6 = vpop.f32.mrb[89].mxu0  ;;  %v4626_v43 = vpack.c.bf16 %v8868_v39, %v8868_v39  ;;  %4862 = vmatprep.subr.bf16.mxu1 %v9556_v21 }
0x1a14   :  { %v8869_v25 = vpop.f32.mrb[90].mxu0 }
0x1a15   :  { %v4614_v33 = vpop.f32.mrb[91].mxu0 }
0x1a16   :  { %v4625_v55 = vpack.c.bf16 %v4614_v33, %v4611_v6  ;;  %4863 = vmatpush1.bf16.msra.mxu1 %v9554_v45  ;;  %v9569_v33 = vld [vmem:[%s10915_s24] sm:$0xff]  }
0x1a17   :  { %8890 = vmatprep.subr.bf16.mxu0 %v9569_v33 }
0x1a18   :  { %8886 = vmatprep.mubr.bf16.mxu0 %v4625_v55  ;;  %v9570_v55 = vld [vmem:[%s10915_s24 + $0x8] sm:$0xff]  }
0x1a19   :  { %8887 = vmatmul.mubr.bf16.vlgmr.msra.gmra.mrb[92].mxu0 %v4626_v43  ;;  %v9571_v43 = vld [vmem:[%s10915_s24 + $0x10] sm:$0xff]  }
0x1a1a   :  { %8891 = vmatpush3.bf16.msra.mxu0 %v9569_v33  ;;  %v9600_v33 = vld [vmem:[%s10525_s26 + $0x42c] ss:$48 sps:$4 sm:$0xff]  }
0x1a1b   :  { %8892 = vmatprep.subr.bf16.mxu0 %v9570_v55 }
0x1a1e   :  { %8893 = vmatpush3.bf16.msra.mxu0 %v9570_v55  ;;  %v9598_v55 = vld [vmem:[%s10525_s26 + $0x428] ss:$48 sps:$4 sm:$0xff]  }
0x1a1f   :  { %8894 = vmatprep.subr.bf16.mxu0 %v9571_v43 }
0x1a22   :  { %8895 = vmatpush3.bf16.msra.mxu0 %v9571_v43  ;;  %v9603_v43 = vld [vmem:[%s10525_s26 + $0x484] ss:$48 sps:$4 sm:$0xff]  }
0x1a23   :  { %8896 = vmatprep.subr.bf16.mxu0 %v9572_v46 }
0x1a26   :  { %8897 = vmatpush3.bf16.msra.mxu0 %v9572_v46  ;;  %v9606_v46 = vld [vmem:[%s10525_s26 + $0x48c] ss:$48 sps:$4 sm:$0xff]  }
0x1a27   :  { %8898 = vmatprep.subr.bf16.mxu0 %v9573_v47 }
0x1a2a   :  { %8899 = vmatpush3.bf16.msra.mxu0 %v9573_v47  ;;  %v9601_v47 = vld [vmem:[%s10525_s26 + $0x480] ss:$48 sps:$4 sm:$0xff]  }
0x1a2b   :  { %8900 = vmatprep.subr.bf16.mxu0 %v9574_v51 }
0x1a2e   :  { %8901 = vmatpush3.bf16.msra.mxu0 %v9574_v51  ;;  %v9604_v51 = vld [vmem:[%s10525_s26 + $0x488] ss:$48 sps:$4 sm:$0xff]  }
0x1a2f   :  { %8902 = vmatprep.subr.bf16.mxu0 %v9575_v49 }
0x1a32   :  { %8903 = vmatpush3.bf16.msra.mxu0 %v9575_v49  ;;  %v9609_v49 = vld [vmem:[%s10525_s26 + $0x4e4] ss:$48 sps:$4 sm:$0xff]  }
0x1a33   :  { %8904 = vmatprep.subr.bf16.mxu0 %v9576_v7 }
0x1a36   :  { %8905 = vmatpush3.bf16.msra.mxu0 %v9576_v7  ;;  %v9612_v7 = vld [vmem:[%s10525_s26 + $0x4ec] ss:$48 sps:$4 sm:$0xff]  }
0x1adc   :  { %v8852_v26 = vpop.f32.mrb[92].mxu1 }
0x1add   :  { %v4478_v27 = vadd.f32 %v8852_v26, %v10817_v10  ;;  %v4462_v22 = vpop.f32.mrb[93].mxu1 }
0x1ade   :  { %v4476_v36 = vadd.f32 %v4462_v22, %v10819_v9  ;;  %v8853_v41 = vpop.f32.mrb[94].mxu1 }
0x1adf   :  { %v4465_v8 = vpop.f32.mrb[95].mxu1 }
0x1ae0   :  { %v4477_v42 = vadd.f32 %v4465_v8, %v10821_v40 }
0x1aec   :  { %v8888_v44 = vpop.f32.mrb[92].mxu0 }
0x1aed   :  { %v4725_v13 = vadd.f32 %v8888_v44, %v4478_v27  ;;  %v4709_v34 = vpop.f32.mrb[93].mxu0 }
0x1aee   :  { %v4723_v48 = vadd.f32 %v4709_v34, %v4476_v36  ;;  %v8889_v53 = vpop.f32.mrb[94].mxu0 }
0x1aef   :  { %v10877_v30 = vadd.f32 %v4725_v13, %v10520_v52  ;;  %v4712_v10 = vpop.f32.mrb[95].mxu0 }
0x1af0   :  { %v10880_v50 = vadd.f32 %v4723_v48, %v10542_v56  ;;  %v4724_v9 = vadd.f32 %v4712_v10, %v4477_v42 }
0x1af1   :  { %v4732_v56 = vmul.f32 %v10877_v30, %v10877_v30 }
0x1af2   :  { %v10883_v40 = vadd.f32 %v4724_v9, %v10515_v3  ;;  %v4730_v63 = vmul.f32 %v10880_v50, %v10880_v50  ;;  %v9559_v3 = vld [vmem:[%s10865_s16 + $0x44] ss:$8 sps:$4 sm:$0xff]  }
0x1af3   :  { %4864 = vmatprep.subr.bf16.mxu1 %v9559_v3 }
0x1af4   :  { %4733 = vadd.xlane.f32.xlu0 %v4730_v63  ;;  %v4731_v52 = vmul.f32 %v10883_v40, %v10883_v40  ;;  %4865 = vmatpush1.bf16.msra.mxu1 %v9557_v57 }
0x1af5   :  { %4866 = vmatprep.subr.bf16.mxu1 %v9562_v59 }
0x1af6   :  { %4735 = vadd.xlane.f32.xlu1 %v4731_v52 }
0x1af8   :  { %4737 = vadd.xlane.f32.xlu0 %v4732_v56  ;;  %4867 = vmatpush1.bf16.msra.mxu1 %v9560_v54 }
0x1af9   :  { %4868 = vmatprep.subr.bf16.mxu1 %v9565_v14 }
0x1afc   :  { %4869 = vmatpush1.bf16.msra.mxu1 %v9563_v61 }
0x1afd   :  { %4870 = vmatprep.subr.bf16.mxu1 %v9568_v17 }
0x1b00   :  { %4871 = vmatpush1.bf16.msra.mxu1 %v9566_v19 }
0x1b81   :  { %v4734_v1 = vpop.xlane.xlu0 %4733 }
0x1b82   :  { %v4739_v62 = vmul.f32 0.03125, %v4734_v1  ;;  %v9577_v1 = vld [vmem:[%s10525_s26 + $0x300] ss:$48 sps:$4 sm:$0xff]  }
0x1b83   :  { %v4736_v58 = vpop.xlane.xlu1 %4735 }
0x1b84   :  { %v4742_v4 = vadd.f32 1e-06, %v4739_v62  ;;  %v4740_v28 = vmul.f32 0.03125, %v4736_v58  ;;  %v9579_v62 = vld [vmem:[%s10525_s26 + $0x304] ss:$48 sps:$4 sm:$0xff]  }
0x1b85   :  { %v4738_v5 = vpop.xlane.xlu0 %4737  ;;  %v9580_v58 = vld [vmem:[%s10525_s26 + $0x308] ss:$48 sps:$4 sm:$0xff]   ;;  %5721 = vmatprep.subr.bf16.mxu1 %v9579_v62  ;;  %v9625_v62 = vld [vmem:[%s10525_s26 + $0x310] ss:$48 sps:$4 sm:$0xff]  }
0x1b86   :  { %9873 = vrsqrt.f32 %v4742_v4  ;;  %v4743_v60 = vadd.f32 1e-06, %v4740_v28  ;;  %v4741_v12 = vmul.f32 0.03125, %v4738_v5  ;;  %v9582_v4 = vld [vmem:[%s10525_s26 + $0x30c] ss:$48 sps:$4 sm:$0xff]  }
0x1b87   :  { %v9585_v28 = vld [vmem:[%s10525_s26 + $0x364] ss:$48 sps:$4 sm:$0xff]   ;;  %v9588_v5 = vld [vmem:[%s10525_s26 + $0x36c] ss:$48 sps:$4 sm:$0xff]   ;;  %5772 = vmatprep.subr.bf16.mxu0 %v9582_v4 }
0x1b88   :  { %9875 = vrsqrt.f32 %v4743_v60  ;;  %v4744_v15 = vadd.f32 1e-06, %v4741_v12  ;;  %v9583_v60 = vld [vmem:[%s10525_s26 + $0x360] ss:$48 sps:$4 sm:$0xff]   ;;  %v9586_v12 = vld [vmem:[%s10525_s26 + $0x368] ss:$48 sps:$4 sm:$0xff]  }
0x1b8a   :  { %9877 = vrsqrt.f32 %v4744_v15  ;;  %v9591_v15 = vld [vmem:[%s10525_s26 + $0x3c4] ss:$48 sps:$4 sm:$0xff]  }
0x1b90   :  { %v9874_v23 = vpop.eup %9873 }
0x1b91   :  { %v4748_v20 = vmul.f32 %v9874_v23, %v10880_v50  ;;  %v9594_v23 = vld [vmem:[%s10525_s26 + $0x3cc] ss:$48 sps:$4 sm:$0xff]  }
0x1b92   :  { %v9876_v29 = vpop.eup %9875 }
0x1b93   :  { %v4749_v24 = vmul.f32 %v9876_v29, %v10883_v40  ;;  %v4755_v35 = vmul.f32 %v7853_v31, %v4748_v20  ;;  %v9589_v20 = vld [vmem:[%s10525_s26 + $0x3c0] ss:$48 sps:$4 sm:$0xff]   ;;  %v9592_v29 = vld [vmem:[%s10525_s26 + $0x3c8] ss:$48 sps:$4 sm:$0xff]  }
0x1b94   :  { %v9878_v32 = vpop.eup %9877 }
0x1b95   :  { %v4756_v37 = vmul.f32 %v7853_v31, %v4749_v24  ;;  %v4750_v39 = vmul.f32 %v9878_v32, %v10877_v30 }
0x1b97   :  { %v4758_v38 = vpack.c.bf16 %v4756_v37, %v4755_v35  ;;  %v4757_v6 = vmul.f32 %v7853_v31, %v4750_v39 }
0x1b99   :  { %4889 = vmatmul.mubr.bf16.vlgmr.msra.gmra.mrb[96].mxu1 %v4758_v38  ;;  %v4759_v25 = vpack.c.bf16 %v4757_v6, %v4757_v6 }
0x1b9a   :  { %4898 = vmatprep.mubr.bf16.mxu1 %v9969_v0  ;;  %5722 = vmatpush1.bf16.msra.mxu1 %v9577_v1 }
0x1b9b   :  { %5723 = vmatprep.subr.bf16.mxu1 %v9585_v28 }
0x1b9e   :  { %5724 = vmatpush1.bf16.msra.mxu1 %v9583_v60  ;;  %v9636_v60 = vld [vmem:[%s10525_s26 + $0x37c] ss:$48 sps:$4 sm:$0xff]  }
0x1b9f   :  { %5725 = vmatprep.subr.bf16.mxu1 %v9591_v15  ;;  %v9634_v15 = vld [vmem:[%s10525_s26 + $0x378] ss:$48 sps:$4 sm:$0xff]  }
0x1ba1   :  { %4899 = vmatmul.mubr.bf16.gmra.mrb[100].mxu1 %v4759_v25 }
0x1ba2   :  { %5753 = vmatprep.mubr.bf16.mxu1 %v9969_v0  ;;  %5726 = vmatpush1.bf16.msra.mxu1 %v9589_v20  ;;  %v9639_v20 = vld [vmem:[%s10525_s26 + $0x3d4] ss:$48 sps:$4 sm:$0xff]  }
0x1c6c   :  { %v4890_v16 = vpop.f32.mrb[96].mxu1 }
0x1c6d   :  { %v7870_v26 = vmul.f32 -1.442695, %v4890_v16  ;;  %v4892_v27 = vpop.f32.mrb[97].mxu1 }
0x1c6e   :  { %v4894_v22 = vpop.f32.mrb[98].mxu1 }
0x1c6f   :  { %9879 = vpow2.f32 %v7870_v26  ;;  %v7871_v36 = vmul.f32 -1.442695, %v4894_v22  ;;  %v4896_v41 = vpop.f32.mrb[99].mxu1  ;;  %v9610_v26 = vld [vmem:[%s10525_s26 + $0x4e8] ss:$48 sps:$4 sm:$0xff]  }
0x1c71   :  { %9881 = vpow2.f32 %v7871_v36  ;;  %v9613_v36 = vld [vmem:[%s10525_s26 + $0x540] ss:$48 sps:$4 sm:$0xff]  }
0x1c74   :  { %v4900_v8 = vpop.f32.mrb[100].mxu1 }
0x1c75   :  { %v7872_v42 = vmul.f32 -1.442695, %v4900_v8  ;;  %v4902_v44 = vpop.f32.mrb[101].mxu1 }
0x1c76   :  { %v4904_v13 = vpop.f32.mrb[102].mxu1 }
0x1c77   :  { %9883 = vpow2.f32 %v7872_v42  ;;  %v4905_v34 = vpop.f32.mrb[103].mxu1  ;;  %v9624_v42 = vld [vmem:[%s10525_s26 + $0x5ac] ss:$48 sps:$4 sm:$0xff]   ;;  %v9622_v13 = vld [vmem:[%s10525_s26 + $0x5a8] ss:$48 sps:$4 sm:$0xff]  }
0x1c78   :  { %v9627_v34 = vld [vmem:[%s10525_s26 + $0x314] ss:$48 sps:$4 sm:$0xff]  }
0x1c79   :  { %v9880_v48 = vpop.eup %9879 }
0x1c7a   :  { %v4916_v53 = vadd.f32 1.0, %v9880_v48  ;;  %v9630_v48 = vld [vmem:[%s10525_s26 + $0x31c] ss:$48 sps:$4 sm:$0xff]  }
0x1c7b   :  { %v9882_v10 = vpop.eup %9881 }
0x1c7c   :  { %9885 = vrcp.f32 %v4916_v53  ;;  %v4917_v9 = vadd.f32 1.0, %v9882_v10 }
0x1c7e   :  { %9887 = vrcp.f32 %v4917_v9 }
0x1c81   :  { %v9884_v63 = vpop.eup %9883 }
0x1c82   :  { %v4918_v52 = vadd.f32 1.0, %v9884_v63 }
0x1c84   :  { %9889 = vrcp.f32 %v4918_v52 }
0x1c86   :  { %v9886_v56 = vpop.eup %9885 }
0x1c87   :  { %v4925_v21 = vmul.f32 %v9886_v56, %v4890_v16  ;;  %v9607_v16 = vld [vmem:[%s10525_s26 + $0x4e0] ss:$48 sps:$4 sm:$0xff]  }
0x1c88   :  { %v9888_v45 = vpop.eup %9887 }
0x1c89   :  { %v4928_v3 = vmul.f32 %v4925_v21, %v4892_v27  ;;  %v4926_v57 = vmul.f32 %v9888_v45, %v4894_v22  ;;  %v9615_v27 = vld [vmem:[%s10525_s26 + $0x544] ss:$48 sps:$4 sm:$0xff]   ;;  %v9618_v22 = vld [vmem:[%s10525_s26 + $0x54c] ss:$48 sps:$4 sm:$0xff]  }
0x1c8b   :  { %v4929_v54 = vmul.f32 %v4926_v57, %v4896_v41  ;;  %v9616_v41 = vld [vmem:[%s10525_s26 + $0x548] ss:$48 sps:$4 sm:$0xff]  }
0x1c8d   :  { %v4931_v59 = vpack.c.bf16 %v4929_v54, %v4928_v3 }
0x1c8e   :  { %v9890_v14 = vpop.eup %9889 }
0x1c8f   :  { %v4927_v61 = vmul.f32 %v9890_v14, %v4900_v8  ;;  %8906 = vmatprep.mubr.bf16.mxu0 %v4931_v59  ;;  %v9621_v8 = vld [vmem:[%s10525_s26 + $0x5a4] ss:$48 sps:$4 sm:$0xff]   ;;  %v7881_v14 = vld [vmem:[%s10580_s9 + $0x1] ss:$0 sm:$0xff] }
0x1c91   :  { %v4930_v17 = vmul.f32 %v4927_v61, %v4902_v44  ;;  %v9619_v44 = vld [vmem:[%s10525_s26 + $0x5a0] ss:$48 sps:$4 sm:$0xff]  }
0x1c93   :  { %v4932_v19 = vpack.c.bf16 %v4930_v17, %v4930_v17 }
0x1c95   :  { %8907 = vmatmul.mubr.bf16.vlgmr.msra.gmra.mrb[96].mxu0 %v4932_v19 }
0x1c96   :  { %5804 = vmatprep.mubr.bf16.mxu0 %v9969_v0  ;;  %5773 = vmatpush1.bf16.msra.mxu0 %v9580_v58  ;;  %v9628_v58 = vld [vmem:[%s10525_s26 + $0x318] ss:$48 sps:$4 sm:$0xff]  }
0x1c97   :  { %5774 = vmatprep.subr.bf16.mxu0 %v9588_v5  ;;  %v9633_v5 = vld [vmem:[%s10525_s26 + $0x374] ss:$48 sps:$4 sm:$0xff]  }
0x1c9a   :  { %5775 = vmatpush1.bf16.msra.mxu0 %v9586_v12  ;;  %v9631_v12 = vld [vmem:[%s10525_s26 + $0x370] ss:$48 sps:$4 sm:$0xff]  }
0x1c9b   :  { %5776 = vmatprep.subr.bf16.mxu0 %v9594_v23 }
0x1c9e   :  { %5777 = vmatpush1.bf16.msra.mxu0 %v9592_v29  ;;  %v9642_v29 = vld [vmem:[%s10525_s26 + $0x3dc] ss:$48 sps:$4 sm:$0xff]  }
0x1c9f   :  { %5778 = vmatprep.subr.bf16.mxu0 %v9600_v33  ;;  %v9654_v33 = vld [vmem:[%s10525_s26 + $0x49c] ss:$48 sps:$4 sm:$0xff]  }
0x1ca2   :  { %5779 = vmatpush1.bf16.msra.mxu0 %v9598_v55  ;;  %v9652_v55 = vld [vmem:[%s10525_s26 + $0x498] ss:$48 sps:$4 sm:$0xff]  }
0x1ca3   :  { %5780 = vmatprep.subr.bf16.mxu0 %v9606_v46  ;;  %v9660_v46 = vld [vmem:[%s10525_s26 + $0x4fc] ss:$48 sps:$4 sm:$0xff]  }
0x1ca6   :  { %5781 = vmatpush1.bf16.msra.mxu0 %v9604_v51  ;;  %v9658_v51 = vld [vmem:[%s10525_s26 + $0x4f8] ss:$48 sps:$4 sm:$0xff]  }
0x1ca7   :  { %5782 = vmatprep.subr.bf16.mxu0 %v9612_v7  ;;  %v9666_v7 = vld [vmem:[%s10525_s26 + $0x55c] ss:$48 sps:$4 sm:$0xff]  }
0x1caa   :  { %5783 = vmatpush1.bf16.msra.mxu0 %v9610_v26  ;;  %v9664_v26 = vld [vmem:[%s10525_s26 + $0x558] ss:$48 sps:$4 sm:$0xff]  }
0x1cab   :  { %5784 = vmatprep.subr.bf16.mxu0 %v9618_v22  ;;  %v9672_v22 = vld [vmem:[%s10525_s26 + $0x5bc] ss:$48 sps:$4 sm:$0xff]  }
0x1cae   :  { %5785 = vmatpush1.bf16.msra.mxu0 %v9616_v41  ;;  %v9670_v41 = vld [vmem:[%s10525_s26 + $0x5b8] ss:$48 sps:$4 sm:$0xff]  }
0x1caf   :  { %5786 = vmatprep.subr.bf16.mxu0 %v9624_v42  ;;  %v9678_v42 = vld [vmem:[%s10525_s26 + $0x32c] ss:$48 sps:$4 sm:$0xff]  }
0x1cb2   :  { %5787 = vmatpush1.bf16.msra.mxu0 %v9622_v13  ;;  %v9676_v13 = vld [vmem:[%s10525_s26 + $0x328] ss:$48 sps:$4 sm:$0xff]  }
0x1cb3   :  { %5874 = vmatprep.subr.bf16.mxu0 %v9630_v48  ;;  %v9684_v48 = vld [vmem:[%s10525_s26 + $0x38c] ss:$48 sps:$4 sm:$0xff]  }
0x1d68   :  { %v8908_v31 = vpop.f32.mrb[96].mxu0 }
0x1d69   :  { %v5031_v24 = vpop.f32.mrb[97].mxu0  ;;  %v10942_v38 = vadd.f32 %v8908_v31, %v10877_v30  ;;  %v9597_v30 = vld [vmem:[%s10525_s26 + $0x424] ss:$48 sps:$4 sm:$0xff]   ;;  %v9637_v31 = vld [vmem:[%s10525_s26 + $0x3d0] ss:$48 sps:$4 sm:$0xff]  }
0x1d6a   :  { %v10939_v32 = vadd.f32 %v5031_v24, %v10880_v50  ;;  %v8909_v35 = vpop.f32.mrb[98].mxu0  ;;  %5727 = vmatprep.subr.bf16.mxu1 %v9597_v30  ;;  %v9640_v24 = vld [vmem:[%s10525_s26 + $0x3d8] ss:$48 sps:$4 sm:$0xff]   ;;  %v9651_v30 = vld [vmem:[%s10525_s26 + $0x494] ss:$48 sps:$4 sm:$0xff]  }
0x1d6b   :  { %v5034_v37 = vpop.f32.mrb[99].mxu0  ;;  %v5051_v25 = vmul.f32 %v10942_v38, %v10942_v38 }
0x1d6c   :  { %v10945_v39 = vadd.f32 %v5034_v37, %v10883_v40  ;;  %v5049_v6 = vmul.f32 %v10939_v32, %v10939_v32  ;;  %v9595_v40 = vld [vmem:[%s10525_s26 + $0x420] ss:$48 sps:$4 sm:$0xff]   ;;  %v9645_v37 = vld [vmem:[%s10525_s26 + $0x434] ss:$48 sps:$4 sm:$0xff]  }
0x1d6d   :  { %5728 = vmatpush1.bf16.msra.mxu1 %v9595_v40  ;;  %v9649_v40 = vld [vmem:[%s10525_s26 + $0x490] ss:$48 sps:$4 sm:$0xff]  }
0x1d6e   :  { %5052 = vadd.xlane.f32.xlu1 %v5049_v6  ;;  %v5050_v50 = vmul.f32 %v10945_v39, %v10945_v39  ;;  %5729 = vmatprep.subr.bf16.mxu1 %v9603_v43  ;;  %v9648_v6 = vld [vmem:[%s10525_s26 + $0x43c] ss:$48 sps:$4 sm:$0xff]   ;;  %v9657_v43 = vld [vmem:[%s10525_s26 + $0x4f4] ss:$48 sps:$4 sm:$0xff]  }
0x1d70   :  { %5054 = vadd.xlane.f32.xlu0 %v5050_v50  ;;  %v9643_v50 = vld [vmem:[%s10525_s26 + $0x430] ss:$48 sps:$4 sm:$0xff]  }
0x1d71   :  { %5730 = vmatpush1.bf16.msra.mxu1 %v9601_v47  ;;  %v9655_v47 = vld [vmem:[%s10525_s26 + $0x4f0] ss:$48 sps:$4 sm:$0xff]  }
0x1d72   :  { %5056 = vadd.xlane.f32.xlu1 %v5051_v25  ;;  %5731 = vmatprep.subr.bf16.mxu1 %v9609_v49  ;;  %v9646_v25 = vld [vmem:[%s10525_s26 + $0x438] ss:$48 sps:$4 sm:$0xff]   ;;  %v9663_v49 = vld [vmem:[%s10525_s26 + $0x554] ss:$48 sps:$4 sm:$0xff]  }
0x1d75   :  { %5732 = vmatpush1.bf16.msra.mxu1 %v9607_v16  ;;  %v9661_v16 = vld [vmem:[%s10525_s26 + $0x550] ss:$48 sps:$4 sm:$0xff]  }
0x1d76   :  { %5733 = vmatprep.subr.bf16.mxu1 %v9615_v27  ;;  %v9669_v27 = vld [vmem:[%s10525_s26 + $0x5b4] ss:$48 sps:$4 sm:$0xff]  }
0x1d79   :  { %5734 = vmatpush1.bf16.msra.mxu1 %v9613_v36  ;;  %v9667_v36 = vld [vmem:[%s10525_s26 + $0x5b0] ss:$48 sps:$4 sm:$0xff]  }
0x1d7a   :  { %5735 = vmatprep.subr.bf16.mxu1 %v9621_v8  ;;  %v9675_v8 = vld [vmem:[%s10525_s26 + $0x324] ss:$48 sps:$4 sm:$0xff]  }
0x1d7d   :  { %5736 = vmatpush1.bf16.msra.mxu1 %v9619_v44  ;;  %v9673_v44 = vld [vmem:[%s10525_s26 + $0x320] ss:$48 sps:$4 sm:$0xff]  }
0x1d7e   :  { %5823 = vmatprep.subr.bf16.mxu1 %v9627_v34  ;;  %v9681_v34 = vld [vmem:[%s10525_s26 + $0x384] ss:$48 sps:$4 sm:$0xff]  }
0x1dfb   :  { %v5053_v53 = vpop.xlane.xlu1 %5052 }
0x1dfc   :  { %v5058_v10 = vmul.f32 0.03125, %v5053_v53  ;;  %v9679_v53 = vld [vmem:[%s10525_s26 + $0x380] ss:$48 sps:$4 sm:$0xff]  }
0x1dfd   :  { %v5055_v9 = vpop.xlane.xlu0 %5054 }
0x1dfe   :  { %v5061_v63 = vadd.f32 1e-06, %v5058_v10  ;;  %v5059_v52 = vmul.f32 0.03125, %v5055_v9  ;;  %v9682_v10 = vld [vmem:[%s10525_s26 + $0x388] ss:$48 sps:$4 sm:$0xff]  }
0x1dff   :  { %v5057_v56 = vpop.xlane.xlu1 %5056  ;;  %v9687_v9 = vld [vmem:[%s10525_s26 + $0x3e4] ss:$48 sps:$4 sm:$0xff]  }
0x1e00   :  { %9891 = vrsqrt.f32 %v5061_v63  ;;  %v5062_v21 = vadd.f32 1e-06, %v5059_v52  ;;  %v5060_v45 = vmul.f32 0.03125, %v5057_v56  ;;  %v9690_v63 = vld [vmem:[%s10525_s26 + $0x3ec] ss:$48 sps:$4 sm:$0xff]  }
0x1e01   :  { %v9685_v52 = vld [vmem:[%s10525_s26 + $0x3e0] ss:$48 sps:$4 sm:$0xff]   ;;  %v9688_v56 = vld [vmem:[%s10525_s26 + $0x3e8] ss:$48 sps:$4 sm:$0xff]  }
0x1e02   :  { %9893 = vrsqrt.f32 %v5062_v21  ;;  %v5063_v3 = vadd.f32 1e-06, %v5060_v45  ;;  %v9693_v21 = vld [vmem:[%s10525_s26 + $0x444] ss:$48 sps:$4 sm:$0xff]   ;;  %v9696_v45 = vld [vmem:[%s10525_s26 + $0x44c] ss:$48 sps:$4 sm:$0xff]  }
0x1e04   :  { %9895 = vrsqrt.f32 %v5063_v3  ;;  %v9691_v3 = vld [vmem:[%s10525_s26 + $0x440] ss:$48 sps:$4 sm:$0xff]  }
0x1e0a   :  { %v9892_v57 = vpop.eup %9891 }
0x1e0b   :  { %v5067_v54 = vmul.f32 %v9892_v57, %v10939_v32  ;;  %v9694_v57 = vld [vmem:[%s10525_s26 + $0x448] ss:$48 sps:$4 sm:$0xff]  }
0x1e0c   :  { %v9894_v59 = vpop.eup %9893 }
0x1e0d   :  { %v5068_v61 = vmul.f32 %v9894_v59, %v10945_v39  ;;  %v5074_v19 = vmul.f32 %v7881_v14, %v5067_v54  ;;  %v9699_v54 = vld [vmem:[%s10525_s26 + $0x4a4] ss:$48 sps:$4 sm:$0xff]   ;;  %v9702_v59 = vld [vmem:[%s10525_s26 + $0x4ac] ss:$48 sps:$4 sm:$0xff]  }
0x1e0e   :  { %v9896_v17 = vpop.eup %9895 }
0x1e0f   :  { %v5075_v1 = vmul.f32 %v7881_v14, %v5068_v61  ;;  %v5069_v28 = vmul.f32 %v9896_v17, %v10942_v38  ;;  %v9700_v61 = vld [vmem:[%s10525_s26 + $0x4a8] ss:$48 sps:$4 sm:$0xff]   ;;  %v9705_v17 = vld [vmem:[%s10525_s26 + $0x504] ss:$48 sps:$4 sm:$0xff]  }
0x1e11   :  { %v10980_v4 = vpack.c.bf16 %v5075_v1, %v5074_v19  ;;  %v5076_v23 = vmul.f32 %v7881_v14, %v5069_v28  ;;  %v9697_v14 = vld [vmem:[%s10525_s26 + $0x4a0] ss:$48 sps:$4 sm:$0xff]   ;;  %v9708_v19 = vld [vmem:[%s10525_s26 + $0x50c] ss:$48 sps:$4 sm:$0xff]  }
0x1e12   :  { %v9703_v1 = vld [vmem:[%s10525_s26 + $0x500] ss:$48 sps:$4 sm:$0xff]   ;;  %v9714_v28 = vld [vmem:[%s10525_s26 + $0x56c] ss:$48 sps:$4 sm:$0xff]  }
0x1e13   :  { %5754 = vmatmul.mubr.bf16.vlgmr.msra.gmra.mrb[104].mxu1 %v10980_v4  ;;  %5805 = vmatmul.mubr.bf16.vlgmr.msra.gmra.mrb[100].mxu0 %v10980_v4  ;;  %v10995_v35 = vpack.c.bf16 %v5076_v23, %v5076_v23  ;;  %v9715_v23 = vld [vmem:[%s10525_s26 + $0x5c0] ss:$48 sps:$4 sm:$0xff]  }
0x1e14   :  { %5824 = vmatpush1.bf16.msra.mxu1 %v9625_v62  ;;  %5875 = vmatpush1.bf16.msra.mxu0 %v9628_v58  ;;  %v9706_v62 = vld [vmem:[%s10525_s26 + $0x508] ss:$48 sps:$4 sm:$0xff]   ;;  %v9711_v58 = vld [vmem:[%s10525_s26 + $0x564] ss:$48 sps:$4 sm:$0xff]  }
0x1e15   :  { %5825 = vmatprep.subr.bf16.mxu1 %v9633_v5  ;;  %5876 = vmatprep.subr.bf16.mxu0 %v9636_v60  ;;  %v9709_v5 = vld [vmem:[%s10525_s26 + $0x560] ss:$48 sps:$4 sm:$0xff]   ;;  %v9712_v60 = vld [vmem:[%s10525_s26 + $0x568] ss:$48 sps:$4 sm:$0xff]  }
0x1e16   :  { %5763 = vmatprep.mubr.bf16.mxu1 %v9969_v0  ;;  %5814 = vmatprep.mubr.bf16.mxu0 %v9969_v0 }
0x1e18   :  { %5826 = vmatpush1.bf16.msra.mxu1 %v9631_v12  ;;  %5877 = vmatpush1.bf16.msra.mxu0 %v9634_v15  ;;  %v9717_v12 = vld [vmem:[%s10525_s26 + $0x5c4] ss:$48 sps:$4 sm:$0xff]   ;;  %v9720_v15 = vld [vmem:[%s10525_s26 + $0x5cc] ss:$48 sps:$4 sm:$0xff]  }
0x1e19   :  { %5827 = vmatprep.subr.bf16.mxu1 %v9639_v20  ;;  %5878 = vmatprep.subr.bf16.mxu0 %v9642_v29  ;;  %v9718_v20 = vld [vmem:[%s10525_s26 + $0x5c8] ss:$48 sps:$4 sm:$0xff]  }
0x1e1b   :  { %5764 = vmatmul.mubr.bf16.gmra.mrb[108].mxu1 %v10995_v35  ;;  %5815 = vmatmul.mubr.bf16.gmra.mrb[104].mxu0 %v10995_v35 }
0x1e1c   :  { %5828 = vmatpush1.bf16.msra.mxu1 %v9637_v31  ;;  %5879 = vmatpush1.bf16.msra.mxu0 %v9640_v24 }
0x1e1d   :  { %5829 = vmatprep.subr.bf16.mxu1 %v9645_v37  ;;  %5880 = vmatprep.subr.bf16.mxu0 %v9648_v6 }
0x1e1e   :  { %5855 = vmatprep.mubr.bf16.mxu1 %v9969_v0  ;;  %5906 = vmatprep.mubr.bf16.mxu0 %v9969_v0 }
0x1e20   :  { %5830 = vmatpush1.bf16.msra.mxu1 %v9643_v50  ;;  %5881 = vmatpush1.bf16.msra.mxu0 %v9646_v25 }
0x1e21   :  { %5831 = vmatprep.subr.bf16.mxu1 %v9651_v30  ;;  %5882 = vmatprep.subr.bf16.mxu0 %v9654_v33 }
0x1e24   :  { %5832 = vmatpush1.bf16.msra.mxu1 %v9649_v40  ;;  %5883 = vmatpush1.bf16.msra.mxu0 %v9652_v55 }
0x1e25   :  { %5833 = vmatprep.subr.bf16.mxu1 %v9657_v43  ;;  %5884 = vmatprep.subr.bf16.mxu0 %v9660_v46 }
0x1e28   :  { %5834 = vmatpush1.bf16.msra.mxu1 %v9655_v47  ;;  %5885 = vmatpush1.bf16.msra.mxu0 %v9658_v51 }
0x1e29   :  { %5835 = vmatprep.subr.bf16.mxu1 %v9663_v49  ;;  %5886 = vmatprep.subr.bf16.mxu0 %v9666_v7 }
0x1e2c   :  { %5836 = vmatpush1.bf16.msra.mxu1 %v9661_v16  ;;  %5887 = vmatpush1.bf16.msra.mxu0 %v9664_v26 }
0x1e2d   :  { %5837 = vmatprep.subr.bf16.mxu1 %v9669_v27  ;;  %5888 = vmatprep.subr.bf16.mxu0 %v9672_v22 }
0x1e30   :  { %5838 = vmatpush1.bf16.msra.mxu1 %v9667_v36  ;;  %5889 = vmatpush1.bf16.msra.mxu0 %v9670_v41 }
0x1e31   :  { %5925 = vmatprep.subr.bf16.mxu1 %v9675_v8  ;;  %5976 = vmatprep.subr.bf16.mxu0 %v9678_v42 }
0x1e33   :  { %5856 = vmatmul.mubr.bf16.vlgmr.msra.gmra.mrb[112].mxu1 %v10980_v4  ;;  %5907 = vmatmul.mubr.bf16.vlgmr.msra.gmra.mrb[108].mxu0 %v10980_v4 }
0x1e34   :  { %5926 = vmatpush1.bf16.msra.mxu1 %v9673_v44  ;;  %5977 = vmatpush1.bf16.msra.mxu0 %v9676_v13 }
0x1e35   :  { %5927 = vmatprep.subr.bf16.mxu1 %v9681_v34  ;;  %5978 = vmatprep.subr.bf16.mxu0 %v9684_v48 }
0x1e36   :  { %5865 = vmatprep.mubr.bf16.mxu1 %v9969_v0  ;;  %5916 = vmatprep.mubr.bf16.mxu0 %v9969_v0 }
0x1e38   :  { %5928 = vmatpush1.bf16.msra.mxu1 %v9679_v53  ;;  %5979 = vmatpush1.bf16.msra.mxu0 %v9682_v10 }
0x1e39   :  { %5929 = vmatprep.subr.bf16.mxu1 %v9687_v9  ;;  %5980 = vmatprep.subr.bf16.mxu0 %v9690_v63 }
0x1e3b   :  { %5866 = vmatmul.mubr.bf16.gmra.mrb[116].mxu1 %v10995_v35  ;;  %5917 = vmatmul.mubr.bf16.gmra.mrb[112].mxu0 %v10995_v35 }
0x1e3c   :  { %5930 = vmatpush1.bf16.msra.mxu1 %v9685_v52  ;;  %5981 = vmatpush1.bf16.msra.mxu0 %v9688_v56 }
0x1e3d   :  { %5931 = vmatprep.subr.bf16.mxu1 %v9693_v21  ;;  %5982 = vmatprep.subr.bf16.mxu0 %v9696_v45 }
0x1e3e   :  { %5957 = vmatprep.mubr.bf16.mxu1 %v9969_v0  ;;  %6008 = vmatprep.mubr.bf16.mxu0 %v9969_v0 }
0x1e40   :  { %5932 = vmatpush1.bf16.msra.mxu1 %v9691_v3  ;;  %5983 = vmatpush1.bf16.msra.mxu0 %v9694_v57 }
0x1e41   :  { %5933 = vmatprep.subr.bf16.mxu1 %v9699_v54  ;;  %5984 = vmatprep.subr.bf16.mxu0 %v9702_v59 }
0x1e44   :  { %5934 = vmatpush1.bf16.msra.mxu1 %v9697_v14  ;;  %5985 = vmatpush1.bf16.msra.mxu0 %v9700_v61 }
0x1e45   :  { %5935 = vmatprep.subr.bf16.mxu1 %v9705_v17  ;;  %5986 = vmatprep.subr.bf16.mxu0 %v9708_v19 }
0x1e48   :  { %5936 = vmatpush1.bf16.msra.mxu1 %v9703_v1  ;;  %5987 = vmatpush1.bf16.msra.mxu0 %v9706_v62 }
0x1e49   :  { %5937 = vmatprep.subr.bf16.mxu1 %v9711_v58  ;;  %5988 = vmatprep.subr.bf16.mxu0 %v9714_v28 }
0x1e4c   :  { %5938 = vmatpush1.bf16.msra.mxu1 %v9709_v5  ;;  %5989 = vmatpush1.bf16.msra.mxu0 %v9712_v60 }
0x1e4d   :  { %5939 = vmatprep.subr.bf16.mxu1 %v9717_v12  ;;  %5990 = vmatprep.subr.bf16.mxu0 %v9720_v15 }
0x1e50   :  { %5940 = vmatpush1.bf16.msra.mxu1 %v9715_v23  ;;  %5991 = vmatpush1.bf16.msra.mxu0 %v9718_v20 }
0x1e53   :  { %5958 = vmatmul.mubr.bf16.vlgmr.msra.gmra.mrb[120].mxu1 %v10980_v4  ;;  %6009 = vmatmul.mubr.bf16.vlgmr.msra.gmra.mrb[116].mxu0 %v10980_v4 }
0x1e54   :  { %5967 = vmatprep.mubr.bf16.mxu1 %v9969_v0  ;;  %6018 = vmatprep.mubr.bf16.mxu0 %v9969_v0 }
0x1e5b   :  { %5968 = vmatmul.mubr.bf16.gmra.mrb[124].mxu1 %v10995_v35  ;;  %6019 = vmatmul.mubr.bf16.gmra.mrb[120].mxu0 %v10995_v35 }
0x1ee6   :  { %v5755_v29 = vpop.f32.mrb[104].mxu1  ;;  %v5806_v31 = vpop.f32.mrb[100].mxu0 }
0x1ee7   :  { %v5757_v24 = vpop.f32.mrb[105].mxu1  ;;  %v11067_v37 = vpop.f32.mrb[101].mxu0 }
0x1ee8   :  { %v5759_v6 = vpop.f32.mrb[106].mxu1  ;;  %v5810_v50 = vpop.f32.mrb[102].mxu0 }
0x1ee9   :  { %v6027_v25 = vpack.c.bf16 %v5759_v6, %v5755_v29  ;;  %v6114_v30 = vpack.c.bf16 %v5810_v50, %v5806_v31  ;;  %v5761_v33 = vpop.f32.mrb[107].mxu1  ;;  %v11069_v40 = vpop.f32.mrb[103].mxu0 }
0x1eea   :  { %v6029_v4 = vpack.c.bf16 %v5761_v33, %v5757_v24  ;;  %v6175_v55 = vpack.c.bf16 %v11069_v40, %v11067_v37  ;;  %v9724_v37 = vld [vmem:[%s10677_s13 + $0x158] sm:$0xff]   ;;  %v9725_v40 = vld [vmem:[%s10677_s13 + $0x160] sm:$0xff]  }
0x1eeb   :  { %8914 = vmatprep.mubr.bf16.mxu1 %v6027_v25 }
0x1eec   :  { %8910 = vmatprep.subr.bf16.mxu1 %v6029_v4 }
0x1eed   :  { %8911 = vmatpush3.bf16.xpose.msra.mxu1 %v6029_v4 }
0x1eee   :  { %v5765_v35 = vpop.f32.mrb[108].mxu1  ;;  %v5816_v43 = vpop.f32.mrb[104].mxu0 }
0x1eef   :  { %v5767_v46 = vpop.f32.mrb[109].mxu1  ;;  %v11073_v47 = vpop.f32.mrb[105].mxu0  ;;  %v6028_v27 = vpack.c.bf16 %v5765_v35, %v5765_v35  ;;  %v6115_v22 = vpack.c.bf16 %v5816_v43, %v5816_v43 }
0x1ef0   :  { %v6030_v51 = vpack.c.bf16 %v5767_v46, %v5767_v46  ;;  %v5769_v49 = vpop.f32.mrb[110].mxu1  ;;  %v5820_v7 = vpop.f32.mrb[106].mxu0 }
0x1ef1   :  { %v5770_v16 = vpop.f32.mrb[111].mxu1  ;;  %v5821_v26 = vpop.f32.mrb[107].mxu0  ;;  %v6123_v36 = vsel %vm136_vm0, %v6115_v22, 0 }
0x1ef2   :  { %8912 = vmatprep.subr.bf16.mxu1 %v6030_v51 }
0x1ef5   :  { %8913 = vmatpush3.bf16.xpose.msra.mxu1 %v6030_v51 }
0x1ef6   :  { %8918 = vmatprep.subr.bf16.mxu1 %v6114_v30 }
0x1efc   :  { %8915 = vmatmul.mubr.bf16.vlgmr.msra.gmra.mrb[128].mxu1 %v6028_v27 }
0x1efd   :  { %8919 = vmatpush3.bf16.msra.mxu1 %v6114_v30 }
0x1efe   :  { %9098 = vmatprep.subr.msk.bf16.mxu1 %vm136_vm0, %v6115_v22 }
0x1f01   :  { %8921 = vmatpush3.bf16.msra.mxu1 %v6123_v36 }
0x1f06   :  { %v5857_v41 = vpop.f32.mrb[112].mxu1  ;;  %v11077_v8 = vpop.f32.mrb[108].mxu0 }
0x1f07   :  { %v5859_v42 = vpop.f32.mrb[113].mxu1  ;;  %v5910_v44 = vpop.f32.mrb[109].mxu0 }
0x1f08   :  { %v5861_v13 = vpop.f32.mrb[114].mxu1  ;;  %v11079_v34 = vpop.f32.mrb[110].mxu0 }
0x1f09   :  { %v11081_v48 = vpack.c.bf16 %v5861_v13, %v5857_v41  ;;  %v6515_v53 = vpack.c.bf16 %v11079_v34, %v11077_v8  ;;  %v5863_v10 = vpop.f32.mrb[115].mxu1  ;;  %v5914_v9 = vpop.f32.mrb[111].mxu0 }
0x1f0a   :  { %v6262_v63 = vpack.c.bf16 %v5863_v10, %v5859_v42  ;;  %v11085_v52 = vpack.c.bf16 %v5914_v9, %v5910_v44 }
0x1f0b   :  { %8926 = vmatprep.subr.bf16.mxu1 %v11081_v48 }
0x1f0c   :  { %8934 = vmatprep.subr.bf16.mxu0 %v6262_v63 }
0x1f0d   :  { %8935 = vmatpush3.bf16.msra.mxu0 %v6262_v63 }
0x1f0e   :  { %v11088_v56 = vpop.f32.mrb[116].mxu1  ;;  %v11090_v21 = vpop.f32.mrb[112].mxu0 }
0x1f0f   :  { %v5869_v45 = vpop.f32.mrb[117].mxu1  ;;  %v11092_v3 = vpop.f32.mrb[113].mxu0 }
0x1f10   :  { %v6263_v57 = vpack.c.bf16 %v5869_v45, %v5869_v45  ;;  %v5871_v54 = vpop.f32.mrb[118].mxu1  ;;  %v5922_v59 = vpop.f32.mrb[114].mxu0 }
0x1f11   :  { %v5872_v14 = vpop.f32.mrb[119].mxu1  ;;  %v5923_v61 = vpop.f32.mrb[115].mxu0 }
0x1f12   :  { %v6271_v17 = vsel %vm136_vm0, %v6263_v57, 0  ;;  %9099 = vmatprep.subr.msk.bf16.mxu0 %vm136_vm0, %v6263_v57 }
0x1f13   :  { %8937 = vmatpush3.bf16.msra.mxu0 %v6271_v17 }
0x1f26   :  { %v5959_v19 = vpop.f32.mrb[120].mxu1  ;;  %v6010_v1 = vpop.f32.mrb[116].mxu0 }
0x1f27   :  { %v11096_v62 = vpop.f32.mrb[121].mxu1  ;;  %v6012_v58 = vpop.f32.mrb[117].mxu0 }
0x1f28   :  { %v5963_v28 = vpop.f32.mrb[122].mxu1  ;;  %v6014_v5 = vpop.f32.mrb[118].mxu0 }
0x1f29   :  { %v11098_v60 = vpack.c.bf16 %v5963_v28, %v5959_v19  ;;  %v11100_v12 = vpack.c.bf16 %v6014_v5, %v6010_v1  ;;  %v11102_v15 = vpop.f32.mrb[123].mxu1  ;;  %v6016_v23 = vpop.f32.mrb[119].mxu0 }
0x1f2a   :  { %v6762_v20 = vpack.c.bf16 %v11102_v15, %v11096_v62  ;;  %v11106_v29 = vpack.c.bf16 %v6016_v23, %v6012_v58 }
0x1f2e   :  { %v11108_v31 = vpop.f32.mrb[124].mxu1  ;;  %v11110_v24 = vpop.f32.mrb[120].mxu0 }
0x1f2f   :  { %v11112_v6 = vpop.f32.mrb[125].mxu1  ;;  %v11114_v50 = vpop.f32.mrb[121].mxu0 }
0x1f30   :  { %v5973_v25 = vpop.f32.mrb[126].mxu1  ;;  %v6024_v30 = vpop.f32.mrb[122].mxu0 }
0x1f31   :  { %v5974_v33 = vpop.f32.mrb[127].mxu1  ;;  %v6025_v4 = vpop.f32.mrb[123].mxu0 }
0x1fcf   :  { %v8916_v35 = vpop.f32.mrb[128].mxu1 }
0x1fd0   :  { %v6065_v43 = vpop.f32.mrb[129].mxu1  ;;  %v6074_v7 = vadd.f32 %v8916_v35, %v10751_v2 }
0x1fd1   :  { %v6066_v46 = vadd.f32 %v6065_v43, %v10747_v11  ;;  %v8917_v51 = vpop.f32.mrb[130].mxu1  ;;  %v6178_v43 = vpack.c.bf16 %v11088_v56, %v11088_v56  ;;  %v9727_v56 = vld [vmem:[%s10677_s13 + $0x170] sm:$0xff]  }
0x1fd2   :  { %v6068_v49 = vpop.f32.mrb[131].mxu1  ;;  %v6085_v22 = vsel %vm3795_vm6, %v6074_v7, -inf  ;;  %v6176_v51 = vpack.c.bf16 %v11073_v47, %v11073_v47  ;;  %v9728_v47 = vld [vmem:[%s10677_s13 + $0x178] sm:$0xff]  }
0x1fd3   :  { %v6069_v16 = vadd.f32 %v6068_v49, %v10749_v18  ;;  %v6079_v26 = vsel %vm3795_vm6, %v6066_v46, -inf  ;;  %v9722_v49 = vld [vmem:[%s10677_s13 + $0x148] sm:$0xff]  }
0x1fd4   :  { %6080 = vmax.xlane.f32.xlu0 %v6079_v26 }
0x1fd5   :  { %v6082_v27 = vsel %vm3795_vm6, %v6069_v16, -inf }
0x1fd6   :  { %6083 = vmax.xlane.f32.xlu1 %v6082_v27 }
0x1fd8   :  { %6086 = vmax.xlane.f32.xlu0 %v6085_v22 }
0x2061   :  { %v6081_v36 = vpop.xlane.xlu0 %6080 }
0x2062   :  { %v6088_v41 = vsub.f32 %v6066_v46, %v6081_v36  ;;  %v9721_v46 = vld [vmem:[%s10677_s13 + $0x140] sm:$0xff]  }
0x2063   :  { %v6084_v42 = vpop.xlane.xlu1 %6083 }
0x2064   :  { %v6091_v44 = vmul.f32 1.442695, %v6088_v41  ;;  %v6089_v13 = vsub.f32 %v6069_v16, %v6084_v42 }
0x2065   :  { %v6087_v10 = vpop.xlane.xlu0 %6086 }
0x2066   :  { %9897 = vpow2.f32 %v6091_v44  ;;  %v6093_v9 = vmul.f32 1.442695, %v6089_v13  ;;  %v6090_v63 = vsub.f32 %v6074_v7, %v6087_v10 }
0x2068   :  { %9899 = vpow2.f32 %v6093_v9  ;;  %v6095_v45 = vmul.f32 1.442695, %v6090_v63 }
0x206a   :  { %9901 = vpow2.f32 %v6095_v45 }
0x2070   :  { %v9898_v57 = vpop.eup %9897 }
0x2071   :  { %v6097_v54 = vsel %vm3795_vm6, %v9898_v57, 0.0 }
0x2072   :  { %v9900_v59 = vpop.eup %9899  ;;  %6098 = vadd.xlane.f32.xlu1 %v6097_v54 }
0x2073   :  { %v6100_v14 = vsel %vm3795_vm6, %v9900_v59, 0.0 }
0x2074   :  { %v9902_v61 = vpop.eup %9901  ;;  %6101 = vadd.xlane.f32.xlu0 %v6100_v14 }
0x2075   :  { %v6103_v17 = vsel %vm3795_vm6, %v9902_v61, 0.0 }
0x2076   :  { %6104 = vadd.xlane.f32.xlu1 %v6103_v17 }
0x20ff   :  { %v6099_v19 = vpop.xlane.xlu1 %6098 }
0x2100   :  { %9903 = vrcp.f32 %v6099_v19 }
0x2101   :  { %v6102_v1 = vpop.xlane.xlu0 %6101 }
0x2102   :  { %9905 = vrcp.f32 %v6102_v1 }
0x2103   :  { %v6105_v58 = vpop.xlane.xlu1 %6104 }
0x2104   :  { %9907 = vrcp.f32 %v6105_v58 }
0x210a   :  { %v9904_v28 = vpop.eup %9903 }
0x210b   :  { %v6109_v23 = vmul.f32 %v9904_v28, %v9898_v57 }
0x210c   :  { %v9906_v5 = vpop.eup %9905 }
0x210d   :  { %v6110_v25 = vmul.f32 %v9906_v5, %v9900_v59 }
0x210e   :  { %v9908_v30 = vpop.eup %9907 }
0x210f   :  { %v6111_v33 = vmul.f32 %v9908_v30, %v9902_v61  ;;  %v6112_v4 = vpack.c.bf16 %v6110_v25, %v6109_v23 }
0x2111   :  { %8922 = vmatprep.mubr.msk.bf16.mxu1 %vm3795_vm6, %v6112_v4  ;;  %v6113_v35 = vpack.c.bf16 %v6111_v33, %v6111_v33 }
0x2113   :  { %8923 = vmatmul.mubr.msk.bf16.vlgmr.msra.gmra.mrb[132].mxu1 %vm3795_vm6, %v6113_v35  ;;  %v9729_v35 = vld [vmem:[%s10677_s13 + $0x100] sm:$0xff]  }
0x2114   :  { %8927 = vmatpush3.bf16.xpose.msra.mxu1 %v11081_v48  ;;  %8930 = vmatprep.mubr.bf16.mxu1 %v6175_v55  ;;  %v9723_v48 = vld [vmem:[%s10677_s13 + $0x150] sm:$0xff]   ;;  %v9726_v55 = vld [vmem:[%s10677_s13 + $0x168] sm:$0xff]  }
0x2115   :  { %8928 = vmatprep.subr.bf16.mxu1 %v6178_v43  ;;  %8962 = vmatprep.subr.bf16.mxu0 %v9729_v35 }
0x211c   :  { %8929 = vmatpush3.bf16.xpose.msra.mxu1 %v6178_v43 }
0x211d   :  { %8942 = vmatprep.subr.bf16.mxu1 %v9721_v46 }
0x2123   :  { %8931 = vmatmul.mubr.bf16.vlgmr.msra.gmra.mrb[136].mxu1 %v6176_v51 }
0x2124   :  { %8943 = vmatpush3.bf16.msra.mxu1 %v9721_v46 }
0x2125   :  { %8944 = vmatprep.subr.bf16.mxu1 %v9722_v49 }
0x2128   :  { %8945 = vmatpush3.bf16.msra.mxu1 %v9722_v49 }
0x2129   :  { %8946 = vmatprep.subr.bf16.mxu1 %v9723_v48 }
0x212c   :  { %8947 = vmatpush3.bf16.msra.mxu1 %v9723_v48 }
0x212d   :  { %8948 = vmatprep.subr.bf16.mxu1 %v9724_v37 }
0x2130   :  { %8949 = vmatpush3.bf16.msra.mxu1 %v9724_v37 }
0x2131   :  { %8950 = vmatprep.subr.bf16.mxu1 %v9725_v40 }
0x2134   :  { %8951 = vmatpush3.bf16.msra.mxu1 %v9725_v40 }
0x2135   :  { %8952 = vmatprep.subr.bf16.mxu1 %v9726_v55 }
0x2138   :  { %8953 = vmatpush3.bf16.msra.mxu1 %v9726_v55 }
0x2139   :  { %8954 = vmatprep.subr.bf16.mxu1 %v9727_v56 }
0x213c   :  { %8955 = vmatpush3.bf16.msra.mxu1 %v9727_v56 }
0x213d   :  { %8956 = vmatprep.subr.bf16.mxu1 %v9728_v47 }
0x2140   :  { %8957 = vmatpush3.bf16.msra.mxu1 %v9728_v47 }
0x2141   :  { %8982 = vmatprep.subr.bf16.mxu1 %v11085_v52 }
0x21e6   :  { %v11144_v7 = vpop.f32.mrb[132].mxu1 }
0x21e7   :  { %v6159_v16 = vpop.f32.mrb[133].mxu1 }
0x21e8   :  { %v8925_v26 = vpop.f32.mrb[134].mxu1 }
0x21e9   :  { %v6162_v27 = vpop.f32.mrb[135].mxu1  ;;  %v9730_v26 = vld [vmem:[%s10677_s13 + $0x108] sm:$0xff]  }
0x21ea   :  { %v6173_v22 = vpack.c.bf16 %v6162_v27, %v6159_v16  ;;  %v9731_v27 = vld [vmem:[%s10677_s13 + $0x110] sm:$0xff]  }
0x21f6   :  { %v8932_v36 = vpop.f32.mrb[136].mxu1 }
0x21f7   :  { %v6213_v41 = vpop.f32.mrb[137].mxu1  ;;  %v6222_v10 = vadd.f32 %v8932_v36, %v10751_v2  ;;  %v9732_v36 = vld [vmem:[%s10677_s13 + $0x118] sm:$0xff]  }
0x21f8   :  { %v6214_v42 = vadd.f32 %v6213_v41, %v10747_v11  ;;  %v8933_v44 = vpop.f32.mrb[138].mxu1  ;;  %v9733_v41 = vld [vmem:[%s10677_s13 + $0x120] sm:$0xff]  }
0x21f9   :  { %v6216_v13 = vpop.f32.mrb[139].mxu1  ;;  %v6233_v57 = vsel %vm3795_vm6, %v6222_v10, -inf  ;;  %v9735_v44 = vld [vmem:[%s10677_s13 + $0x130] sm:$0xff]  }
0x21fa   :  { %v6217_v9 = vadd.f32 %v6216_v13, %v10749_v18  ;;  %v6227_v63 = vsel %vm3795_vm6, %v6214_v42, -inf  ;;  %v9736_v13 = vld [vmem:[%s10677_s13 + $0x138] sm:$0xff]  }
0x21fb   :  { %6228 = vmax.xlane.f32.xlu0 %v6227_v63 }
0x21fc   :  { %v6230_v45 = vsel %vm3795_vm6, %v6217_v9, -inf }
0x21fd   :  { %6231 = vmax.xlane.f32.xlu1 %v6230_v45 }
0x21ff   :  { %6234 = vmax.xlane.f32.xlu0 %v6233_v57 }
0x2288   :  { %v6229_v54 = vpop.xlane.xlu0 %6228 }
0x2289   :  { %v6236_v59 = vsub.f32 %v6214_v42, %v6229_v54  ;;  %v9734_v42 = vld [vmem:[%s10677_s13 + $0x128] sm:$0xff]  }
0x228a   :  { %v6232_v14 = vpop.xlane.xlu1 %6231 }
0x228b   :  { %v6239_v61 = vmul.f32 1.442695, %v6236_v59  ;;  %v6237_v17 = vsub.f32 %v6217_v9, %v6232_v14 }
0x228c   :  { %v6235_v19 = vpop.xlane.xlu0 %6234 }
0x228d   :  { %9909 = vpow2.f32 %v6239_v61  ;;  %v6241_v1 = vmul.f32 1.442695, %v6237_v17  ;;  %v6238_v58 = vsub.f32 %v6222_v10, %v6235_v19  ;;  %v6603_v10 = vpack.c.bf16 %v11108_v31, %v11108_v31 }
0x228e   :  { %v6765_v31 = vpack.c.bf16 %v11110_v24, %v11110_v24 }
0x228f   :  { %9911 = vpow2.f32 %v6241_v1  ;;  %v6243_v28 = vmul.f32 1.442695, %v6238_v58  ;;  %v6611_v9 = vsel %vm136_vm0, %v6603_v10, 0 }
0x2291   :  { %9913 = vpow2.f32 %v6243_v28 }
0x2297   :  { %v9910_v5 = vpop.eup %9909 }
0x2298   :  { %v6245_v23 = vsel %vm3795_vm6, %v9910_v5, 0.0 }
0x2299   :  { %v9912_v25 = vpop.eup %9911  ;;  %6246 = vadd.xlane.f32.xlu1 %v6245_v23 }
0x229a   :  { %v6248_v30 = vsel %vm3795_vm6, %v9912_v25, 0.0 }
0x229b   :  { %v9914_v33 = vpop.eup %9913  ;;  %6249 = vadd.xlane.f32.xlu0 %v6248_v30 }
0x229c   :  { %v6251_v4 = vsel %vm3795_vm6, %v9914_v33, 0.0 }
0x229d   :  { %6252 = vadd.xlane.f32.xlu1 %v6251_v4 }
0x2326   :  { %v6247_v43 = vpop.xlane.xlu1 %6246 }
0x2327   :  { %9915 = vrcp.f32 %v6247_v43 }
0x2328   :  { %v6250_v46 = vpop.xlane.xlu0 %6249 }
0x2329   :  { %9917 = vrcp.f32 %v6250_v46 }
0x232a   :  { %v6253_v51 = vpop.xlane.xlu1 %6252 }
0x232b   :  { %9919 = vrcp.f32 %v6253_v51 }
0x2331   :  { %v9916_v49 = vpop.eup %9915 }
0x2332   :  { %v6257_v37 = vmul.f32 %v9916_v49, %v9910_v5 }
0x2333   :  { %v9918_v48 = vpop.eup %9917 }
0x2334   :  { %v6258_v40 = vmul.f32 %v9918_v48, %v9912_v25 }
0x2335   :  { %v9920_v55 = vpop.eup %9919 }
0x2336   :  { %v6259_v56 = vmul.f32 %v9920_v55, %v9914_v33  ;;  %v6260_v47 = vpack.c.bf16 %v6258_v40, %v6257_v37 }
0x2338   :  { %v6261_v16 = vpack.c.bf16 %v6259_v56, %v6259_v56  ;;  %8938 = vmatprep.mubr.msk.bf16.mxu0 %vm3795_vm6, %v6260_v47 }
0x233a   :  { %8939 = vmatmul.mubr.msk.bf16.vlgmr.msra.gmra.mrb[124].mxu0 %vm3795_vm6, %v6261_v16 }
0x233b   :  { %8963 = vmatpush3.bf16.msra.mxu0 %v9729_v35  ;;  %8978 = vmatprep.mubr.bf16.mxu0 %v6173_v22  ;;  %v6174_v22 = vpack.c.bf16 %v11144_v7, %v11144_v7  ;;  %v6518_v7 = vpack.c.bf16 %v11092_v3, %v11092_v3  ;;  %v6850_v3 = vpack.c.bf16 %v11114_v50, %v11114_v50 }
0x233c   :  { %8964 = vmatprep.subr.bf16.mxu0 %v9730_v26 }
0x233d   :  { %v6858_v62 = vsel %vm136_vm0, %v6850_v3, 0 }
0x233f   :  { %8965 = vmatpush3.bf16.msra.mxu0 %v9730_v26 }
0x2340   :  { %8966 = vmatprep.subr.bf16.mxu0 %v9731_v27 }
0x2343   :  { %8967 = vmatpush3.bf16.msra.mxu0 %v9731_v27 }
0x2344   :  { %8968 = vmatprep.subr.bf16.mxu0 %v9732_v36 }
0x2347   :  { %8969 = vmatpush3.bf16.msra.mxu0 %v9732_v36 }
0x2348   :  { %8970 = vmatprep.subr.bf16.mxu0 %v9733_v41 }
0x234b   :  { %8971 = vmatpush3.bf16.msra.mxu0 %v9733_v41 }
0x234c   :  { %8972 = vmatprep.subr.bf16.mxu0 %v9734_v42 }
0x234f   :  { %8973 = vmatpush3.bf16.msra.mxu0 %v9734_v42 }
0x2350   :  { %8974 = vmatprep.subr.bf16.mxu0 %v9735_v44 }
0x2353   :  { %8975 = vmatpush3.bf16.msra.mxu0 %v9735_v44 }
0x2354   :  { %8976 = vmatprep.subr.bf16.mxu0 %v9736_v13 }
0x2357   :  { %8977 = vmatpush3.bf16.msra.mxu0 %v9736_v13 }
0x2358   :  { %8990 = vmatprep.subr.bf16.mxu0 %v11098_v60 }
0x235a   :  { %8979 = vmatmul.mubr.bf16.vlgmr.msra.gmra.mrb[128].mxu0 %v6174_v22 }
0x235b   :  { %8991 = vmatpush3.bf16.msra.mxu0 %v11098_v60  ;;  %v6516_v60 = vpack.c.bf16 %v11090_v21, %v11090_v21  ;;  %v6763_v21 = vpack.c.bf16 %v11112_v6, %v11112_v6 }
0x235c   :  { %9100 = vmatprep.subr.msk.bf16.mxu0 %vm136_vm0, %v6603_v10 }
0x235f   :  { %8993 = vmatpush3.bf16.msra.mxu0 %v6611_v9 }
0x240d   :  { %v8940_v63 = vpop.f32.mrb[124].mxu0 }
0x240e   :  { %v6307_v45 = vpop.f32.mrb[125].mxu0  ;;  %v6322_v14 = vpack.c.bf16 %v8940_v63, %v8940_v63 }
0x240f   :  { %v8941_v57 = vpop.f32.mrb[126].mxu0 }
0x2410   :  { %v6310_v54 = vpop.f32.mrb[127].mxu0 }
0x2411   :  { %v6321_v59 = vpack.c.bf16 %v6310_v54, %v6307_v45 }
0x2413   :  { %8958 = vmatprep.mubr.bf16.mxu1 %v6321_v59 }
0x2414   :  { %8959 = vmatmul.mubr.bf16.vlgmr.msra.gmra.mrb[140].mxu1 %v6322_v14 }
0x2415   :  { %8983 = vmatpush3.bf16.xpose.msra.mxu1 %v11085_v52  ;;  %8986 = vmatprep.mubr.bf16.mxu1 %v6515_v53 }
0x2416   :  { %8984 = vmatprep.subr.bf16.mxu1 %v6518_v7 }
0x241d   :  { %8985 = vmatpush3.bf16.xpose.msra.mxu1 %v6518_v7 }
0x241e   :  { %9018 = vmatprep.subr.bf16.mxu1 %v11100_v12 }
0x2424   :  { %8987 = vmatmul.mubr.bf16.vlgmr.msra.gmra.mrb[144].mxu1 %v6516_v60 }
0x2425   :  { %9019 = vmatpush3.bf16.xpose.msra.mxu1 %v11100_v12  ;;  %9022 = vmatprep.mubr.bf16.mxu1 %v6762_v20 }
0x2426   :  { %9020 = vmatprep.subr.bf16.mxu1 %v6765_v31 }
0x242d   :  { %v8980_v8 = vpop.f32.mrb[128].mxu0  ;;  %9021 = vmatpush3.bf16.xpose.msra.mxu1 %v6765_v31 }
0x242e   :  { %v6501_v34 = vpop.f32.mrb[129].mxu0  ;;  %9026 = vmatprep.subr.bf16.mxu1 %v11106_v29 }
0x242f   :  { %v8981_v53 = vpop.f32.mrb[130].mxu0 }
0x2430   :  { %v6504_v52 = vpop.f32.mrb[131].mxu0 }
0x2434   :  { %9023 = vmatmul.mubr.bf16.vlgmr.msra.gmra.mrb[148].mxu1 %v6763_v21  ;;  %v9737_v21 = vld [vmem:[%s10677_s13 + $0x180] sm:$0xff]  }
0x2435   :  { %9027 = vmatpush3.bf16.msra.mxu1 %v11106_v29  ;;  %8998 = vmatprep.subr.bf16.mxu0 %v9737_v21 }
0x2436   :  { %9101 = vmatprep.subr.msk.bf16.mxu1 %vm136_vm0, %v6850_v3  ;;  %v9742_v3 = vld [vmem:[%s10677_s13 + $0x1c0] sm:$0xff]  }
0x2439   :  { %9029 = vmatpush3.bf16.msra.mxu1 %v6858_v62 }
0x243a   :  { %9034 = vmatprep.subr.bf16.mxu1 %v9742_v3 }
0x24e7   :  { %v8960_v12 = vpop.f32.mrb[140].mxu1 }
0x24e8   :  { %v11196_v15 = vadd.f32 %v8980_v8, %v8960_v12  ;;  %v6405_v20 = vpop.f32.mrb[141].mxu1 }
0x24e9   :  { %v11198_v24 = vadd.f32 %v6501_v34, %v6405_v20  ;;  %v8961_v61 = vpop.f32.mrb[142].mxu1 }
0x24ea   :  { %v6408_v17 = vpop.f32.mrb[143].mxu1 }
0x24eb   :  { %v11200_v6 = vadd.f32 %v6504_v52, %v6408_v17 }
0x24f7   :  { %v8988_v19 = vpop.f32.mrb[144].mxu1 }
0x24f8   :  { %v6562_v50 = vadd.f32 %v8988_v19, %v10751_v2  ;;  %v6553_v1 = vpop.f32.mrb[145].mxu1 }
0x24f9   :  { %v8989_v29 = vpop.f32.mrb[146].mxu1  ;;  %v6554_v58 = vadd.f32 %v6553_v1, %v10747_v11 }
0x24fa   :  { %v6556_v28 = vpop.f32.mrb[147].mxu1  ;;  %v6573_v5 = vsel %vm3795_vm6, %v6562_v50, -inf }
0x24fb   :  { %v6557_v23 = vadd.f32 %v6556_v28, %v10749_v18  ;;  %6574 = vmax.xlane.f32.xlu0 %v6573_v5  ;;  %v6567_v30 = vsel %vm3795_vm6, %v6554_v58, -inf }
0x24fd   :  { %v6570_v25 = vsel %vm3795_vm6, %v6557_v23, -inf }
0x24fe   :  { %6571 = vmax.xlane.f32.xlu1 %v6570_v25  ;;  %v9738_v25 = vld [vmem:[%s10677_s13 + $0x188] sm:$0xff]  }
0x24ff   :  { %6568 = vmax.xlane.f32.xlu0 %v6567_v30 }
0x2507   :  { %v9024_v33 = vpop.f32.mrb[148].mxu1 }
0x2508   :  { %v6800_v4 = vpop.f32.mrb[149].mxu1  ;;  %v6809_v51 = vadd.f32 %v9024_v33, %v10751_v2  ;;  %v9739_v33 = vld [vmem:[%s10677_s13 + $0x190] sm:$0xff]  }
0x2509   :  { %v6801_v35 = vadd.f32 %v6800_v4, %v10747_v11  ;;  %v9025_v43 = vpop.f32.mrb[150].mxu1  ;;  %v9740_v4 = vld [vmem:[%s10677_s13 + $0x198] sm:$0xff]  }
0x250a   :  { %v6803_v46 = vpop.f32.mrb[151].mxu1  ;;  %v6820_v40 = vsel %vm3795_vm6, %v6809_v51, -inf }
0x250b   :  { %v6804_v49 = vadd.f32 %v6803_v46, %v10749_v18  ;;  %v6814_v48 = vsel %vm3795_vm6, %v6801_v35, -inf }
0x250c   :  { %6815 = vmax.xlane.f32.xlu1 %v6814_v48 }
0x250d   :  { %v6817_v37 = vsel %vm3795_vm6, %v6804_v49, -inf }
0x250e   :  { %6818 = vmax.xlane.f32.xlu0 %v6817_v37 }
0x2510   :  { %6821 = vmax.xlane.f32.xlu1 %v6820_v40 }
0x2588   :  { %v6575_v55 = vpop.xlane.xlu0 %6574 }
0x2589   :  { %v6578_v56 = vsub.f32 %v6562_v50, %v6575_v55 }
0x258b   :  { %v6583_v47 = vmul.f32 1.442695, %v6578_v56  ;;  %v6572_v16 = vpop.xlane.xlu1 %6571  ;;  %v9743_v56 = vld [vmem:[%s10677_s13 + $0x1a8] sm:$0xff]  }
0x258c   :  { %v6577_v11 = vsub.f32 %v6557_v23, %v6572_v16  ;;  %v6569_v26 = vpop.xlane.xlu0 %6568  ;;  %v9745_v16 = vld [vmem:[%s10677_s13 + $0x1b0] sm:$0xff]  }
0x258d   :  { %9921 = vpow2.f32 %v6583_v47  ;;  %v6576_v27 = vsub.f32 %v6554_v58, %v6569_v26  ;;  %v9744_v47 = vld [vmem:[%s10677_s13 + $0x1c8] sm:$0xff]   ;;  %v9747_v26 = vld [vmem:[%s10677_s13 + $0x1b8] sm:$0xff]  }
0x258e   :  { %v6581_v2 = vmul.f32 1.442695, %v6577_v11  ;;  %v9746_v11 = vld [vmem:[%s10677_s13 + $0x1d0] sm:$0xff]  }
0x258f   :  { %v6579_v36 = vmul.f32 1.442695, %v6576_v27  ;;  %v9748_v27 = vld [vmem:[%s10677_s13 + $0x1d8] sm:$0xff]  }
0x2590   :  { %9923 = vpow2.f32 %v6581_v2  ;;  %v9749_v2 = vld [vmem:[%s10677_s13 + $0x1e0] sm:$0xff]  }
0x2591   :  { %9925 = vpow2.f32 %v6579_v36  ;;  %v9750_v36 = vld [vmem:[%s10677_s13 + $0x1e8] sm:$0xff]  }
0x2597   :  { %v9922_v18 = vpop.eup %9921 }
0x2598   :  { %v6591_v41 = vsel %vm3795_vm6, %v9922_v18, 0.0 }
0x2599   :  { %v6816_v42 = vpop.xlane.xlu1 %6815  ;;  %6592 = vadd.xlane.f32.xlu0 %v6591_v41  ;;  %v9752_v41 = vld [vmem:[%s10677_s13 + $0x1f8] sm:$0xff]  }
0x259a   :  { %v9924_v44 = vpop.eup %9923  ;;  %v6823_v13 = vsub.f32 %v6801_v35, %v6816_v42 }
0x259b   :  { %v9926_v22 = vpop.eup %9925  ;;  %v6819_v10 = vpop.xlane.xlu0 %6818  ;;  %v6588_v9 = vsel %vm3795_vm6, %v9924_v44, 0.0 }
0x259c   :  { %v6826_v63 = vmul.f32 1.442695, %v6823_v13  ;;  %v6824_v45 = vsub.f32 %v6804_v49, %v6819_v10  ;;  %6589 = vadd.xlane.f32.xlu1 %v6588_v9  ;;  %v6585_v57 = vsel %vm3795_vm6, %v9926_v22, 0.0  ;;  %v9741_v49 = vld [vmem:[%s10677_s13 + $0x1a0] sm:$0xff]  }
0x259d   :  { %v6822_v54 = vpop.xlane.xlu1 %6821  ;;  %6586 = vadd.xlane.f32.xlu0 %v6585_v57 }
0x259e   :  { %9927 = vpow2.f32 %v6826_v63  ;;  %v6828_v59 = vmul.f32 1.442695, %v6824_v45  ;;  %v6825_v14 = vsub.f32 %v6809_v51, %v6822_v54 }
0x25a0   :  { %9929 = vpow2.f32 %v6828_v59  ;;  %v6830_v7 = vmul.f32 1.442695, %v6825_v14 }
0x25a2   :  { %9931 = vpow2.f32 %v6830_v7  ;;  %v9753_v7 = vld [vmem:[%s10865_s16 + $0x80] ss:$8 sps:$4 sm:$0xff]  }
0x25a8   :  { %v9928_v60 = vpop.eup %9927 }
0x25a9   :  { %v6832_v31 = vsel %vm3795_vm6, %v9928_v60, 0.0 }
0x25aa   :  { %v9930_v8 = vpop.eup %9929  ;;  %6833 = vadd.xlane.f32.xlu1 %v6832_v31  ;;  %v9758_v31 = vld [vmem:[%s10865_s16 + $0x94] ss:$8 sps:$4 sm:$0xff]  }
0x25ab   :  { %v6835_v34 = vsel %vm3795_vm6, %v9930_v8, 0.0 }
0x25ac   :  { %v9932_v53 = vpop.eup %9931  ;;  %6836 = vadd.xlane.f32.xlu0 %v6835_v34  ;;  %v9761_v34 = vld [vmem:[%s10865_s16 + $0xa4] ss:$8 sps:$4 sm:$0xff]  }
0x25ad   :  { %v6838_v52 = vsel %vm3795_vm6, %v9932_v53, 0.0 }
0x25ae   :  { %6839 = vadd.xlane.f32.xlu1 %v6838_v52 }
0x2626   :  { %v6593_v62 = vpop.xlane.xlu0 %6592 }
0x2627   :  { %9933 = vrcp.f32 %v6593_v62 }
0x2629   :  { %v6590_v12 = vpop.xlane.xlu1 %6589 }
0x262a   :  { %9935 = vrcp.f32 %v6590_v12  ;;  %v6587_v20 = vpop.xlane.xlu0 %6586 }
0x262b   :  { %9937 = vrcp.f32 %v6587_v20 }
0x2631   :  { %v9934_v61 = vpop.eup %9933 }
0x2632   :  { %v6599_v50 = vmul.f32 %v9934_v61, %v9922_v18  ;;  %v9751_v18 = vld [vmem:[%s10677_s13 + $0x1f0] sm:$0xff]  }
0x2634   :  { %v9936_v17 = vpop.eup %9935  ;;  %v6601_v23 = vpack.c.bf16 %v6599_v50, %v6599_v50 }
0x2635   :  { %v9938_v19 = vpop.eup %9937  ;;  %v6598_v1 = vmul.f32 %v9936_v17, %v9924_v44 }
0x2636   :  { %v6597_v29 = vmul.f32 %v9938_v19, %v9926_v22 }
0x2637   :  { %v6834_v58 = vpop.xlane.xlu1 %6833 }
0x2638   :  { %9939 = vrcp.f32 %v6834_v58  ;;  %v6600_v28 = vpack.c.bf16 %v6598_v1, %v6597_v29 }
0x2639   :  { %v6837_v5 = vpop.xlane.xlu0 %6836 }
0x263a   :  { %9941 = vrcp.f32 %v6837_v5  ;;  %8994 = vmatprep.mubr.msk.bf16.mxu0 %vm3795_vm6, %v6600_v28 }
0x263b   :  { %v6840_v30 = vpop.xlane.xlu1 %6839  ;;  %8995 = vmatmul.mubr.msk.bf16.vlgmr.msra.gmra.mrb[132].mxu0 %vm3795_vm6, %v6601_v23 }
0x263c   :  { %9943 = vrcp.f32 %v6840_v30  ;;  %8999 = vmatpush3.bf16.msra.mxu0 %v9737_v21  ;;  %v9765_v30 = vld [vmem:[%s10865_s16 + $0xc0] ss:$8 sps:$4 sm:$0xff]  }
0x263d   :  { %9000 = vmatprep.subr.bf16.mxu0 %v9738_v25 }
0x2640   :  { %9001 = vmatpush3.bf16.msra.mxu0 %v9738_v25  ;;  %v9762_v25 = vld [vmem:[%s10865_s16 + $0xb0] ss:$8 sps:$4 sm:$0xff]  }
0x2641   :  { %9002 = vmatprep.subr.bf16.mxu0 %v9739_v33 }
0x2642   :  { %v9940_v35 = vpop.eup %9939 }
0x2643   :  { %v6844_v46 = vmul.f32 %v9940_v35, %v9928_v60  ;;  %v9755_v60 = vld [vmem:[%s10865_s16 + $0x84] ss:$8 sps:$4 sm:$0xff]  }
0x2644   :  { %v9942_v43 = vpop.eup %9941  ;;  %9003 = vmatpush3.bf16.msra.mxu0 %v9739_v33  ;;  %v9768_v33 = vld [vmem:[%s10865_s16 + $0xd0] ss:$8 sps:$4 sm:$0xff]   ;;  %v9773_v35 = vld [vmem:[%s10865_s16 + $0xe4] ss:$8 sps:$4 sm:$0xff]  }
0x2645   :  { %v6845_v51 = vmul.f32 %v9942_v43, %v9930_v8  ;;  %9004 = vmatprep.subr.bf16.mxu0 %v9740_v4  ;;  %v9756_v8 = vld [vmem:[%s10865_s16 + $0x90] ss:$8 sps:$4 sm:$0xff]   ;;  %v9771_v43 = vld [vmem:[%s10865_s16 + $0xe0] ss:$8 sps:$4 sm:$0xff]  }
0x2646   :  { %v9944_v48 = vpop.eup %9943 }
0x2647   :  { %v6846_v37 = vmul.f32 %v9944_v48, %v9932_v53  ;;  %v6847_v40 = vpack.c.bf16 %v6845_v51, %v6844_v46  ;;  %v9759_v53 = vld [vmem:[%s10865_s16 + $0xa0] ss:$8 sps:$4 sm:$0xff]   ;;  %v9776_v46 = vld [vmem:[%s10865_s16 + $0xf4] ss:$8 sps:$4 sm:$0xff]   ;;  %v9774_v51 = vld [vmem:[%s10865_s16 + $0xf0] ss:$8 sps:$4 sm:$0xff]  }
0x2648   :  { %9005 = vmatpush3.bf16.msra.mxu0 %v9740_v4  ;;  %v9770_v4 = vld [vmem:[%s10865_s16 + $0xd4] ss:$8 sps:$4 sm:$0xff]  }
0x2649   :  { %9030 = vmatprep.mubr.msk.bf16.mxu1 %vm3795_vm6, %v6847_v40  ;;  %v6848_v55 = vpack.c.bf16 %v6846_v37, %v6846_v37  ;;  %9006 = vmatprep.subr.bf16.mxu0 %v9741_v49 }
0x264b   :  { %9031 = vmatmul.mubr.msk.bf16.vlgmr.msra.gmra.mrb[152].mxu1 %vm3795_vm6, %v6848_v55 }
0x264c   :  { %9007 = vmatpush3.bf16.msra.mxu0 %v9741_v49  ;;  %9035 = vmatpush3.bf16.msra.mxu1 %v9742_v3 }
0x264d   :  { %9008 = vmatprep.subr.bf16.mxu0 %v9743_v56  ;;  %9036 = vmatprep.subr.bf16.mxu1 %v9744_v47 }
0x2650   :  { %9009 = vmatpush3.bf16.msra.mxu0 %v9743_v56  ;;  %9037 = vmatpush3.bf16.msra.mxu1 %v9744_v47 }
0x2651   :  { %9010 = vmatprep.subr.bf16.mxu0 %v9745_v16  ;;  %9038 = vmatprep.subr.bf16.mxu1 %v9746_v11 }
0x2654   :  { %9011 = vmatpush3.bf16.msra.mxu0 %v9745_v16  ;;  %9039 = vmatpush3.bf16.msra.mxu1 %v9746_v11 }
0x2655   :  { %9012 = vmatprep.subr.bf16.mxu0 %v9747_v26  ;;  %9040 = vmatprep.subr.bf16.mxu1 %v9748_v27 }
0x2658   :  { %9013 = vmatpush3.bf16.msra.mxu0 %v9747_v26  ;;  %9041 = vmatpush3.bf16.msra.mxu1 %v9748_v27 }
0x2659   :  { %9042 = vmatprep.subr.bf16.mxu1 %v9749_v2  ;;  %7140 = vmatprep.subr.bf16.mxu0 %v9755_v60 }
0x265c   :  { %9043 = vmatpush3.bf16.msra.mxu1 %v9749_v2 }
0x265d   :  { %9044 = vmatprep.subr.bf16.mxu1 %v9750_v36 }
0x2660   :  { %9045 = vmatpush3.bf16.msra.mxu1 %v9750_v36  ;;  %v8178_v36 = vld [vmem:[%s10904_s20 + $0x1] ss:$0 sm:$0xff] }
0x2661   :  { %9046 = vmatprep.subr.bf16.mxu1 %v9751_v18 }
0x2664   :  { %9047 = vmatpush3.bf16.msra.mxu1 %v9751_v18 }
0x2665   :  { %9048 = vmatprep.subr.bf16.mxu1 %v9752_v41 }
0x2668   :  { %9049 = vmatpush3.bf16.msra.mxu1 %v9752_v41 }
0x270e   :  { %v8996_v42 = vpop.f32.mrb[132].mxu0 }
0x270f   :  { %v6647_v44 = vpop.f32.mrb[133].mxu0  ;;  %v6662_v9 = vpack.c.bf16 %v8996_v42, %v8996_v42 }
0x2710   :  { %v8997_v13 = vpop.f32.mrb[134].mxu0 }
0x2711   :  { %v6650_v22 = vpop.f32.mrb[135].mxu0 }
0x2712   :  { %v6661_v10 = vpack.c.bf16 %v6650_v22, %v6647_v44 }
0x2714   :  { %9014 = vmatprep.mubr.bf16.mxu0 %v6661_v10 }
0x2715   :  { %9015 = vmatmul.mubr.bf16.vlgmr.msra.gmra.mrb[136].mxu0 %v6662_v9 }
0x2716   :  { %7172 = vmatprep.mubr.bf16.mxu0 %v9969_v0  ;;  %7141 = vmatpush1.bf16.msra.mxu0 %v9753_v7  ;;  %v9784_v7 = vld [vmem:[%s10915_s24 + $0x78] sm:$0xff]  }
0x2717   :  { %7142 = vmatprep.subr.bf16.mxu0 %v9758_v31 }
0x271a   :  { %7143 = vmatpush1.bf16.msra.mxu0 %v9756_v8 }
0x271b   :  { %7144 = vmatprep.subr.bf16.mxu0 %v9761_v34 }
0x271e   :  { %v9032_v63 = vpop.f32.mrb[152].mxu1  ;;  %7145 = vmatpush1.bf16.msra.mxu0 %v9759_v53 }
0x271f   :  { %v6894_v45 = vpop.f32.mrb[153].mxu1  ;;  %v6909_v14 = vpack.c.bf16 %v9032_v63, %v9032_v63  ;;  %v9777_v63 = vld [vmem:[%s10915_s24 + $0x40] sm:$0xff]  }
0x2720   :  { %v9033_v57 = vpop.f32.mrb[154].mxu1  ;;  %9054 = vmatprep.subr.bf16.mxu1 %v9777_v63 }
0x2721   :  { %v6897_v54 = vpop.f32.mrb[155].mxu1  ;;  %v9779_v57 = vld [vmem:[%s10915_s24 + $0x50] sm:$0xff]  }
0x2722   :  { %v6908_v59 = vpack.c.bf16 %v6897_v54, %v6894_v45  ;;  %v9778_v45 = vld [vmem:[%s10915_s24 + $0x48] sm:$0xff]   ;;  %v9780_v54 = vld [vmem:[%s10915_s24 + $0x58] sm:$0xff]  }
0x2724   :  { %9050 = vmatprep.mubr.bf16.mxu1 %v6908_v59  ;;  %v9782_v59 = vld [vmem:[%s10915_s24 + $0x68] sm:$0xff]  }
0x2725   :  { %9051 = vmatmul.mubr.bf16.vlgmr.msra.gmra.mrb[156].mxu1 %v6909_v14  ;;  %v9783_v14 = vld [vmem:[%s10915_s24 + $0x70] sm:$0xff]  }
0x2726   :  { %9055 = vmatpush3.bf16.msra.mxu1 %v9777_v63 }
0x2727   :  { %9056 = vmatprep.subr.bf16.mxu1 %v9778_v45 }
0x272a   :  { %9057 = vmatpush3.bf16.msra.mxu1 %v9778_v45 }
0x272b   :  { %9058 = vmatprep.subr.bf16.mxu1 %v9779_v57 }
0x272e   :  { %9059 = vmatpush3.bf16.msra.mxu1 %v9779_v57  ;;  %v8238_v57 = vld [vmem:[%s7512_s3] ss:$0 sm:$0xff] }
0x272f   :  { %9060 = vmatprep.subr.bf16.mxu1 %v9780_v54 }
0x2732   :  { %9061 = vmatpush3.bf16.msra.mxu1 %v9780_v54 }
0x27e8   :  { %v9016_v52 = vpop.f32.mrb[136].mxu0 }
0x27e9   :  { %v6761_v21 = vadd.f32 %v9016_v52, %v11196_v15  ;;  %v6745_v3 = vpop.f32.mrb[137].mxu0 }
0x27ea   :  { %v6759_v62 = vadd.f32 %v6745_v3, %v11198_v24  ;;  %v9017_v12 = vpop.f32.mrb[138].mxu0 }
0x27eb   :  { %v6748_v20 = vpop.f32.mrb[139].mxu0 }
0x27ec   :  { %v6760_v61 = vadd.f32 %v6748_v20, %v11200_v6 }
0x27f8   :  { %v9052_v17 = vpop.f32.mrb[156].mxu1 }
0x27f9   :  { %v7008_v19 = vadd.f32 %v9052_v17, %v6761_v21  ;;  %v6992_v50 = vpop.f32.mrb[157].mxu1 }
0x27fa   :  { %v7006_v1 = vadd.f32 %v6992_v50, %v6759_v62  ;;  %v9053_v29 = vpop.f32.mrb[158].mxu1 }
0x27fb   :  { %v6995_v58 = vpop.f32.mrb[159].mxu1  ;;  %v11254_v24 = vadd.f32 %v7008_v19, %v10942_v38  ;;  %v9764_v38 = vld [vmem:[%s10865_s16 + $0xb4] ss:$8 sps:$4 sm:$0xff]  }
0x27fc   :  { %v11251_v28 = vadd.f32 %v7006_v1, %v10939_v32  ;;  %v7007_v15 = vadd.f32 %v6995_v58, %v6760_v61  ;;  %7146 = vmatprep.subr.bf16.mxu0 %v9764_v38 }
0x27fd   :  { %v7015_v32 = vmul.f32 %v11254_v24, %v11254_v24  ;;  %7147 = vmatpush1.bf16.msra.mxu0 %v9762_v25 }
0x27fe   :  { %v11257_v6 = vadd.f32 %v7007_v15, %v10945_v39  ;;  %v7013_v5 = vmul.f32 %v11251_v28, %v11251_v28  ;;  %v9767_v39 = vld [vmem:[%s10865_s16 + $0xc4] ss:$8 sps:$4 sm:$0xff]  }
0x27ff   :  { %7148 = vmatprep.subr.bf16.mxu0 %v9767_v39 }
0x2800   :  { %7016 = vadd.xlane.f32.xlu0 %v7013_v5  ;;  %v7014_v23 = vmul.f32 %v11257_v6, %v11257_v6 }
0x2801   :  { %7149 = vmatpush1.bf16.msra.mxu0 %v9765_v30 }
0x2802   :  { %7018 = vadd.xlane.f32.xlu1 %v7014_v23  ;;  %7150 = vmatprep.subr.bf16.mxu0 %v9770_v4 }
0x2804   :  { %7020 = vadd.xlane.f32.xlu0 %v7015_v32 }
0x2805   :  { %7151 = vmatpush1.bf16.msra.mxu0 %v9768_v33 }
0x2806   :  { %7152 = vmatprep.subr.bf16.mxu0 %v9773_v35  ;;  %v9785_v35 = vld [vmem:[%s11291_s29] sm:$0xff]  }
0x2809   :  { %7153 = vmatpush1.bf16.msra.mxu0 %v9771_v43  ;;  %v9786_v43 = vld [vmem:[%s11291_s29 + $0x8] sm:$0xff]  }
0x280a   :  { %7154 = vmatprep.subr.bf16.mxu0 %v9776_v46 }
0x280d   :  { %7155 = vmatpush1.bf16.msra.mxu0 %v9774_v51 }
0x280e   :  { %9074 = vmatprep.subr.bf16.mxu0 %v9785_v35 }
0x288d   :  { %v7017_v49 = vpop.xlane.xlu0 %7016 }
0x288e   :  { %v7022_v48 = vmul.f32 0.03125, %v7017_v49 }
0x288f   :  { %v7019_v37 = vpop.xlane.xlu1 %7018 }
0x2890   :  { %v7025_v40 = vadd.f32 1e-06, %v7022_v48  ;;  %v7023_v55 = vmul.f32 0.03125, %v7019_v37 }
0x2891   :  { %v7021_v56 = vpop.xlane.xlu0 %7020 }
0x2892   :  { %9945 = vrsqrt.f32 %v7025_v40  ;;  %v7026_v47 = vadd.f32 1e-06, %v7023_v55  ;;  %v7024_v16 = vmul.f32 0.03125, %v7021_v56 }
0x2894   :  { %9947 = vrsqrt.f32 %v7026_v47  ;;  %v7027_v11 = vadd.f32 1e-06, %v7024_v16 }
0x2896   :  { %9949 = vrsqrt.f32 %v7027_v11  ;;  %v9787_v11 = vld [vmem:[%s11291_s29 + $0x10] sm:$0xff]  }
0x289c   :  { %v9946_v26 = vpop.eup %9945 }
0x289d   :  { %v7031_v27 = vmul.f32 %v9946_v26, %v11251_v28  ;;  %v9789_v26 = vld [vmem:[%s11291_s29 + $0x20] sm:$0xff]  }
0x289e   :  { %v9948_v2 = vpop.eup %9947 }
0x289f   :  { %v7032_v18 = vmul.f32 %v9948_v2, %v11257_v6  ;;  %v7038_v42 = vmul.f32 %v8178_v36, %v7031_v27  ;;  %v9792_v27 = vld [vmem:[%s11291_s29 + $0x38] sm:$0xff]  }
0x28a0   :  { %v9950_v41 = vpop.eup %9949 }
0x28a1   :  { %v7039_v44 = vmul.f32 %v8178_v36, %v7032_v18  ;;  %v7033_v22 = vmul.f32 %v9950_v41, %v11254_v24 }
0x28a3   :  { %v7041_v13 = vpack.c.bf16 %v7039_v44, %v7038_v42  ;;  %v7040_v10 = vmul.f32 %v8178_v36, %v7033_v22 }
0x28a5   :  { %7173 = vmatmul.mubr.bf16.vlgmr.msra.gmra.mrb[140].mxu0 %v7041_v13  ;;  %v7042_v9 = vpack.c.bf16 %v7040_v10, %v7040_v10 }
0x28a6   :  { %7182 = vmatprep.mubr.bf16.mxu0 %v9969_v0  ;;  %v9781_v0 = vld [vmem:[%s10915_s24 + $0x60] sm:$0xff]   ;;  %9075 = vmatpush3.bf16.msra.mxu0 %v9785_v35 }
0x28a7   :  { %9062 = vmatprep.subr.bf16.mxu1 %v9781_v0  ;;  %9076 = vmatprep.subr.bf16.mxu0 %v9786_v43 }
0x28a8   :  { %9063 = vmatpush3.bf16.msra.mxu1 %v9781_v0 }
0x28a9   :  { %9064 = vmatprep.subr.bf16.mxu1 %v9782_v59 }
0x28aa   :  { %9077 = vmatpush3.bf16.msra.mxu0 %v9786_v43 }
0x28ab   :  { %9078 = vmatprep.subr.bf16.mxu0 %v9787_v11 }
0x28ac   :  { %9065 = vmatpush3.bf16.msra.mxu1 %v9782_v59 }
0x28ad   :  { %7183 = vmatmul.mubr.bf16.gmra.mrb[144].mxu0 %v7042_v9  ;;  %9066 = vmatprep.subr.bf16.mxu1 %v9783_v14 }
0x28ae   :  { %9079 = vmatpush3.bf16.msra.mxu0 %v9787_v11 }
0x28b0   :  { %9067 = vmatpush3.bf16.msra.mxu1 %v9783_v14 }
0x28b1   :  { %9068 = vmatprep.subr.bf16.mxu1 %v9784_v7 }
0x28b4   :  { %9069 = vmatpush3.bf16.msra.mxu1 %v9784_v7 }
0x2978   :  { %v7174_v60 = vpop.f32.mrb[140].mxu0 }
0x2979   :  { %v8211_v31 = vmul.f32 -1.442695, %v7174_v60  ;;  %v7176_v8 = vpop.f32.mrb[141].mxu0 }
0x297a   :  { %v7178_v34 = vpop.f32.mrb[142].mxu0 }
0x297b   :  { %9951 = vpow2.f32 %v8211_v31  ;;  %v8212_v53 = vmul.f32 -1.442695, %v7178_v34  ;;  %v7180_v52 = vpop.f32.mrb[143].mxu0 }
0x297d   :  { %9953 = vpow2.f32 %v8212_v53 }
0x2980   :  { %v7184_v21 = vpop.f32.mrb[144].mxu0 }
0x2981   :  { %v8213_v3 = vmul.f32 -1.442695, %v7184_v21  ;;  %v7186_v62 = vpop.f32.mrb[145].mxu0 }
0x2982   :  { %v7188_v12 = vpop.f32.mrb[146].mxu0 }
0x2983   :  { %9955 = vpow2.f32 %v8213_v3  ;;  %v7189_v20 = vpop.f32.mrb[147].mxu0 }
0x2985   :  { %v9952_v61 = vpop.eup %9951 }
0x2986   :  { %v7200_v17 = vadd.f32 1.0, %v9952_v61 }
0x2987   :  { %v9954_v19 = vpop.eup %9953 }
0x2988   :  { %9957 = vrcp.f32 %v7200_v17  ;;  %v7201_v50 = vadd.f32 1.0, %v9954_v19 }
0x298a   :  { %9959 = vrcp.f32 %v7201_v50 }
0x298d   :  { %v9956_v1 = vpop.eup %9955 }
0x298e   :  { %v7202_v29 = vadd.f32 1.0, %v9956_v1 }
0x2990   :  { %9961 = vrcp.f32 %v7202_v29 }
0x2992   :  { %v9958_v58 = vpop.eup %9957 }
0x2993   :  { %v7209_v15 = vmul.f32 %v9958_v58, %v7174_v60 }
0x2994   :  { %v9960_v5 = vpop.eup %9959 }
0x2995   :  { %v7212_v23 = vmul.f32 %v7209_v15, %v7176_v8  ;;  %v7210_v32 = vmul.f32 %v9960_v5, %v7178_v34 }
0x2997   :  { %v7213_v38 = vmul.f32 %v7210_v32, %v7180_v52 }
0x2999   :  { %v7215_v25 = vpack.c.bf16 %v7213_v38, %v7212_v23 }
0x299a   :  { %v9962_v39 = vpop.eup %9961 }
0x299b   :  { %v7211_v30 = vmul.f32 %v9962_v39, %v7184_v21  ;;  %9070 = vmatprep.mubr.bf16.mxu1 %v7215_v25 }
0x299d   :  { %v7214_v33 = vmul.f32 %v7211_v30, %v7186_v62 }
0x299f   :  { %v7216_v4 = vpack.c.bf16 %v7214_v33, %v7214_v33 }
0x29a1   :  { %9071 = vmatmul.mubr.bf16.vlgmr.msra.gmra.mrb[160].mxu1 %v7216_v4 }
0x2a74   :  { %v9072_v46 = vpop.f32.mrb[160].mxu1 }
0x2a75   :  { %v7316_v51 = vpop.f32.mrb[161].mxu1  ;;  %v7332_v40 = vadd.f32 %v9072_v46, %v11254_v24  ;;  %v9790_v24 = vld [vmem:[%s11291_s29 + $0x28] sm:$0xff]  }
0x2a76   :  { %v7330_v49 = vadd.f32 %v7316_v51, %v11251_v28  ;;  %v9073_v48 = vpop.f32.mrb[162].mxu1  ;;  %v9788_v28 = vld [vmem:[%s11291_s29 + $0x18] sm:$0xff]  }
0x2a77   :  { %v7319_v37 = vpop.f32.mrb[163].mxu1  ;;  %v7336_v16 = vmul.f32 %v7332_v40, %v7332_v40  ;;  %9080 = vmatprep.subr.bf16.mxu0 %v9788_v28 }
0x2a78   :  { %v7331_v55 = vadd.f32 %v7319_v37, %v11257_v6  ;;  %v7334_v56 = vmul.f32 %v7330_v49, %v7330_v49  ;;  %9081 = vmatpush3.bf16.msra.mxu0 %v9788_v28  ;;  %v9791_v6 = vld [vmem:[%s11291_s29 + $0x30] sm:$0xff]  }
0x2a79   :  { %9082 = vmatprep.subr.bf16.mxu0 %v9789_v26 }
0x2a7a   :  { %7337 = vadd.xlane.f32.xlu1 %v7334_v56  ;;  %v7335_v47 = vmul.f32 %v7331_v55, %v7331_v55 }
0x2a7c   :  { %7339 = vadd.xlane.f32.xlu0 %v7335_v47  ;;  %9083 = vmatpush3.bf16.msra.mxu0 %v9789_v26 }
0x2a7d   :  { %9084 = vmatprep.subr.bf16.mxu0 %v9790_v24 }
0x2a7e   :  { %7341 = vadd.xlane.f32.xlu1 %v7336_v16 }
0x2a80   :  { %9085 = vmatpush3.bf16.msra.mxu0 %v9790_v24 }
0x2a81   :  { %9086 = vmatprep.subr.bf16.mxu0 %v9791_v6 }
0x2a84   :  { %9087 = vmatpush3.bf16.msra.mxu0 %v9791_v6 }
0x2a85   :  { %9088 = vmatprep.subr.bf16.mxu0 %v9792_v27 }
0x2a88   :  { %9089 = vmatpush3.bf16.msra.mxu0 %v9792_v27 }
0x2b07   :  { %v7338_v2 = vpop.xlane.xlu1 %7337 }
0x2b08   :  { %v7343_v36 = vmul.f32 0.03125, %v7338_v2 }
0x2b09   :  { %v7340_v18 = vpop.xlane.xlu0 %7339 }
0x2b0a   :  { %v7346_v41 = vadd.f32 1e-06, %v7343_v36  ;;  %v7344_v42 = vmul.f32 0.03125, %v7340_v18 }
0x2b0b   :  { %v7342_v44 = vpop.xlane.xlu1 %7341 }
0x2b0c   :  { %9963 = vrsqrt.f32 %v7346_v41  ;;  %v7347_v13 = vadd.f32 1e-06, %v7344_v42  ;;  %v7345_v22 = vmul.f32 0.03125, %v7342_v44 }
0x2b0e   :  { %9965 = vrsqrt.f32 %v7347_v13  ;;  %v7348_v10 = vadd.f32 1e-06, %v7345_v22 }
0x2b10   :  { %9967 = vrsqrt.f32 %v7348_v10 }
0x2b16   :  { %v9964_v9 = vpop.eup %9963 }
0x2b17   :  { %v7352_v63 = vmul.f32 %v9964_v9, %v7330_v49 }
0x2b18   :  { %v9966_v45 = vpop.eup %9965 }
0x2b19   :  { %v7353_v54 = vmul.f32 %v9966_v45, %v7331_v55  ;;  %v7361_v14 = vmul.f32 %v8238_v57, %v7352_v63 }
0x2b1a   :  { %v9968_v0 = vpop.eup %9967 }
0x2b1b   :  { %v7354_v59 = vmul.f32 %v9968_v0, %v7332_v40  ;;  %v7362_v7 = vmul.f32 %v8238_v57, %v7353_v54 }
0x2b1d   :  { %v7363_v60 = vmul.f32 %v8238_v57, %v7354_v59  ;;  %v7364_v31 = vpack.c.bf16 %v7362_v7, %v7361_v14 }
0x2b1f   :  { %v7365_v8 = vpack.c.bf16 %v7363_v60, %v7363_v60  ;;  %9090 = vmatprep.mubr.bf16.mxu0 %v7364_v31 }
0x2b21   :  { %9091 = vmatmul.mubr.bf16.vlgmr.msra.gmra.mrb[148].mxu0 %v7365_v8 }
0x2bf4   :  { %v9092_v34 = vpop.f32.mrb[148].mxu0 }
0x2bf5   :  { %7480 = vst [vmem:[%s7514_s7 + $0x10] sm:$0xff] %v9092_v34  ;;  %v7464_v53 = vpop.f32.mrb[149].mxu0 }
0x2bf6   :  { %7478 = vst [vmem:[%s7514_s7] sm:$0xff] %v7464_v53  ;;  %v9093_v52 = vpop.f32.mrb[150].mxu0 }
0x2bf7   :  { %v7467_v21 = vpop.f32.mrb[151].mxu0 }
0x2bf8   :  { %7479 = vst [vmem:[%s7514_s7 + $0x8] sm:$0xff] %v7467_v21 }

</bundles_post_ra>
